<compile_context>
chip_gen: v7x
topology: tpu7x:2x2x1
jax: 0.10.0
libtpu: 0.0.40
codegen_flags: <defaults>
</compile_context>

<pallas_src>
import jax
import jax.numpy as jnp
import numpy as np
from jax.experimental import pallas as pl
from jax.experimental.pallas import tpu as pltpu

BPS_DIM = 512
CSE_DIM = 16
LATENT_DIM = 128
HALF = CSE_DIM // 2              # 8  bimanual channels per hand
CORR_IN = HALF - 1               # 7  corrMapFinal input dim
OUT_B = CSE_DIM * BPS_DIM        # 8192 bimanualFinal output dim
OUT_C = CSE_DIM + 1              # 17 channels per hand after contact/corr heads
OUT_F = 2 * OUT_C * BPS_DIM      # 17408 fused output columns, ordered (p, h, c)


def _fused_kernel(x_ref, w_ref, b_ref, o_ref):
    # x: (TN, LATENT) bf16 ; w: (LATENT, CB) bf16 ; b: (1, CB) f32 ; o: (TN, CB).
    # f32 accumulate + bias, cast on the single unmasked lane-dense store.
    acc = jnp.dot(x_ref[...], w_ref[...], preferred_element_type=jnp.float32)
    o_ref[...] = (acc + b_ref[...]).astype(o_ref.dtype)


def prepare_fused_params(params):
    """Fold contactMapFinal / corrMapFinal into the bimanualFinal weight.

    Call once outside the hot path (exact f32 composition; both heads are linear
    in the 8 per-hand bimanual channels).  Returns bf16 weight + f32 bias.
    """
    wb = params["wb"].astype(jnp.float32)        # (OUT_B, LATENT), row o = p*16 + h*8 + k
    bb = params["bb"].astype(jnp.float32)        # (OUT_B,)
    wc = params["wc"].astype(jnp.float32)        # (1, 1)   contactMapFinal.weight
    bc = params["bc"].astype(jnp.float32)        # (1,)     contactMapFinal.bias
    wcorr = params["wcorr"].astype(jnp.float32)  # (CSE, 7) corrMapFinal.weight
    bcorr = params["bcorr"].astype(jnp.float32)  # (CSE,)   corrMapFinal.bias

    # post[k, c]: fused output channel c from per-hand bimanual channel k.
    post = jnp.zeros((HALF, OUT_C), jnp.float32)
    post = post.at[0, 0].set(wc[0, 0])           # contact head: k=0 -> c=0
    post = post.at[1:, 1:].set(wcorr.T)          # corr head:   k=1..7 -> c=1..16
    b_post = jnp.concatenate([bc, bcorr])        # (OUT_C,)

    wb_r = wb.reshape(BPS_DIM, 2, HALF, LATENT_DIM)   # (p, h, k, l)
    bb_r = bb.reshape(BPS_DIM, 2, HALF)               # (p, h, k)

    w_f = jnp.einsum("phkl,kc->lphc", wb_r, post).reshape(LATENT_DIM, OUT_F)
    b_f = (jnp.einsum("phk,kc->phc", bb_r, post) + b_post).reshape(1, OUT_F)
    # Keep weight in bf16 (MXU-native); bias stays f32 for the f32 accumulate path.
    return dict(w=w_f.astype(jnp.bfloat16), b=b_f)


def _round_up(v, m):
    return (v + m - 1) // m * m


def output_process_cemap(x, prepared, *, tn=512, n_col=2, out_dtype=jnp.bfloat16):
    """x: (seqlen, bs, latent) -> (bs, seqlen, bps, 2, cse+1) in `out_dtype`."""
    seqlen, bs, lat = x.shape
    assert lat == LATENT_DIM
    assert OUT_F % n_col == 0 and (OUT_F // n_col) % 128 == 0
    n = seqlen * bs
    cb = OUT_F // n_col          # 8704 = 68 * 128 lane-aligned column block

    # Reorder rows on the INPUT side (128x smaller than the output) so the kernel
    # already emits rows in (bs, seqlen) order -> no post-kernel output transpose.
    x2 = jnp.transpose(x, (1, 0, 2)).reshape(n, LATENT_DIM).astype(jnp.bfloat16)

    # Multiple of 16 rows keeps bf16 (16,128) vreg tiles whole for small n.
    tn_eff = min(tn, max(16, _round_up(n, 16)))
    grid_rows = pl.cdiv(n, tn_eff)   # partial boundary block is masked by Pallas

    out_bytes = jnp.dtype(out_dtype).itemsize
    cost = pl.CostEstimate(
        flops=2 * n * LATENT_DIM * OUT_F,
        transcendentals=0,
        bytes_accessed=(n * OUT_F * out_bytes            # output writes (dominant)
                        + n * LATENT_DIM * 2             # x read (bf16)
                        + LATENT_DIM * OUT_F * 2         # fused weight read (bf16)
                        + OUT_F * 4),                    # fused bias read (f32)
    )

    # VMEM @ tn=512, n_col=2, bf16 out: out 2*8.5 MiB + weight 2*2.13 MiB + bias/x
    # ~0.3 MiB ~= 21.7 MiB (f32 out: ~38.7 MiB) -> fits v7x 64 MiB; explicit limit
    # matters on v5e (16 MiB default scoped VMEM).
    out = pl.pallas_call(
        _fused_kernel,
        out_shape=jax.ShapeDtypeStruct((n, OUT_F), out_dtype),
        grid=(n_col, grid_rows),     # column axis OUTER: weight slab resident per half
        in_specs=[
            pl.BlockSpec((tn_eff, LATENT_DIM), lambda c, r: (r, 0)),
            pl.BlockSpec((LATENT_DIM, cb), lambda c, r: (0, c)),   # constant over r
            pl.BlockSpec((1, cb), lambda c, r: (0, c)),            # constant over r
        ],
        out_specs=pl.BlockSpec((tn_eff, cb), lambda c, r: (r, c)),
        compiler_params=pltpu.CompilerParams(
            dimension_semantics=("parallel", "parallel"),  # disjoint output blocks
            vmem_limit_bytes=48 * 1024 * 1024,
        ),
        cost_estimate=cost,
    )(x2, prepared["w"], prepared["b"])

    # Rows are (bs, seqlen)-ordered and columns (p, h, c)-ordered -> free reshape.
    return out.reshape(bs, seqlen, BPS_DIM, 2, OUT_C)


def reference(x, wb, bb, wc, bc, wcorr, bcorr):
    """Pure-JAX mirror of the PyTorch forward, for validation."""
    seqlen, bs, _ = x.shape
    out = jnp.einsum("sbl,ol->sbo", x, wb) + bb
    out = out.reshape(seqlen, bs, BPS_DIM, 2, HALF)

    def branch(o):  # o: (s, b, BPS, HALF)
        c = o[..., 0:1] * wc[0, 0] + bc[0]
        e = jnp.einsum("sbpk,ck->sbpc", o[..., 1:], wcorr) + bcorr
        return jnp.concatenate([c, e], axis=-1)

    o1 = branch(out[..., 0, :])[..., None, :]
    o2 = branch(out[..., 1, :])[..., None, :]
    o = jnp.concatenate([o1, o2], axis=-2)          # (s, b, BPS, 2, CSE+1)
    return jnp.transpose(o, (1, 0, 2, 3, 4))        # (b, s, BPS, 2, CSE+1)


if __name__ == "__main__":
    # deterministic parameter init (PyTorch-Linear-style uniform(+-1/sqrt(fan_in)))
    pkey = jax.random.PRNGKey(42)
    ks = jax.random.split(pkey, 6)

    def uni(k, shape, fan_in):
        bound = 1.0 / float(np.sqrt(fan_in))
        return jax.random.uniform(k, shape, jnp.float32, -bound, bound)

    params = dict(
        wb=uni(ks[0], (OUT_B, LATENT_DIM), LATENT_DIM),
        bb=uni(ks[1], (OUT_B,), LATENT_DIM),
        wc=uni(ks[2], (1, 1), 1),
        bc=uni(ks[3], (1,), 1),
        wcorr=uni(ks[4], (CSE_DIM, CORR_IN), CORR_IN),
        bcorr=uni(ks[5], (CSE_DIM,), CORR_IN),
    )
    prepared = jax.block_until_ready(prepare_fused_params(params))

    # 1) small-shape check (n=16 -> single 16-row tile, 2 column blocks), bf16 output.
    seqlen, bs = 8, 2
    x = jax.random.normal(jax.random.PRNGKey(0), (seqlen, bs, LATENT_DIM), jnp.float32)
    out = jax.block_until_ready(output_process_cemap(x, prepared))
    assert out.shape == (bs, seqlen, BPS_DIM, 2, CSE_DIM + 1), out.shape
    assert out.dtype == jnp.bfloat16, out.dtype
    ref = jax.block_until_ready(reference(x, **params))
    np.testing.assert_allclose(np.asarray(out.astype(jnp.float32)), np.asarray(ref),
                               atol=3e-2, rtol=3e-2)

    # 2) exercise multi-row-block + masked partial boundary block (n=300, tn=128 ->
    #    3 row blocks, last block 44 valid rows), f32 output path.
    seqlen2, bs2 = 100, 3
    x2 = jax.random.normal(jax.random.PRNGKey(1), (seqlen2, bs2, LATENT_DIM), jnp.float32)
    out2 = jax.block_until_ready(
        output_process_cemap(x2, prepared, tn=128, out_dtype=jnp.float32))
    assert out2.shape == (bs2, seqlen2, BPS_DIM, 2, CSE_DIM + 1), out2.shape
    ref2 = jax.block_until_ready(reference(x2, **params))
    np.testing.assert_allclose(np.asarray(out2), np.asarray(ref2), atol=2e-2, rtol=2e-2)

    print("KERNEL_OK")
</pallas_src>

<mosaic_0001>
module attributes {stable_mosaic.version = 11 : i64} {
  func.func @_fused_kernel(%arg0: i32, %arg1: i32, %arg2: memref<16x128xbf16, #tpu.memory_space<vmem>>, %arg3: memref<128x8704xbf16, #tpu.memory_space<vmem>>, %arg4: memref<1x8704xf32, #tpu.memory_space<vmem>>, %arg5: memref<16x8704xbf16, #tpu.memory_space<vmem>>) attributes {dimension_semantics = [#tpu.dimension_semantics<parallel>, #tpu.dimension_semantics<parallel>], iteration_bounds = array<i64: 2, 1>, scalar_prefetch = 0 : i64, scratch_operands = 0 : i64, tpu.core_type = #tpu.core_type<tc>, window_params = [{transform_indices = @transform_0, window_bounds = array<i64: 16, 128>}, {transform_indices = @transform_1, window_bounds = array<i64: 128, 8704>}, {transform_indices = @transform_2, window_bounds = array<i64: 1, 8704>}, {transform_indices = @transform_3, window_bounds = array<i64: 16, 8704>}]} {
    %c0 = arith.constant 0 : index
    %c0_0 = arith.constant 0 : index
    %0 = vector.load %arg2[%c0, %c0_0] : memref<16x128xbf16, #tpu.memory_space<vmem>>, vector<16x128xbf16>
    %c0_1 = arith.constant 0 : index
    %c0_2 = arith.constant 0 : index
    %1 = vector.load %arg3[%c0_1, %c0_2] : memref<128x8704xbf16, #tpu.memory_space<vmem>>, vector<128x8704xbf16>
    %cst = arith.constant dense<0.000000e+00> : vector<16x8704xf32>
    %2 = tpu.matmul %0, %1, %cst {dimension_numbers = #tpu.dot_dimension_numbers<[1], [0], [0], [1], [0, 0, 1, 1], [], []>} : vector<16x128xbf16>, vector<128x8704xbf16>, vector<16x8704xf32> -> vector<16x8704xf32>
    %c0_3 = arith.constant 0 : index
    %c0_4 = arith.constant 0 : index
    %3 = vector.load %arg4[%c0_3, %c0_4] : memref<1x8704xf32, #tpu.memory_space<vmem>>, vector<1x8704xf32>
    %4 = vector.broadcast %3 : vector<1x8704xf32> to vector<16x8704xf32>
    %5 = arith.addf %2, %4 : vector<16x8704xf32>
    %6 = arith.truncf %5 : vector<16x8704xf32> to vector<16x8704xbf16>
    %c0_5 = arith.constant 0 : index
    %c0_6 = arith.constant 0 : index
    %7 = vector.load %arg5[%c0_5, %c0_6] : memref<16x8704xbf16, #tpu.memory_space<vmem>>, vector<16x8704xbf16>
    tpu.vector_store %arg5[%c0_5, %c0_6], %6 {strides = array<i32>} : memref<16x8704xbf16, #tpu.memory_space<vmem>>, vector<16x8704xbf16>,
    return
  }
  func.func @transform_0(%arg0: i32, %arg1: i32) -> (i32, i32) {
    %c0_i32 = arith.constant 0 : i32
    %c0_i32_0 = arith.constant 0 : i32
    return %arg1, %c0_i32 : i32, i32
  }
  func.func @transform_1(%arg0: i32, %arg1: i32) -> (i32, i32) {
    %c0_i32 = arith.constant 0 : i32
    %c0_i32_0 = arith.constant 0 : i32
    return %c0_i32, %arg0 : i32, i32
  }
  func.func @transform_2(%arg0: i32, %arg1: i32) -> (i32, i32) {
    %c0_i32 = arith.constant 0 : i32
    %c0_i32_0 = arith.constant 0 : i32
    return %c0_i32, %arg0 : i32, i32
  }
  func.func @transform_3(%arg0: i32, %arg1: i32) -> (i32, i32) {
    %c0_i32 = arith.constant 0 : i32
    return %arg1, %arg0 : i32, i32
  }
}

</mosaic_0001>

<bundles_post_ra>
// kernel: tpu_custom_call.1
= control target key start
LH: loop header
LB: loop body
LE: loop exit
PB: predicated region body
PF: predicated region fallthrough
CT: control target
= control target key end

     0   :  { %s8896_s0 = inlined_call_operand.hbm [shape: bf16[16,128], index: 0, kind: input, shape index: {}]   ;;  %s8897_s1 = inlined_call_operand.hbm [shape: bf16[128,17408], index: 1, kind: input, shape index: {}]   ;;  %s8898_s2 = inlined_call_operand.hbm [shape: f32[1,17408], index: 2, kind: input, shape index: {}]   ;;  %s8899_s3 = inlined_call_operand.hbm [shape: bf16[16,17408], index: 3, kind: output, shape index: {}]  }
   0x1   :  { %8908 = sst [smem:[#allocation13_spill]] %s8897_s1 }
   0x2   :  { %8 = vsyncpa [#allocation3], 0 }
   0x3   :  { %9 = vsyncpa [#allocation6], 0 }
   0x4   :  { %11 = vsyncpa [#allocation6 + $0x1], 0 }
   0x5   :  { %12 = vsyncpa [#allocation4], 0 }
   0x6   :  { %14 = vsyncpa [#allocation4 + $0x1], 0  ;;  %s7787_s12 = smov 0   ;;  %s7789_s13 = smov 0  }
   0x7   :  { %s7791_s14 = smov 0   ;;  %s7793_s15 = smov 0  }
   0x8   :  { %s7795_s16 = smov 0   ;;  %s7797_s17 = smov 0  }
   0x9 LB: > { %s32_s18 = sadd.s32 1, %s7748_s16  ;;  %s65_s19 = sadd.s32 1, %s7740_s14  ;;  %s7752_s17 = sphi %s7797_s17, %s20_s17   ;;  %s7748_s16 = sphi %s7795_s16, %s8932_s16   ;;  %s7744_s15 = sphi %s7793_s15, %s8931_s15   ;;  %s7740_s14 = sphi %s7791_s14, %s8930_s14   ;;  %s7736_s13 = sphi %s7789_s13, %s8929_s13   ;;  %s7732_s12 = sphi %s7787_s12, %s8928_s12  }
   0xa   : > { %p34_p0 = scmp.ge.s32.totalorder %s32_s18, 2  ;;  %p72_p1 = scmp.ne.s32.totalorder %s7740_s14, %s7736_s13 }
   0xb   : > { %p73_p2 = scmp.eq.s32.totalorder %s7752_s17, 0  ;;  %p6697_p5 = scmp.lt.s32.totalorder %s7752_s17, 2 }
   0xc   : > { %s8934_s18 = smov (%p34_p0, %s32_s18), 0  ;;  %s172_s21 = sand.u32 1, %s7752_s17  }
   0xd   : > { %8909 = sst [smem:[#allocation12_spill]] %s8934_s18  ;;  %p74_p4 = por %p73_p2, %p72_p1 }
   0xe   : > { %s62_s20 = ssub.s32 %s7748_s16, %s8934_s18  ;;  %s174_s22 = sand.u32 1, %s7740_s14  }
   0xf   : > { %p63_p6 = scmp.eq.s32.totalorder %s62_s20, 0  ;;  %s6595_s23 = smul.u32 4352, %s7748_s16 }
  0x10   : > { %s6666_s25 = smul.u32 4352, %s174_s22  ;;  %s8910_s1 = sld [smem:[#allocation13_spill]] }
  0x11   : > { %s7835_s24 = scalar_select %p63_p6, %s7740_s14, %s65_s19  }
  0x12   : > { %p7844_p7 = pnand %p6697_p5, %p74_p4  ;;  %s176_s30 = scalar_lea.vmem [#allocation5], %s6666_s25 }
  0x13   : > { %s183_s4 = sshll.u32 %s176_s30, 4  ;;  %s7850_s5 = scalar_lea.sflag [#allocation6], %s172_s21  ;;  %s7848_s4 = int_to_ptr.vmem [resolvable:$true] %s183_s4 }
  0x14   : > { %s8911_s29 = scalar_select %p7844_p7, 1, 0 }
  0x15   : > { %p8902_p9 = pneg %p7844_p7 }
  0x16   : > { %s7842_s28 = scalar_lea.hbm %s8910_s1, %s6595_s23  ;;  %s7583_s9 = scalar_lea.hbm %s8910_s1, 139264 }
  0x17   : > { %s7578_s6 = scalar_lea.hbm %s7842_s28, 69632  ;;  %p7584_p12 = scmp.lt.u32.totalorder %s7842_s28, %s8910_s1 }
  0x18   : > { %p7579_p8 = scmp.ne.s32.totalorder %s7842_s28, %s7578_s6  ;;  %p7585_p13 = scmp.lt.u32.totalorder %s7583_s9, %s7578_s6 }
  0x19   : > { %p7587_p2 = scmp.lt.u32.totalorder %s7578_s6, %s7842_s28 }
  0x1a   : > { %p7581_p10 = pnand %p8902_p9, %p7579_p8  ;;  %p7586_p0 = por %p7585_p13, %p7584_p12 }
  0x1c   : > { %p7582_p11 = pneg %p7581_p10  ;;  %p7588_p4 = por %p7587_p2, %p7586_p0 }
  0x1e   : > { %p7589_p5 = pnand %p7588_p4, %p7582_p11 }
  0x20   : > { %7592 = shalt.err (!%p7589_p5)
}
  0x21   : > { %s7593_s19 = scalar_lea.vmem %s7848_s4, 69632  ;;  %s7754_s20 = smov [#allocation5]  }
  0x22   : > { %p7594_p6 = scmp.ne.s32.totalorder %s7848_s4, %s7593_s19  ;;  %s7598_s21 = sshll.u32 %s7754_s20, 4  ;;  %s7599_s21 = int_to_ptr.vmem [resolvable:$false] %s7598_s21 }
  0x23   : > { %s7600_s23 = scalar_lea.vmem %s7599_s21, 139264  ;;  %p7601_p3 = scmp.lt.s32.totalorder %s7848_s4, %s7599_s21 }
  0x24   : > { %p7596_p8 = pnand %p7594_p6, %p8902_p9  ;;  %p7602_p12 = scmp.lt.s32.totalorder %s7600_s23, %s7593_s19 }
  0x26   : > { %p7597_p10 = pneg %p7596_p8  ;;  %p7603_p13 = por %p7602_p12, %p7601_p3 }
  0x28   : > { %p7604_p0 = pnand %p7603_p13, %p7597_p10 }
  0x2a   : > { %7607 = shalt.err (!%p7604_p0)
}
  0x2b   : > { %s7755_s25 = smov 8704   ;;  %s7756_s26 = smov 4352  }
  0x2c   : > { %s7757_s27 = smov 272   ;;  %s7879_s30 = sadd.s32 4294967295, %s7752_s17  }
  0x2d   : > { %6688 = dma.hbm_to_vmem [thread:$0]  (!%p7844_p7), %s7842_s28, 69632, %s7848_s4, %s7850_s5, %s7755_s25, %s7756_s26, %s7757_s27  }
  0x2e   : > { %s5971_s6 = sadd.s32 4294967294, %s7752_s17   ;;  %p78_p3 = scmp.ne.s32.totalorder %s7736_s13, %s7732_s12 }
  0x2f   : > { %p8901_p11 = scmp.eq.s32.totalorder %s7879_s30, 0  ;;  %p130_p2 = scmp.eq.s32.totalorder %s7879_s30, 1 }
  0x30   : > { %p136_p4 = scmp.eq.s32.totalorder %s5971_s6, 1  ;;  %p5972_p6 = scmp.ge.s32.totalorder %s7752_s17, 1 }
  0x31   : > { %p7888_p5 = por %p8901_p11, %p78_p3  ;;  %p7896_p8 = por %p130_p2, %p72_p1 }
  0x32   : > { %p7900_p10 = por %p136_p4, %p78_p3  ;;  %p143_p12 = scmp.lt.s32.totalorder %s7752_s17, 3 }
  0x33   : > { %s8912_s7 = scalar_select %p7888_p5, 1, 0 }
  0x34   : > { %s8913_s28 = scalar_select %p7896_p8, 1, 0 }
  0x35   : > { %s8914_s4 = scalar_select %p7900_p10, 1, 0 }
  0x36   : > { %p7905_p13 = pnand %p5972_p6, %p143_p12  ;;  %s7758_s9 = smov [#allocation2]  }
  0x37   : > { %s158_s10 = sshll.u32 %s7758_s9, 4  ;;  %s6667_s11 = smul.u32 68, %s174_s22  ;;  %s7909_s10 = int_to_ptr.vmem [resolvable:$true] %s158_s10 }
  0x38   : > { %s8915_s8 = scalar_select %p7905_p13, 1, 0 }
  0x39   : > { %p6681_p0 = pneg %p7905_p13  ;;  %s6596_s19 = smul.u32 1088, %s7748_s16 }
  0x3a   : > { %s197_s26 = scalar_lea.vmem [#allocation7], %s6667_s11  ;;  %s7608_s22 = scalar_lea.hbm %s8896_s0, 128 }
  0x3b   : > { %p7918_p1 = pnand %p6681_p0, %p8901_p11  ;;  %s7925_s25 = scalar_lea.hbm %s8898_s2, %s6596_s19 }
  0x3c   : > { %s205_s27 = sshll.u32 %s197_s26, 4  ;;  %p7609_p3 = scmp.ne.s32.totalorder %s8896_s0, %s7608_s22  ;;  %s7927_s27 = int_to_ptr.vmem [resolvable:$true] %s205_s27 }
  0x3d   : > { %p7610_p2 = pneg %p7918_p1  ;;  %p7615_p12 = scmp.lt.u32.totalorder %s7608_s22, %s8896_s0 }
  0x3f   : > { %p7611_p4 = pnand %p7610_p2, %p7609_p3 }
  0x41   : > { %p7612_p6 = pneg %p7611_p4 }
  0x43   : > { %p7617_p0 = pnand %p7615_p12, %p7612_p6 }
  0x45   : > { %7620 = shalt.err (!%p7617_p0)
}
  0x46   : > { %s7621_s11 = scalar_lea.vmem %s7909_s10, 128  ;;  %p7629_p8 = scmp.lt.s32.totalorder %s7909_s10, %s7909_s10 }
  0x47   : > { %p7622_p11 = scmp.ne.s32.totalorder %s7909_s10, %s7621_s11  ;;  %p7630_p5 = scmp.lt.s32.totalorder %s7621_s11, %s7621_s11 }
  0x49   : > { %p7624_p9 = pnand %p7622_p11, %p7610_p2  ;;  %p7631_p13 = por %p7630_p5, %p7629_p8 }
  0x4b   : > { %p7625_p10 = pneg %p7624_p9 }
  0x4d   : > { %p7632_p7 = pnand %p7631_p13, %p7625_p10 }
  0x4f   : > { %7635 = shalt.err (!%p7632_p7)
}
  0x50   : > { %s7759_s1 = smov 64   ;;  %s7760_s18 = smov 4  }
  0x51   : > { %6684 = dma.hbm_to_vmem [thread:$0]  (!%p7918_p1), %s8896_s0, 128, %s7909_s10, [#allocation3], %s7759_s1, %s7759_s1, %s7760_s18  }
  0x52   : > { %s7636_s6 = scalar_lea.hbm %s7925_s25, 1088  ;;  %p8917_p11 = scmp.ne.s32.totalorder %s8911_s29, 0 }
  0x53   : > { %p7637_p9 = scmp.ne.s32.totalorder %s7925_s25, %s7636_s6  ;;  %s7641_s21 = scalar_lea.hbm %s8898_s2, 2176 }
  0x54   : > { %p8918_p5 = pneg %p8917_p11  ;;  %p7642_p10 = scmp.lt.u32.totalorder %s7925_s25, %s8898_s2 }
  0x55   : > { %p7643_p13 = scmp.lt.u32.totalorder %s7641_s21, %s7636_s6  ;;  %p7645_p2 = scmp.lt.u32.totalorder %s7636_s6, %s7925_s25 }
  0x56   : > { %p7639_p8 = pnand %p7637_p9, %p8918_p5 }
  0x57   : > { %p7644_p3 = por %p7643_p13, %p7642_p10 }
  0x58   : > { %p7640_p7 = pneg %p7639_p8 }
  0x59   : > { %p7646_p4 = por %p7645_p2, %p7644_p3 }
  0x5b   : > { %p7647_p6 = pnand %p7646_p4, %p7640_p7 }
  0x5d   : > { %7650 = shalt.err (!%p7647_p6)
}
  0x5e   : > { %s7651_s10 = scalar_lea.vmem %s7927_s27, 1088  ;;  %p8919_p12 = pmov %p8918_p5 }
  0x5f   : > { %p7652_p1 = scmp.ne.s32.totalorder %s7927_s27, %s7651_s10  ;;  %s7761_s20 = smov [#allocation7]  }
  0x60   : > { %s7656_s1 = sshll.u32 %s7761_s20, 4  ;;  %s7657_s1 = int_to_ptr.vmem [resolvable:$false] %s7656_s1 }
  0x61   : > { %p7654_p0 = pnand %p7652_p1, %p8919_p12  ;;  %s7658_s18 = scalar_lea.vmem %s7657_s1, 2176 }
  0x62   : > { %p7659_p5 = scmp.lt.s32.totalorder %s7927_s27, %s7657_s1  ;;  %p7660_p8 = scmp.lt.s32.totalorder %s7658_s18, %s7651_s10 }
  0x63   : > { %p7655_p9 = pneg %p7654_p0 }
  0x64   : > { %p7661_p10 = por %p7660_p8, %p7659_p5 }
  0x66   : > { %p7662_p13 = pnand %p7661_p10, %p7655_p9 }
  0x68   : > { %7665 = shalt.err (!%p7662_p13)
}
  0x69   : > { %6691 = dma.hbm_to_vmem [thread:$0]  (!%p8917_p11), %s7925_s25, 1088, %s7927_s27, %s7850_s5  }
  0x6a   : > { %p8920_p7 = scmp.ne.s32.totalorder %s8915_s8, 0 }
  0x6b   : > { %p8921_p3 = scmp.eq.s32.totalorder (!%p8920_p7), %s7879_s30, 0 }
  0x6c   : > { %214 = sbr.rel (%p8920_p7) target bundleno = 902 (0x386), region = 32 }
  0x73   : > { %7719 = dma.done.wait (%p8921_p3), [#allocation3], 128   ;;  %p8922_p2 = pmov %p8921_p3 }
  0x74   : > { %s220_s19 = sand.u32 1, %s7879_s30   ;;  %s7982_s26 = sand.u32 1, %s7736_s13  }
  0x75   : > { %7721 = vsyncadd (%p8922_p2), [#allocation3], 4294967168  ;;  %s6668_s29 = smul.u32 4352, %s7982_s26  ;;  %s221_s6 = scalar_lea.sflag [#allocation6], %s220_s19 }
  0x76   : > { %p8923_p11 = scmp.ne.s32.totalorder %s8912_s7, 0 }
  0x77   : > { %s7985_s9 = scalar_lea.vmem [#allocation5], %s6668_s29 }
  0x78   : > { %7723 = dma.done.wait (%p8923_p11), %s221_s6, 70720  }
  0x79   : > { %7725 = vsyncadd (%p8923_p11), %s221_s6, 4294896576  ;;  %v7762_v0 = vmov 0   ;;  %v6758_v1 = vld [vmem:[%s7985_s9 + $0x4] ss:$272 sps:$4 sm:$0xff]   ;;  %v6760_v2 = vld [vmem:[%s7985_s9 + $0xc] ss:$272 sps:$4 sm:$0xff]  }
  0x7a   : > { %3929 = vmatprep.mubr.bf16.mxu0 %v7762_v0  ;;  %3972 = vmatprep.mubr.bf16.mxu1 %v7762_v0  ;;  %v6762_v3 = vld [vmem:[%s7985_s9] ss:$272 sps:$4 sm:$0xff]   ;;  %v6763_v4 = vld [vmem:[%s7985_s9 + $0x8] ss:$272 sps:$4 sm:$0xff]   ;;  %v6764_v5 = vld [vmem:[%s7985_s9 + $0x224] ss:$272 sps:$4 sm:$0xff]  }
  0x7b   : > { %3897 = vmatprep.subr.bf16.mxu0 %v6758_v1  ;;  %3940 = vmatprep.subr.bf16.mxu1 %v6760_v2  ;;  %v6766_v6 = vld [vmem:[%s7985_s9 + $0x22c] ss:$272 sps:$4 sm:$0xff]   ;;  %v6768_v7 = vld [vmem:[%s7985_s9 + $0x220] ss:$272 sps:$4 sm:$0xff]   ;;  %v6769_v8 = vld [vmem:[%s7985_s9 + $0x228] ss:$272 sps:$4 sm:$0xff]  }
  0x7c   : > { %3898 = vmatpush1.bf16.msra.mxu0 %v6762_v3  ;;  %3941 = vmatpush1.bf16.msra.mxu1 %v6763_v4  ;;  %v6770_v9 = vld [vmem:[%s7985_s9 + $0x444] ss:$272 sps:$4 sm:$0xff]   ;;  %v6772_v10 = vld [vmem:[%s7985_s9 + $0x44c] ss:$272 sps:$4 sm:$0xff]   ;;  %v6774_v11 = vld [vmem:[%s7985_s9 + $0x440] ss:$272 sps:$4 sm:$0xff]  }
  0x7d   : > { %3899 = vmatprep.subr.bf16.mxu0 %v6764_v5  ;;  %3942 = vmatprep.subr.bf16.mxu1 %v6766_v6  ;;  %v6775_v12 = vld [vmem:[%s7985_s9 + $0x448] ss:$272 sps:$4 sm:$0xff]   ;;  %v6776_v13 = vld [vmem:[%s7985_s9 + $0x664] ss:$272 sps:$4 sm:$0xff]   ;;  %v6778_v14 = vld [vmem:[%s7985_s9 + $0x66c] ss:$272 sps:$4 sm:$0xff]  }
  0x7e   : > { %v6780_v15 = vld [vmem:[%s7985_s9 + $0x660] ss:$272 sps:$4 sm:$0xff]   ;;  %v6781_v16 = vld [vmem:[%s7985_s9 + $0x668] ss:$272 sps:$4 sm:$0xff]   ;;  %v6782_v17 = vld [vmem:[%s7985_s9 + $0x884] ss:$272 sps:$4 sm:$0xff]  }
  0x7f   : > { %v6784_v18 = vld [vmem:[%s7985_s9 + $0x88c] ss:$272 sps:$4 sm:$0xff]   ;;  %v6786_v19 = vld [vmem:[%s7985_s9 + $0x880] ss:$272 sps:$4 sm:$0xff]   ;;  %v6787_v20 = vld [vmem:[%s7985_s9 + $0x888] ss:$272 sps:$4 sm:$0xff]  }
  0x80   : > { %3900 = vmatpush1.bf16.msra.mxu0 %v6768_v7  ;;  %3943 = vmatpush1.bf16.msra.mxu1 %v6769_v8  ;;  %v6788_v21 = vld [vmem:[%s7985_s9 + $0xaa4] ss:$272 sps:$4 sm:$0xff]   ;;  %v6790_v22 = vld [vmem:[%s7985_s9 + $0xaac] ss:$272 sps:$4 sm:$0xff]   ;;  %v6792_v23 = vld [vmem:[%s7985_s9 + $0xaa0] ss:$272 sps:$4 sm:$0xff]  }
  0x81   : > { %3901 = vmatprep.subr.bf16.mxu0 %v6770_v9  ;;  %3944 = vmatprep.subr.bf16.mxu1 %v6772_v10  ;;  %v6793_v24 = vld [vmem:[%s7985_s9 + $0xaa8] ss:$272 sps:$4 sm:$0xff]   ;;  %v6794_v25 = vld [vmem:[%s7985_s9 + $0xcc4] ss:$272 sps:$4 sm:$0xff]   ;;  %v6796_v26 = vld [vmem:[%s7985_s9 + $0xccc] ss:$272 sps:$4 sm:$0xff]  }
  0x82   : > { %v6798_v27 = vld [vmem:[%s7985_s9 + $0xcc0] ss:$272 sps:$4 sm:$0xff]   ;;  %v6799_v28 = vld [vmem:[%s7985_s9 + $0xcc8] ss:$272 sps:$4 sm:$0xff]   ;;  %v6800_v29 = vld [vmem:[%s7985_s9 + $0xee4] ss:$272 sps:$4 sm:$0xff]  }
  0x83   : > { %v6802_v30 = vld [vmem:[%s7985_s9 + $0xeec] ss:$272 sps:$4 sm:$0xff]   ;;  %v6804_v31 = vld [vmem:[%s7985_s9 + $0xee0] ss:$272 sps:$4 sm:$0xff]   ;;  %v6805_v32 = vld [vmem:[%s7985_s9 + $0xee8] ss:$272 sps:$4 sm:$0xff]  }
  0x84   : > { %3902 = vmatpush1.bf16.msra.mxu0 %v6774_v11  ;;  %3945 = vmatpush1.bf16.msra.mxu1 %v6775_v12  ;;  %v6809_v33 = vld [vmem:[%s7985_s9 + $0x14] ss:$272 sps:$4 sm:$0xff]   ;;  %v6812_v34 = vld [vmem:[%s7985_s9 + $0x1c] ss:$272 sps:$4 sm:$0xff]   ;;  %v6807_v36 = vld [vmem:[%s7985_s9 + $0x10] ss:$272 sps:$4 sm:$0xff]  }
  0x85   : > { %3903 = vmatprep.subr.bf16.mxu0 %v6776_v13  ;;  %3946 = vmatprep.subr.bf16.mxu1 %v6778_v14  ;;  %v8027_v35 = vld [vmem:[#allocation2] sm:$0xff]   ;;  %v6815_v38 = vld [vmem:[%s7985_s9 + $0x234] ss:$272 sps:$4 sm:$0xff]   ;;  %v6813_v40 = vld [vmem:[%s7985_s9 + $0x230] ss:$272 sps:$4 sm:$0xff]   ;;  %s6669_s5 = smul.u32 68, %s7982_s26 }
  0x86   : > { %v6810_v37 = vld [vmem:[%s7985_s9 + $0x18] ss:$272 sps:$4 sm:$0xff]   ;;  %v6818_v39 = vld [vmem:[%s7985_s9 + $0x23c] ss:$272 sps:$4 sm:$0xff]   ;;  %v6821_v42 = vld [vmem:[%s7985_s9 + $0x454] ss:$272 sps:$4 sm:$0xff]  }
  0x87   : > { %v6816_v41 = vld [vmem:[%s7985_s9 + $0x238] ss:$272 sps:$4 sm:$0xff]   ;;  %v6824_v43 = vld [vmem:[%s7985_s9 + $0x45c] ss:$272 sps:$4 sm:$0xff]   ;;  %v6819_v44 = vld [vmem:[%s7985_s9 + $0x450] ss:$272 sps:$4 sm:$0xff]  }
  0x88   : > { %3904 = vmatpush1.bf16.msra.mxu0 %v6780_v15  ;;  %3947 = vmatpush1.bf16.msra.mxu1 %v6781_v16  ;;  %v6822_v45 = vld [vmem:[%s7985_s9 + $0x458] ss:$272 sps:$4 sm:$0xff]   ;;  %v6827_v46 = vld [vmem:[%s7985_s9 + $0x674] ss:$272 sps:$4 sm:$0xff]   ;;  %v6830_v47 = vld [vmem:[%s7985_s9 + $0x67c] ss:$272 sps:$4 sm:$0xff]  }
  0x89   : > { %3905 = vmatprep.subr.bf16.mxu0 %v6782_v17  ;;  %3948 = vmatprep.subr.bf16.mxu1 %v6784_v18  ;;  %v6825_v48 = vld [vmem:[%s7985_s9 + $0x670] ss:$272 sps:$4 sm:$0xff]   ;;  %v6828_v49 = vld [vmem:[%s7985_s9 + $0x678] ss:$272 sps:$4 sm:$0xff]   ;;  %v6833_v50 = vld [vmem:[%s7985_s9 + $0x894] ss:$272 sps:$4 sm:$0xff]  }
  0x8a   : > { %v6836_v51 = vld [vmem:[%s7985_s9 + $0x89c] ss:$272 sps:$4 sm:$0xff]   ;;  %v6831_v52 = vld [vmem:[%s7985_s9 + $0x890] ss:$272 sps:$4 sm:$0xff]   ;;  %v6834_v53 = vld [vmem:[%s7985_s9 + $0x898] ss:$272 sps:$4 sm:$0xff]  }
  0x8b   : > { %v6839_v54 = vld [vmem:[%s7985_s9 + $0xab4] ss:$272 sps:$4 sm:$0xff]   ;;  %v6842_v55 = vld [vmem:[%s7985_s9 + $0xabc] ss:$272 sps:$4 sm:$0xff]   ;;  %v6837_v56 = vld [vmem:[%s7985_s9 + $0xab0] ss:$272 sps:$4 sm:$0xff]  }
  0x8c   : > { %3906 = vmatpush1.bf16.msra.mxu0 %v6786_v19  ;;  %3949 = vmatpush1.bf16.msra.mxu1 %v6787_v20  ;;  %v6840_v57 = vld [vmem:[%s7985_s9 + $0xab8] ss:$272 sps:$4 sm:$0xff]   ;;  %v6845_v58 = vld [vmem:[%s7985_s9 + $0xcd4] ss:$272 sps:$4 sm:$0xff]   ;;  %v6848_v59 = vld [vmem:[%s7985_s9 + $0xcdc] ss:$272 sps:$4 sm:$0xff]  }
  0x8d   : > { %3907 = vmatprep.subr.bf16.mxu0 %v6788_v21  ;;  %3950 = vmatprep.subr.bf16.mxu1 %v6790_v22  ;;  %v6843_v60 = vld [vmem:[%s7985_s9 + $0xcd0] ss:$272 sps:$4 sm:$0xff]   ;;  %v6846_v61 = vld [vmem:[%s7985_s9 + $0xcd8] ss:$272 sps:$4 sm:$0xff]   ;;  %v6851_v62 = vld [vmem:[%s7985_s9 + $0xef4] ss:$272 sps:$4 sm:$0xff]  }
  0x8e   : > { %v6854_v63 = vld [vmem:[%s7985_s9 + $0xefc] ss:$272 sps:$4 sm:$0xff]   ;;  %v6849_v1 = vld [vmem:[%s7985_s9 + $0xef0] ss:$272 sps:$4 sm:$0xff]   ;;  %v6852_v2 = vld [vmem:[%s7985_s9 + $0xef8] ss:$272 sps:$4 sm:$0xff]  }
  0x8f   : > { %v6857_v3 = vld [vmem:[%s7985_s9 + $0x24] ss:$272 sps:$4 sm:$0xff]   ;;  %v6860_v4 = vld [vmem:[%s7985_s9 + $0x2c] ss:$272 sps:$4 sm:$0xff]   ;;  %v6855_v5 = vld [vmem:[%s7985_s9 + $0x20] ss:$272 sps:$4 sm:$0xff]  }
  0x90   : > { %3908 = vmatpush1.bf16.msra.mxu0 %v6792_v23  ;;  %3951 = vmatpush1.bf16.msra.mxu1 %v6793_v24  ;;  %v6858_v6 = vld [vmem:[%s7985_s9 + $0x28] ss:$272 sps:$4 sm:$0xff]   ;;  %v6863_v7 = vld [vmem:[%s7985_s9 + $0x244] ss:$272 sps:$4 sm:$0xff]   ;;  %v6866_v8 = vld [vmem:[%s7985_s9 + $0x24c] ss:$272 sps:$4 sm:$0xff]  }
  0x91   : > { %3909 = vmatprep.subr.bf16.mxu0 %v6794_v25  ;;  %3952 = vmatprep.subr.bf16.mxu1 %v6796_v26  ;;  %v6861_v9 = vld [vmem:[%s7985_s9 + $0x240] ss:$272 sps:$4 sm:$0xff]   ;;  %v6864_v10 = vld [vmem:[%s7985_s9 + $0x248] ss:$272 sps:$4 sm:$0xff]   ;;  %v6869_v11 = vld [vmem:[%s7985_s9 + $0x464] ss:$272 sps:$4 sm:$0xff]  }
  0x92   : > { %v6872_v12 = vld [vmem:[%s7985_s9 + $0x46c] ss:$272 sps:$4 sm:$0xff]   ;;  %v6867_v13 = vld [vmem:[%s7985_s9 + $0x460] ss:$272 sps:$4 sm:$0xff]   ;;  %v6870_v14 = vld [vmem:[%s7985_s9 + $0x468] ss:$272 sps:$4 sm:$0xff]  }
  0x93   : > { %v6875_v15 = vld [vmem:[%s7985_s9 + $0x684] ss:$272 sps:$4 sm:$0xff]   ;;  %v6878_v16 = vld [vmem:[%s7985_s9 + $0x68c] ss:$272 sps:$4 sm:$0xff]   ;;  %v6873_v17 = vld [vmem:[%s7985_s9 + $0x680] ss:$272 sps:$4 sm:$0xff]  }
  0x94   : > { %3910 = vmatpush1.bf16.msra.mxu0 %v6798_v27  ;;  %3953 = vmatpush1.bf16.msra.mxu1 %v6799_v28  ;;  %v6876_v18 = vld [vmem:[%s7985_s9 + $0x688] ss:$272 sps:$4 sm:$0xff]   ;;  %v6881_v19 = vld [vmem:[%s7985_s9 + $0x8a4] ss:$272 sps:$4 sm:$0xff]   ;;  %v6884_v20 = vld [vmem:[%s7985_s9 + $0x8ac] ss:$272 sps:$4 sm:$0xff]  }
  0x95   : > { %3911 = vmatprep.subr.bf16.mxu0 %v6800_v29  ;;  %3954 = vmatprep.subr.bf16.mxu1 %v6802_v30  ;;  %v6879_v21 = vld [vmem:[%s7985_s9 + $0x8a0] ss:$272 sps:$4 sm:$0xff]   ;;  %v6882_v22 = vld [vmem:[%s7985_s9 + $0x8a8] ss:$272 sps:$4 sm:$0xff]   ;;  %v6887_v23 = vld [vmem:[%s7985_s9 + $0xac4] ss:$272 sps:$4 sm:$0xff]  }
  0x96   : > { %v6890_v24 = vld [vmem:[%s7985_s9 + $0xacc] ss:$272 sps:$4 sm:$0xff]   ;;  %v6885_v25 = vld [vmem:[%s7985_s9 + $0xac0] ss:$272 sps:$4 sm:$0xff]   ;;  %v6888_v26 = vld [vmem:[%s7985_s9 + $0xac8] ss:$272 sps:$4 sm:$0xff]  }
  0x97   : > { %v6893_v27 = vld [vmem:[%s7985_s9 + $0xce4] ss:$272 sps:$4 sm:$0xff]   ;;  %v6896_v28 = vld [vmem:[%s7985_s9 + $0xcec] ss:$272 sps:$4 sm:$0xff]   ;;  %v6891_v29 = vld [vmem:[%s7985_s9 + $0xce0] ss:$272 sps:$4 sm:$0xff]  }
  0x98   : > { %3912 = vmatpush1.bf16.msra.mxu0 %v6804_v31  ;;  %3955 = vmatpush1.bf16.msra.mxu1 %v6805_v32  ;;  %v6894_v30 = vld [vmem:[%s7985_s9 + $0xce8] ss:$272 sps:$4 sm:$0xff]   ;;  %v6899_v31 = vld [vmem:[%s7985_s9 + $0xf04] ss:$272 sps:$4 sm:$0xff]   ;;  %v6902_v32 = vld [vmem:[%s7985_s9 + $0xf0c] ss:$272 sps:$4 sm:$0xff]  }
  0x99   : > { %3983 = vmatprep.subr.bf16.mxu0 %v6809_v33  ;;  %4026 = vmatprep.subr.bf16.mxu1 %v6812_v34  ;;  %v6897_v33 = vld [vmem:[%s7985_s9 + $0xf00] ss:$272 sps:$4 sm:$0xff]   ;;  %v6900_v34 = vld [vmem:[%s7985_s9 + $0xf08] ss:$272 sps:$4 sm:$0xff]   ;;  %s8278_s30 = scalar_lea.vmem [#allocation7], %s6669_s5  ;;  %s6670_s7 = smul.u32 544, %s7982_s26 }
  0x9a   : > { %s6665_s25 = smul.u32 4352, %s7744_s15  ;;  %s5836_s23 = scalar_lea.sflag [#allocation4], %s7982_s26 }
  0x9b   : > { %3930 = vmatmul.mubr.bf16.vlgmr.msra.gmra.mrb[0].mxu0 %v8027_v35  ;;  %3973 = vmatmul.mubr.bf16.vlgmr.msra.gmra.mrb[0].mxu1 %v8027_v35  ;;  %s8311_s8 = scalar_lea.vmem [#allocation8], %s6670_s7  ;;  %p8924_p6 = scmp.ne.s32.totalorder %s8913_s28, 0 }
  0x9c   : > { %3984 = vmatpush1.bf16.msra.mxu0 %v6807_v36  ;;  %4027 = vmatpush1.bf16.msra.mxu1 %v6810_v37  ;;  %v6905_v36 = vld [vmem:[%s7985_s9 + $0x34] ss:$272 sps:$4 sm:$0xff]   ;;  %v6908_v37 = vld [vmem:[%s7985_s9 + $0x3c] ss:$272 sps:$4 sm:$0xff]   ;;  %s5852_s27 = sshll.u32 %s8311_s8, 4  ;;  %s8841_s21 = scalar_lea.hbm %s8899_s3, %s6665_s25  ;;  %s8843_s27 = int_to_ptr.vmem [resolvable:$true] %s5852_s27 }
  0x9d   : > { %3985 = vmatprep.subr.bf16.mxu0 %v6815_v38  ;;  %4028 = vmatprep.subr.bf16.mxu1 %v6818_v39  ;;  %v6903_v38 = vld [vmem:[%s7985_s9 + $0x30] ss:$272 sps:$4 sm:$0xff]   ;;  %v6906_v39 = vld [vmem:[%s7985_s9 + $0x38] ss:$272 sps:$4 sm:$0xff]   ;;  %s7666_s11 = scalar_lea.vmem %s8843_s27, 8704  ;;  %s7763_s10 = smov [#allocation8]  }
  0x9e   : > { %4015 = vmatprep.mubr.bf16.mxu0 %v7762_v0  ;;  %4058 = vmatprep.mubr.bf16.mxu1 %v7762_v0  ;;  %p7667_p4 = scmp.ne.s32.totalorder %s8843_s27, %s7666_s11  ;;  %s7670_s20 = sshll.u32 %s7763_s10, 4  ;;  %s7671_s20 = int_to_ptr.vmem [resolvable:$false] %s7670_s20 }
  0x9f   : > { %s7672_s1 = scalar_lea.vmem %s7671_s20, 17408  ;;  %p7673_p0 = scmp.lt.s32.totalorder %s8843_s27, %s7671_s20 }
  0xa0   : > { %3986 = vmatpush1.bf16.msra.mxu0 %v6813_v40  ;;  %4029 = vmatpush1.bf16.msra.mxu1 %v6816_v41  ;;  %v6911_v40 = vld [vmem:[%s7985_s9 + $0x254] ss:$272 sps:$4 sm:$0xff]   ;;  %v6914_v41 = vld [vmem:[%s7985_s9 + $0x25c] ss:$272 sps:$4 sm:$0xff]   ;;  %p7668_p1 = pnand %p7667_p4, %p8924_p6  ;;  %p7674_p9 = scmp.lt.s32.totalorder %s7672_s1, %s7666_s11 }
  0xa1   : > { %3987 = vmatprep.subr.bf16.mxu0 %v6821_v42  ;;  %4030 = vmatprep.subr.bf16.mxu1 %v6824_v43  ;;  %v6909_v42 = vld [vmem:[%s7985_s9 + $0x250] ss:$272 sps:$4 sm:$0xff]   ;;  %v6912_v43 = vld [vmem:[%s7985_s9 + $0x258] ss:$272 sps:$4 sm:$0xff]  }
  0xa2   : > { %p7669_p12 = pneg %p7668_p1  ;;  %p7675_p5 = por %p7674_p9, %p7673_p0 }
  0xa4   : > { %3988 = vmatpush1.bf16.msra.mxu0 %v6819_v44  ;;  %4031 = vmatpush1.bf16.msra.mxu1 %v6822_v45  ;;  %v6917_v44 = vld [vmem:[%s7985_s9 + $0x474] ss:$272 sps:$4 sm:$0xff]   ;;  %v6920_v45 = vld [vmem:[%s7985_s9 + $0x47c] ss:$272 sps:$4 sm:$0xff]   ;;  %p7676_p8 = pnand %p7675_p5, %p7669_p12 }
  0xa5   : > { %3989 = vmatprep.subr.bf16.mxu0 %v6827_v46  ;;  %4032 = vmatprep.subr.bf16.mxu1 %v6830_v47  ;;  %v6915_v46 = vld [vmem:[%s7985_s9 + $0x470] ss:$272 sps:$4 sm:$0xff]   ;;  %v6918_v47 = vld [vmem:[%s7985_s9 + $0x478] ss:$272 sps:$4 sm:$0xff]  }
  0xa8   : > { %3990 = vmatpush1.bf16.msra.mxu0 %v6825_v48  ;;  %4033 = vmatpush1.bf16.msra.mxu1 %v6828_v49  ;;  %v6923_v48 = vld [vmem:[%s7985_s9 + $0x694] ss:$272 sps:$4 sm:$0xff]   ;;  %v6926_v49 = vld [vmem:[%s7985_s9 + $0x69c] ss:$272 sps:$4 sm:$0xff]  }
  0xa9   : > { %3991 = vmatprep.subr.bf16.mxu0 %v6833_v50  ;;  %4034 = vmatprep.subr.bf16.mxu1 %v6836_v51  ;;  %v6921_v50 = vld [vmem:[%s7985_s9 + $0x690] ss:$272 sps:$4 sm:$0xff]   ;;  %v6924_v51 = vld [vmem:[%s7985_s9 + $0x698] ss:$272 sps:$4 sm:$0xff]  }
  0xac   : > { %3992 = vmatpush1.bf16.msra.mxu0 %v6831_v52  ;;  %4035 = vmatpush1.bf16.msra.mxu1 %v6834_v53  ;;  %v6929_v52 = vld [vmem:[%s7985_s9 + $0x8b4] ss:$272 sps:$4 sm:$0xff]   ;;  %v6932_v53 = vld [vmem:[%s7985_s9 + $0x8bc] ss:$272 sps:$4 sm:$0xff]  }
  0xad   : > { %3993 = vmatprep.subr.bf16.mxu0 %v6839_v54  ;;  %4036 = vmatprep.subr.bf16.mxu1 %v6842_v55  ;;  %v6927_v54 = vld [vmem:[%s7985_s9 + $0x8b0] ss:$272 sps:$4 sm:$0xff]   ;;  %v6930_v55 = vld [vmem:[%s7985_s9 + $0x8b8] ss:$272 sps:$4 sm:$0xff]  }
  0xb0   : > { %3994 = vmatpush1.bf16.msra.mxu0 %v6837_v56  ;;  %4037 = vmatpush1.bf16.msra.mxu1 %v6840_v57  ;;  %v6935_v56 = vld [vmem:[%s7985_s9 + $0xad4] ss:$272 sps:$4 sm:$0xff]   ;;  %v6938_v57 = vld [vmem:[%s7985_s9 + $0xadc] ss:$272 sps:$4 sm:$0xff]  }
  0xb1   : > { %3995 = vmatprep.subr.bf16.mxu0 %v6845_v58  ;;  %4038 = vmatprep.subr.bf16.mxu1 %v6848_v59  ;;  %v6933_v58 = vld [vmem:[%s7985_s9 + $0xad0] ss:$272 sps:$4 sm:$0xff]   ;;  %v6936_v59 = vld [vmem:[%s7985_s9 + $0xad8] ss:$272 sps:$4 sm:$0xff]  }
  0xb4   : > { %3996 = vmatpush1.bf16.msra.mxu0 %v6843_v60  ;;  %4039 = vmatpush1.bf16.msra.mxu1 %v6846_v61  ;;  %v6941_v60 = vld [vmem:[%s7985_s9 + $0xcf4] ss:$272 sps:$4 sm:$0xff]   ;;  %v6944_v61 = vld [vmem:[%s7985_s9 + $0xcfc] ss:$272 sps:$4 sm:$0xff]  }
  0xb5   : > { %3997 = vmatprep.subr.bf16.mxu0 %v6851_v62  ;;  %4040 = vmatprep.subr.bf16.mxu1 %v6854_v63  ;;  %v6939_v62 = vld [vmem:[%s7985_s9 + $0xcf0] ss:$272 sps:$4 sm:$0xff]   ;;  %v6942_v63 = vld [vmem:[%s7985_s9 + $0xcf8] ss:$272 sps:$4 sm:$0xff]  }
  0xb8   : > { %3998 = vmatpush1.bf16.msra.mxu0 %v6849_v1  ;;  %4041 = vmatpush1.bf16.msra.mxu1 %v6852_v2  ;;  %v6947_v1 = vld [vmem:[%s7985_s9 + $0xf14] ss:$272 sps:$4 sm:$0xff]   ;;  %v6950_v2 = vld [vmem:[%s7985_s9 + $0xf1c] ss:$272 sps:$4 sm:$0xff]  }
  0xb9   : > { %4069 = vmatprep.subr.bf16.mxu0 %v6857_v3  ;;  %4112 = vmatprep.subr.bf16.mxu1 %v6860_v4  ;;  %v6945_v3 = vld [vmem:[%s7985_s9 + $0xf10] ss:$272 sps:$4 sm:$0xff]   ;;  %v6948_v4 = vld [vmem:[%s7985_s9 + $0xf18] ss:$272 sps:$4 sm:$0xff]  }
  0xbb   : > { %4016 = vmatmul.mubr.bf16.vlgmr.msra.gmra.mrb[4].mxu0 %v8027_v35  ;;  %4059 = vmatmul.mubr.bf16.vlgmr.msra.gmra.mrb[4].mxu1 %v8027_v35 }
  0xbc   : > { %4070 = vmatpush1.bf16.msra.mxu0 %v6855_v5  ;;  %4113 = vmatpush1.bf16.msra.mxu1 %v6858_v6  ;;  %v6953_v5 = vld [vmem:[%s7985_s9 + $0x44] ss:$272 sps:$4 sm:$0xff]   ;;  %v6956_v6 = vld [vmem:[%s7985_s9 + $0x4c] ss:$272 sps:$4 sm:$0xff]  }
  0xbd   : > { %4071 = vmatprep.subr.bf16.mxu0 %v6863_v7  ;;  %4114 = vmatprep.subr.bf16.mxu1 %v6866_v8  ;;  %v6951_v7 = vld [vmem:[%s7985_s9 + $0x40] ss:$272 sps:$4 sm:$0xff]   ;;  %v6954_v8 = vld [vmem:[%s7985_s9 + $0x48] ss:$272 sps:$4 sm:$0xff]  }
  0xbe   : > { %4101 = vmatprep.mubr.bf16.mxu0 %v7762_v0  ;;  %4144 = vmatprep.mubr.bf16.mxu1 %v7762_v0 }
  0xc0   : > { %4072 = vmatpush1.bf16.msra.mxu0 %v6861_v9  ;;  %4115 = vmatpush1.bf16.msra.mxu1 %v6864_v10  ;;  %v6959_v9 = vld [vmem:[%s7985_s9 + $0x264] ss:$272 sps:$4 sm:$0xff]   ;;  %v6962_v10 = vld [vmem:[%s7985_s9 + $0x26c] ss:$272 sps:$4 sm:$0xff]  }
  0xc1   : > { %4073 = vmatprep.subr.bf16.mxu0 %v6869_v11  ;;  %4116 = vmatprep.subr.bf16.mxu1 %v6872_v12  ;;  %v6957_v11 = vld [vmem:[%s7985_s9 + $0x260] ss:$272 sps:$4 sm:$0xff]   ;;  %v6960_v12 = vld [vmem:[%s7985_s9 + $0x268] ss:$272 sps:$4 sm:$0xff]  }
  0xc4   : > { %4074 = vmatpush1.bf16.msra.mxu0 %v6867_v13  ;;  %4117 = vmatpush1.bf16.msra.mxu1 %v6870_v14  ;;  %v6965_v13 = vld [vmem:[%s7985_s9 + $0x484] ss:$272 sps:$4 sm:$0xff]   ;;  %v6968_v14 = vld [vmem:[%s7985_s9 + $0x48c] ss:$272 sps:$4 sm:$0xff]  }
  0xc5   : > { %4075 = vmatprep.subr.bf16.mxu0 %v6875_v15  ;;  %4118 = vmatprep.subr.bf16.mxu1 %v6878_v16  ;;  %v6963_v15 = vld [vmem:[%s7985_s9 + $0x480] ss:$272 sps:$4 sm:$0xff]   ;;  %v6966_v16 = vld [vmem:[%s7985_s9 + $0x488] ss:$272 sps:$4 sm:$0xff]  }
  0xc8   : > { %4076 = vmatpush1.bf16.msra.mxu0 %v6873_v17  ;;  %4119 = vmatpush1.bf16.msra.mxu1 %v6876_v18  ;;  %v6971_v17 = vld [vmem:[%s7985_s9 + $0x6a4] ss:$272 sps:$4 sm:$0xff]   ;;  %v6974_v18 = vld [vmem:[%s7985_s9 + $0x6ac] ss:$272 sps:$4 sm:$0xff]  }
  0xc9   : > { %4077 = vmatprep.subr.bf16.mxu0 %v6881_v19  ;;  %4120 = vmatprep.subr.bf16.mxu1 %v6884_v20  ;;  %v6969_v19 = vld [vmem:[%s7985_s9 + $0x6a0] ss:$272 sps:$4 sm:$0xff]   ;;  %v6972_v20 = vld [vmem:[%s7985_s9 + $0x6a8] ss:$272 sps:$4 sm:$0xff]  }
  0xcc   : > { %4078 = vmatpush1.bf16.msra.mxu0 %v6879_v21  ;;  %4121 = vmatpush1.bf16.msra.mxu1 %v6882_v22  ;;  %v6977_v21 = vld [vmem:[%s7985_s9 + $0x8c4] ss:$272 sps:$4 sm:$0xff]   ;;  %v6980_v22 = vld [vmem:[%s7985_s9 + $0x8cc] ss:$272 sps:$4 sm:$0xff]  }
  0xcd   : > { %4079 = vmatprep.subr.bf16.mxu0 %v6887_v23  ;;  %4122 = vmatprep.subr.bf16.mxu1 %v6890_v24  ;;  %v6975_v23 = vld [vmem:[%s7985_s9 + $0x8c0] ss:$272 sps:$4 sm:$0xff]   ;;  %v6978_v24 = vld [vmem:[%s7985_s9 + $0x8c8] ss:$272 sps:$4 sm:$0xff]  }
  0xd0   : > { %4080 = vmatpush1.bf16.msra.mxu0 %v6885_v25  ;;  %4123 = vmatpush1.bf16.msra.mxu1 %v6888_v26  ;;  %v6983_v25 = vld [vmem:[%s7985_s9 + $0xae4] ss:$272 sps:$4 sm:$0xff]   ;;  %v6986_v26 = vld [vmem:[%s7985_s9 + $0xaec] ss:$272 sps:$4 sm:$0xff]  }
  0xd1   : > { %4081 = vmatprep.subr.bf16.mxu0 %v6893_v27  ;;  %4124 = vmatprep.subr.bf16.mxu1 %v6896_v28  ;;  %v6981_v27 = vld [vmem:[%s7985_s9 + $0xae0] ss:$272 sps:$4 sm:$0xff]   ;;  %v6984_v28 = vld [vmem:[%s7985_s9 + $0xae8] ss:$272 sps:$4 sm:$0xff]  }
  0xd4   : > { %4082 = vmatpush1.bf16.msra.mxu0 %v6891_v29  ;;  %4125 = vmatpush1.bf16.msra.mxu1 %v6894_v30  ;;  %v6989_v29 = vld [vmem:[%s7985_s9 + $0xd04] ss:$272 sps:$4 sm:$0xff]   ;;  %v6992_v30 = vld [vmem:[%s7985_s9 + $0xd0c] ss:$272 sps:$4 sm:$0xff]  }
  0xd5   : > { %4083 = vmatprep.subr.bf16.mxu0 %v6899_v31  ;;  %4126 = vmatprep.subr.bf16.mxu1 %v6902_v32  ;;  %v6987_v31 = vld [vmem:[%s7985_s9 + $0xd00] ss:$272 sps:$4 sm:$0xff]   ;;  %v6990_v32 = vld [vmem:[%s7985_s9 + $0xd08] ss:$272 sps:$4 sm:$0xff]  }
  0xd8   : > { %4084 = vmatpush1.bf16.msra.mxu0 %v6897_v33  ;;  %4127 = vmatpush1.bf16.msra.mxu1 %v6900_v34  ;;  %v6995_v33 = vld [vmem:[%s7985_s9 + $0xf24] ss:$272 sps:$4 sm:$0xff]   ;;  %v6998_v34 = vld [vmem:[%s7985_s9 + $0xf2c] ss:$272 sps:$4 sm:$0xff]  }
  0xd9   : > { %4155 = vmatprep.subr.bf16.mxu0 %v6905_v36  ;;  %4198 = vmatprep.subr.bf16.mxu1 %v6908_v37  ;;  %v6993_v36 = vld [vmem:[%s7985_s9 + $0xf20] ss:$272 sps:$4 sm:$0xff]   ;;  %v6996_v37 = vld [vmem:[%s7985_s9 + $0xf28] ss:$272 sps:$4 sm:$0xff]  }
  0xdb   : > { %4102 = vmatmul.mubr.bf16.vlgmr.msra.gmra.mrb[8].mxu0 %v8027_v35  ;;  %4145 = vmatmul.mubr.bf16.vlgmr.msra.gmra.mrb[8].mxu1 %v8027_v35 }
  0xdc   : > { %4156 = vmatpush1.bf16.msra.mxu0 %v6903_v38  ;;  %4199 = vmatpush1.bf16.msra.mxu1 %v6906_v39  ;;  %v7001_v38 = vld [vmem:[%s7985_s9 + $0x54] ss:$272 sps:$4 sm:$0xff]   ;;  %v7004_v39 = vld [vmem:[%s7985_s9 + $0x5c] ss:$272 sps:$4 sm:$0xff]  }
  0xdd   : > { %4157 = vmatprep.subr.bf16.mxu0 %v6911_v40  ;;  %4200 = vmatprep.subr.bf16.mxu1 %v6914_v41  ;;  %v6999_v40 = vld [vmem:[%s7985_s9 + $0x50] ss:$272 sps:$4 sm:$0xff]   ;;  %v7002_v41 = vld [vmem:[%s7985_s9 + $0x58] ss:$272 sps:$4 sm:$0xff]  }
  0xde   : > { %4187 = vmatprep.mubr.bf16.mxu0 %v7762_v0  ;;  %4230 = vmatprep.mubr.bf16.mxu1 %v7762_v0 }
  0xe0   : > { %4158 = vmatpush1.bf16.msra.mxu0 %v6909_v42  ;;  %4201 = vmatpush1.bf16.msra.mxu1 %v6912_v43  ;;  %v7007_v42 = vld [vmem:[%s7985_s9 + $0x274] ss:$272 sps:$4 sm:$0xff]   ;;  %v7010_v43 = vld [vmem:[%s7985_s9 + $0x27c] ss:$272 sps:$4 sm:$0xff]  }
  0xe1   : > { %4159 = vmatprep.subr.bf16.mxu0 %v6917_v44  ;;  %4202 = vmatprep.subr.bf16.mxu1 %v6920_v45  ;;  %v7005_v44 = vld [vmem:[%s7985_s9 + $0x270] ss:$272 sps:$4 sm:$0xff]   ;;  %v7008_v45 = vld [vmem:[%s7985_s9 + $0x278] ss:$272 sps:$4 sm:$0xff]  }
  0xe4   : > { %4160 = vmatpush1.bf16.msra.mxu0 %v6915_v46  ;;  %4203 = vmatpush1.bf16.msra.mxu1 %v6918_v47  ;;  %v7013_v46 = vld [vmem:[%s7985_s9 + $0x494] ss:$272 sps:$4 sm:$0xff]   ;;  %v7016_v47 = vld [vmem:[%s7985_s9 + $0x49c] ss:$272 sps:$4 sm:$0xff]  }
  0xe5   : > { %4161 = vmatprep.subr.bf16.mxu0 %v6923_v48  ;;  %4204 = vmatprep.subr.bf16.mxu1 %v6926_v49  ;;  %v7011_v48 = vld [vmem:[%s7985_s9 + $0x490] ss:$272 sps:$4 sm:$0xff]   ;;  %v7019_v49 = vld [vmem:[%s7985_s9 + $0x6b4] ss:$272 sps:$4 sm:$0xff]  }
  0xe8   : > { %4162 = vmatpush1.bf16.msra.mxu0 %v6921_v50  ;;  %4205 = vmatpush1.bf16.msra.mxu1 %v6924_v51  ;;  %v7022_v50 = vld [vmem:[%s7985_s9 + $0x6bc] ss:$272 sps:$4 sm:$0xff]   ;;  %v7017_v51 = vld [vmem:[%s7985_s9 + $0x6b0] ss:$272 sps:$4 sm:$0xff]  }
  0xe9   : > { %4163 = vmatprep.subr.bf16.mxu0 %v6929_v52  ;;  %4206 = vmatprep.subr.bf16.mxu1 %v6932_v53  ;;  %v7020_v52 = vld [vmem:[%s7985_s9 + $0x6b8] ss:$272 sps:$4 sm:$0xff]   ;;  %v7025_v53 = vld [vmem:[%s7985_s9 + $0x8d4] ss:$272 sps:$4 sm:$0xff]  }
  0xec   : > { %4164 = vmatpush1.bf16.msra.mxu0 %v6927_v54  ;;  %4207 = vmatpush1.bf16.msra.mxu1 %v6930_v55  ;;  %v7028_v54 = vld [vmem:[%s7985_s9 + $0x8dc] ss:$272 sps:$4 sm:$0xff]   ;;  %v7023_v55 = vld [vmem:[%s7985_s9 + $0x8d0] ss:$272 sps:$4 sm:$0xff]  }
  0xed   : > { %4165 = vmatprep.subr.bf16.mxu0 %v6935_v56  ;;  %4208 = vmatprep.subr.bf16.mxu1 %v6938_v57  ;;  %v7026_v56 = vld [vmem:[%s7985_s9 + $0x8d8] ss:$272 sps:$4 sm:$0xff]   ;;  %v7031_v57 = vld [vmem:[%s7985_s9 + $0xaf4] ss:$272 sps:$4 sm:$0xff]  }
  0xf0   : > { %4166 = vmatpush1.bf16.msra.mxu0 %v6933_v58  ;;  %4209 = vmatpush1.bf16.msra.mxu1 %v6936_v59  ;;  %v7034_v58 = vld [vmem:[%s7985_s9 + $0xafc] ss:$272 sps:$4 sm:$0xff]   ;;  %v7029_v59 = vld [vmem:[%s7985_s9 + $0xaf0] ss:$272 sps:$4 sm:$0xff]  }
  0xf1   : > { %4167 = vmatprep.subr.bf16.mxu0 %v6941_v60  ;;  %4210 = vmatprep.subr.bf16.mxu1 %v6944_v61  ;;  %v7032_v60 = vld [vmem:[%s7985_s9 + $0xaf8] ss:$272 sps:$4 sm:$0xff]   ;;  %v7037_v61 = vld [vmem:[%s7985_s9 + $0xd14] ss:$272 sps:$4 sm:$0xff]  }
  0xf4   : > { %4168 = vmatpush1.bf16.msra.mxu0 %v6939_v62  ;;  %4211 = vmatpush1.bf16.msra.mxu1 %v6942_v63  ;;  %v7040_v62 = vld [vmem:[%s7985_s9 + $0xd1c] ss:$272 sps:$4 sm:$0xff]   ;;  %v7035_v63 = vld [vmem:[%s7985_s9 + $0xd10] ss:$272 sps:$4 sm:$0xff]  }
  0xf5   : > { %4169 = vmatprep.subr.bf16.mxu0 %v6947_v1  ;;  %4212 = vmatprep.subr.bf16.mxu1 %v6950_v2  ;;  %v7038_v1 = vld [vmem:[%s7985_s9 + $0xd18] ss:$272 sps:$4 sm:$0xff]   ;;  %v7043_v2 = vld [vmem:[%s7985_s9 + $0xf34] ss:$272 sps:$4 sm:$0xff]  }
  0xf8   : > { %4170 = vmatpush1.bf16.msra.mxu0 %v6945_v3  ;;  %4213 = vmatpush1.bf16.msra.mxu1 %v6948_v4  ;;  %v7046_v3 = vld [vmem:[%s7985_s9 + $0xf3c] ss:$272 sps:$4 sm:$0xff]   ;;  %v7041_v4 = vld [vmem:[%s7985_s9 + $0xf30] ss:$272 sps:$4 sm:$0xff]  }
  0xf9   : > { %4241 = vmatprep.subr.bf16.mxu0 %v6953_v5  ;;  %4284 = vmatprep.subr.bf16.mxu1 %v6956_v6  ;;  %v7044_v5 = vld [vmem:[%s7985_s9 + $0xf38] ss:$272 sps:$4 sm:$0xff]   ;;  %v7049_v6 = vld [vmem:[%s7985_s9 + $0x64] ss:$272 sps:$4 sm:$0xff]  }
  0xfb   : > { %4188 = vmatmul.mubr.bf16.vlgmr.msra.gmra.mrb[12].mxu0 %v8027_v35  ;;  %4231 = vmatmul.mubr.bf16.vlgmr.msra.gmra.mrb[12].mxu1 %v8027_v35 }
  0xfc   : > { %4242 = vmatpush1.bf16.msra.mxu0 %v6951_v7  ;;  %4285 = vmatpush1.bf16.msra.mxu1 %v6954_v8  ;;  %v7052_v7 = vld [vmem:[%s7985_s9 + $0x6c] ss:$272 sps:$4 sm:$0xff]   ;;  %v7047_v8 = vld [vmem:[%s7985_s9 + $0x60] ss:$272 sps:$4 sm:$0xff]  }
  0xfd   : > { %4243 = vmatprep.subr.bf16.mxu0 %v6959_v9  ;;  %4286 = vmatprep.subr.bf16.mxu1 %v6962_v10  ;;  %v7050_v9 = vld [vmem:[%s7985_s9 + $0x68] ss:$272 sps:$4 sm:$0xff]   ;;  %v7055_v10 = vld [vmem:[%s7985_s9 + $0x284] ss:$272 sps:$4 sm:$0xff]  }
  0xfe   : > { %4273 = vmatprep.mubr.bf16.mxu0 %v7762_v0  ;;  %4316 = vmatprep.mubr.bf16.mxu1 %v7762_v0 }
 0x100   : > { %4244 = vmatpush1.bf16.msra.mxu0 %v6957_v11  ;;  %4287 = vmatpush1.bf16.msra.mxu1 %v6960_v12  ;;  %v7058_v11 = vld [vmem:[%s7985_s9 + $0x28c] ss:$272 sps:$4 sm:$0xff]  }
 0x101   : > { %4245 = vmatprep.subr.bf16.mxu0 %v6965_v13  ;;  %4288 = vmatprep.subr.bf16.mxu1 %v6968_v14  ;;  %v8213_v12 = vld [vmem:[#allocation2] sm:$0xff]   ;;  %v7053_v13 = vld [vmem:[%s7985_s9 + $0x280] ss:$272 sps:$4 sm:$0xff]  }
 0x102   : > { %v7056_v14 = vld [vmem:[%s7985_s9 + $0x288] ss:$272 sps:$4 sm:$0xff]  }
 0x104   : > { %4246 = vmatpush1.bf16.msra.mxu0 %v6963_v15  ;;  %4289 = vmatpush1.bf16.msra.mxu1 %v6966_v16  ;;  %v7061_v15 = vld [vmem:[%s7985_s9 + $0x4a4] ss:$272 sps:$4 sm:$0xff]   ;;  %v7064_v16 = vld [vmem:[%s7985_s9 + $0x4ac] ss:$272 sps:$4 sm:$0xff]  }
 0x105   : > { %4247 = vmatprep.subr.bf16.mxu0 %v6971_v17  ;;  %4290 = vmatprep.subr.bf16.mxu1 %v6974_v18  ;;  %v7059_v17 = vld [vmem:[%s7985_s9 + $0x4a0] ss:$272 sps:$4 sm:$0xff]   ;;  %v7062_v18 = vld [vmem:[%s7985_s9 + $0x4a8] ss:$272 sps:$4 sm:$0xff]  }
 0x108   : > { %4248 = vmatpush1.bf16.msra.mxu0 %v6969_v19  ;;  %4291 = vmatpush1.bf16.msra.mxu1 %v6972_v20  ;;  %v7067_v19 = vld [vmem:[%s7985_s9 + $0x6c4] ss:$272 sps:$4 sm:$0xff]   ;;  %v7070_v20 = vld [vmem:[%s7985_s9 + $0x6cc] ss:$272 sps:$4 sm:$0xff]  }
 0x109   : > { %4249 = vmatprep.subr.bf16.mxu0 %v6977_v21  ;;  %4292 = vmatprep.subr.bf16.mxu1 %v6980_v22  ;;  %v7065_v21 = vld [vmem:[%s7985_s9 + $0x6c0] ss:$272 sps:$4 sm:$0xff]   ;;  %v7068_v22 = vld [vmem:[%s7985_s9 + $0x6c8] ss:$272 sps:$4 sm:$0xff]  }
 0x10c   : > { %4250 = vmatpush1.bf16.msra.mxu0 %v6975_v23  ;;  %4293 = vmatpush1.bf16.msra.mxu1 %v6978_v24  ;;  %v7073_v23 = vld [vmem:[%s7985_s9 + $0x8e4] ss:$272 sps:$4 sm:$0xff]   ;;  %v7076_v24 = vld [vmem:[%s7985_s9 + $0x8ec] ss:$272 sps:$4 sm:$0xff]  }
 0x10d   : > { %4251 = vmatprep.subr.bf16.mxu0 %v6983_v25  ;;  %4294 = vmatprep.subr.bf16.mxu1 %v6986_v26  ;;  %v7071_v25 = vld [vmem:[%s7985_s9 + $0x8e0] ss:$272 sps:$4 sm:$0xff]   ;;  %v7074_v26 = vld [vmem:[%s7985_s9 + $0x8e8] ss:$272 sps:$4 sm:$0xff]  }
 0x110   : > { %4252 = vmatpush1.bf16.msra.mxu0 %v6981_v27  ;;  %4295 = vmatpush1.bf16.msra.mxu1 %v6984_v28  ;;  %v7079_v27 = vld [vmem:[%s7985_s9 + $0xb04] ss:$272 sps:$4 sm:$0xff]   ;;  %v7082_v28 = vld [vmem:[%s7985_s9 + $0xb0c] ss:$272 sps:$4 sm:$0xff]  }
 0x111   : > { %4253 = vmatprep.subr.bf16.mxu0 %v6989_v29  ;;  %4296 = vmatprep.subr.bf16.mxu1 %v6992_v30  ;;  %v7077_v29 = vld [vmem:[%s7985_s9 + $0xb00] ss:$272 sps:$4 sm:$0xff]   ;;  %v7080_v30 = vld [vmem:[%s7985_s9 + $0xb08] ss:$272 sps:$4 sm:$0xff]  }
 0x114   : > { %4254 = vmatpush1.bf16.msra.mxu0 %v6987_v31  ;;  %4297 = vmatpush1.bf16.msra.mxu1 %v6990_v32  ;;  %v7085_v31 = vld [vmem:[%s7985_s9 + $0xd24] ss:$272 sps:$4 sm:$0xff]   ;;  %v7088_v32 = vld [vmem:[%s7985_s9 + $0xd2c] ss:$272 sps:$4 sm:$0xff]  }
 0x115   : > { %4255 = vmatprep.subr.bf16.mxu0 %v6995_v33  ;;  %4298 = vmatprep.subr.bf16.mxu1 %v6998_v34  ;;  %v7083_v33 = vld [vmem:[%s7985_s9 + $0xd20] ss:$272 sps:$4 sm:$0xff]   ;;  %v7086_v34 = vld [vmem:[%s7985_s9 + $0xd28] ss:$272 sps:$4 sm:$0xff]  }
 0x118   : > { %4256 = vmatpush1.bf16.msra.mxu0 %v6993_v36  ;;  %4299 = vmatpush1.bf16.msra.mxu1 %v6996_v37  ;;  %v7091_v36 = vld [vmem:[%s7985_s9 + $0xf44] ss:$272 sps:$4 sm:$0xff]   ;;  %v7094_v37 = vld [vmem:[%s7985_s9 + $0xf4c] ss:$272 sps:$4 sm:$0xff]  }
 0x119   : > { %4327 = vmatprep.subr.bf16.mxu0 %v7001_v38  ;;  %4370 = vmatprep.subr.bf16.mxu1 %v7004_v39  ;;  %v7089_v38 = vld [vmem:[%s7985_s9 + $0xf40] ss:$272 sps:$4 sm:$0xff]   ;;  %v7092_v39 = vld [vmem:[%s7985_s9 + $0xf48] ss:$272 sps:$4 sm:$0xff]  }
 0x11b   : > { %4274 = vmatmul.mubr.bf16.vlgmr.msra.gmra.mrb[16].mxu0 %v8027_v35  ;;  %4317 = vmatmul.mubr.bf16.vlgmr.msra.gmra.mrb[16].mxu1 %v8027_v35  ;;  %v7014_v35 = vld [vmem:[%s7985_s9 + $0x498] ss:$272 sps:$4 sm:$0xff]  }
 0x11c   : > { %4328 = vmatpush1.bf16.msra.mxu0 %v6999_v40  ;;  %4371 = vmatpush1.bf16.msra.mxu1 %v7002_v41  ;;  %v7097_v40 = vld [vmem:[%s7985_s9 + $0x74] ss:$272 sps:$4 sm:$0xff]   ;;  %v7100_v41 = vld [vmem:[%s7985_s9 + $0x7c] ss:$272 sps:$4 sm:$0xff]  }
 0x11d   : > { %4329 = vmatprep.subr.bf16.mxu0 %v7007_v42  ;;  %4372 = vmatprep.subr.bf16.mxu1 %v7010_v43  ;;  %v7095_v42 = vld [vmem:[%s7985_s9 + $0x70] ss:$272 sps:$4 sm:$0xff]   ;;  %v7098_v43 = vld [vmem:[%s7985_s9 + $0x78] ss:$272 sps:$4 sm:$0xff]  }
 0x11e   : > { %4359 = vmatprep.mubr.bf16.mxu0 %v7762_v0  ;;  %4402 = vmatprep.mubr.bf16.mxu1 %v7762_v0 }
 0x120   : > { %4330 = vmatpush1.bf16.msra.mxu0 %v7005_v44  ;;  %4373 = vmatpush1.bf16.msra.mxu1 %v7008_v45  ;;  %v7103_v44 = vld [vmem:[%s7985_s9 + $0x294] ss:$272 sps:$4 sm:$0xff]   ;;  %v7106_v45 = vld [vmem:[%s7985_s9 + $0x29c] ss:$272 sps:$4 sm:$0xff]  }
 0x121   : > { %4331 = vmatprep.subr.bf16.mxu0 %v7013_v46  ;;  %4374 = vmatprep.subr.bf16.mxu1 %v7016_v47  ;;  %v7101_v46 = vld [vmem:[%s7985_s9 + $0x290] ss:$272 sps:$4 sm:$0xff]   ;;  %v7104_v47 = vld [vmem:[%s7985_s9 + $0x298] ss:$272 sps:$4 sm:$0xff]  }
 0x124   : > { %4332 = vmatpush1.bf16.msra.mxu0 %v7011_v48  ;;  %4375 = vmatpush1.bf16.msra.mxu1 %v7014_v35  ;;  %v7109_v48 = vld [vmem:[%s7985_s9 + $0x4b4] ss:$272 sps:$4 sm:$0xff]   ;;  %v7112_v35 = vld [vmem:[%s7985_s9 + $0x4bc] ss:$272 sps:$4 sm:$0xff]  }
 0x125   : > { %4333 = vmatprep.subr.bf16.mxu0 %v7019_v49  ;;  %4376 = vmatprep.subr.bf16.mxu1 %v7022_v50  ;;  %v7107_v49 = vld [vmem:[%s7985_s9 + $0x4b0] ss:$272 sps:$4 sm:$0xff]   ;;  %v831_v50 = vlaneseq }
 0x128   : > { %4334 = vmatpush1.bf16.msra.mxu0 %v7017_v51  ;;  %4377 = vmatpush1.bf16.msra.mxu1 %v7020_v52  ;;  %v7110_v51 = vld [vmem:[%s7985_s9 + $0x4b8] ss:$272 sps:$4 sm:$0xff]   ;;  %v7115_v52 = vld [vmem:[%s7985_s9 + $0x6d4] ss:$272 sps:$4 sm:$0xff]  }
 0x129   : > { %4335 = vmatprep.subr.bf16.mxu0 %v7025_v53  ;;  %4378 = vmatprep.subr.bf16.mxu1 %v7028_v54  ;;  %v7118_v53 = vld [vmem:[%s7985_s9 + $0x6dc] ss:$272 sps:$4 sm:$0xff]   ;;  %v7113_v54 = vld [vmem:[%s7985_s9 + $0x6d0] ss:$272 sps:$4 sm:$0xff]  }
 0x12c   : > { %4336 = vmatpush1.bf16.msra.mxu0 %v7023_v55  ;;  %4379 = vmatpush1.bf16.msra.mxu1 %v7026_v56  ;;  %v8265_v55 = vshrl.u32 %v831_v50, 7  ;;  %v7116_v56 = vld [vmem:[%s7985_s9 + $0x6d8] ss:$272 sps:$4 sm:$0xff]   ;;  %v7155_v50 = vld [vmem:[%s7985_s9 + $0x4c0] ss:$272 sps:$4 sm:$0xff]  }
 0x12d   : > { %4337 = vmatprep.subr.bf16.mxu0 %v7031_v57  ;;  %4380 = vmatprep.subr.bf16.mxu1 %v7034_v58  ;;  %v7121_v57 = vld [vmem:[%s7985_s9 + $0x8f4] ss:$272 sps:$4 sm:$0xff]   ;;  %v7124_v58 = vld [vmem:[%s7985_s9 + $0x8fc] ss:$272 sps:$4 sm:$0xff]  }
 0x130   : > { %4338 = vmatpush1.bf16.msra.mxu0 %v7029_v59  ;;  %4381 = vmatpush1.bf16.msra.mxu1 %v7032_v60  ;;  %v7119_v59 = vld [vmem:[%s7985_s9 + $0x8f0] ss:$272 sps:$4 sm:$0xff]   ;;  %v7122_v60 = vld [vmem:[%s7985_s9 + $0x8f8] ss:$272 sps:$4 sm:$0xff]  }
 0x131   : > { %4339 = vmatprep.subr.bf16.mxu0 %v7037_v61  ;;  %4382 = vmatprep.subr.bf16.mxu1 %v7040_v62  ;;  %v8273_v61 = vsub.s32 0, %v8265_v55  ;;  %v8276_v62 = vsub.s32 2, %v8265_v55 }
 0x134   : > { %4340 = vmatpush1.bf16.msra.mxu0 %v7035_v63  ;;  %4383 = vmatpush1.bf16.msra.mxu1 %v7038_v1  ;;  %v8281_v63 = vld [vmem:[%s8278_s30] sm:$0xff]  ;;  %v8284_v1 = vsub.s32 1, %v8265_v55 }
 0x135   : > { %4341 = vmatprep.subr.bf16.mxu0 %v7043_v2  ;;  %4384 = vmatprep.subr.bf16.mxu1 %v7046_v3  ;;  %v8287_v2 = vsub.s32 3, %v8265_v55  ;;  %v7127_v3 = vld [vmem:[%s7985_s9 + $0xb14] ss:$272 sps:$4 sm:$0xff]  }
 0x138   : > { %4342 = vmatpush1.bf16.msra.mxu0 %v7041_v4  ;;  %4385 = vmatpush1.bf16.msra.mxu1 %v7044_v5  ;;  %v7130_v4 = vld [vmem:[%s7985_s9 + $0xb1c] ss:$272 sps:$4 sm:$0xff]   ;;  %v834_v5 = vrot.slane %v8281_v63, %v8273_v61 }
 0x139   : > { %4413 = vmatprep.subr.bf16.mxu0 %v7049_v6  ;;  %4456 = vmatprep.subr.bf16.mxu1 %v7052_v7  ;;  %v842_v6 = vrot.slane %v8281_v63, %v8276_v62  ;;  %v7125_v7 = vld [vmem:[%s7985_s9 + $0xb10] ss:$272 sps:$4 sm:$0xff]  }
 0x13b   : > { %4360 = vmatmul.mubr.bf16.vlgmr.msra.gmra.mrb[20].mxu0 %v8213_v12  ;;  %4403 = vmatmul.mubr.bf16.vlgmr.msra.gmra.mrb[20].mxu1 %v8213_v12 }
 0x13c   : > { %4414 = vmatpush1.bf16.msra.mxu0 %v7047_v8  ;;  %4457 = vmatpush1.bf16.msra.mxu1 %v7050_v9  ;;  %v838_v8 = vrot.slane %v8281_v63, %v8284_v1  ;;  %v846_v9 = vrot.slane %v8281_v63, %v8287_v2 }
 0x13d   : > { %4415 = vmatprep.subr.bf16.mxu0 %v7055_v10  ;;  %4458 = vmatprep.subr.bf16.mxu1 %v7058_v11  ;;  %v7128_v10 = vld [vmem:[%s7985_s9 + $0xb18] ss:$272 sps:$4 sm:$0xff]   ;;  %v7133_v11 = vld [vmem:[%s7985_s9 + $0xd34] ss:$272 sps:$4 sm:$0xff]  }
 0x13e   : > { %4445 = vmatprep.mubr.bf16.mxu0 %v7762_v0  ;;  %4488 = vmatprep.mubr.bf16.mxu1 %v7762_v0 }
 0x140   : > { %4416 = vmatpush1.bf16.msra.mxu0 %v7053_v13  ;;  %4459 = vmatpush1.bf16.msra.mxu1 %v7056_v14  ;;  %v7136_v13 = vld [vmem:[%s7985_s9 + $0xd3c] ss:$272 sps:$4 sm:$0xff]  }
 0x141   : > { %4417 = vmatprep.subr.bf16.mxu0 %v7061_v15  ;;  %4460 = vmatprep.subr.bf16.mxu1 %v7064_v16 }
 0x144   : > { %4418 = vmatpush1.bf16.msra.mxu0 %v7059_v17  ;;  %4461 = vmatpush1.bf16.msra.mxu1 %v7062_v18 }
 0x145   : > { %4419 = vmatprep.subr.bf16.mxu0 %v7067_v19  ;;  %4462 = vmatprep.subr.bf16.mxu1 %v7070_v20  ;;  %v7131_v20 = vld [vmem:[%s7985_s9 + $0xd30] ss:$272 sps:$4 sm:$0xff]  }
 0x148   : > { %4420 = vmatpush1.bf16.msra.mxu0 %v7065_v21  ;;  %4463 = vmatpush1.bf16.msra.mxu1 %v7068_v22 }
 0x149   : > { %4421 = vmatprep.subr.bf16.mxu0 %v7073_v23  ;;  %4464 = vmatprep.subr.bf16.mxu1 %v7076_v24 }
 0x14c   : > { %4422 = vmatpush1.bf16.msra.mxu0 %v7071_v25  ;;  %4465 = vmatpush1.bf16.msra.mxu1 %v7074_v26  ;;  %v7134_v25 = vld [vmem:[%s7985_s9 + $0xd38] ss:$272 sps:$4 sm:$0xff]   ;;  %v7139_v26 = vld [vmem:[%s7985_s9 + $0xf54] ss:$272 sps:$4 sm:$0xff]  }
 0x14d   : > { %4423 = vmatprep.subr.bf16.mxu0 %v7079_v27  ;;  %4466 = vmatprep.subr.bf16.mxu1 %v7082_v28 }
 0x150   : > { %4424 = vmatpush1.bf16.msra.mxu0 %v7077_v29  ;;  %4467 = vmatpush1.bf16.msra.mxu1 %v7080_v30 }
 0x151   : > { %4425 = vmatprep.subr.bf16.mxu0 %v7085_v31  ;;  %4468 = vmatprep.subr.bf16.mxu1 %v7088_v32  ;;  %v7142_v31 = vld [vmem:[%s7985_s9 + $0xf5c] ss:$272 sps:$4 sm:$0xff]  }
 0x154   : > { %4426 = vmatpush1.bf16.msra.mxu0 %v7083_v33  ;;  %4469 = vmatpush1.bf16.msra.mxu1 %v7086_v34 }
 0x155   : > { %4427 = vmatprep.subr.bf16.mxu0 %v7091_v36  ;;  %4470 = vmatprep.subr.bf16.mxu1 %v7094_v37  ;;  %v7137_v37 = vld [vmem:[%s7985_s9 + $0xf50] ss:$272 sps:$4 sm:$0xff]  }
 0x158   : > { %4428 = vmatpush1.bf16.msra.mxu0 %v7089_v38  ;;  %4471 = vmatpush1.bf16.msra.mxu1 %v7092_v39 }
 0x159   : > { %4499 = vmatprep.subr.bf16.mxu0 %v7097_v40  ;;  %4542 = vmatprep.subr.bf16.mxu1 %v7100_v41  ;;  %v7140_v40 = vld [vmem:[%s7985_s9 + $0xf58] ss:$272 sps:$4 sm:$0xff]   ;;  %v7145_v41 = vld [vmem:[%s7985_s9 + $0x84] ss:$272 sps:$4 sm:$0xff]  }
 0x15b   : > { %4446 = vmatmul.mubr.bf16.vlgmr.msra.gmra.mrb[24].mxu0 %v8213_v12  ;;  %4489 = vmatmul.mubr.bf16.vlgmr.msra.gmra.mrb[24].mxu1 %v8213_v12 }
 0x15c   : > { %4500 = vmatpush1.bf16.msra.mxu0 %v7095_v42  ;;  %4543 = vmatpush1.bf16.msra.mxu1 %v7098_v43  ;;  %v7148_v42 = vld [vmem:[%s7985_s9 + $0x8c] ss:$272 sps:$4 sm:$0xff]   ;;  %v7143_v43 = vld [vmem:[%s7985_s9 + $0x80] ss:$272 sps:$4 sm:$0xff]  }
 0x15d   : > { %4501 = vmatprep.subr.bf16.mxu0 %v7103_v44  ;;  %4544 = vmatprep.subr.bf16.mxu1 %v7106_v45  ;;  %v7146_v44 = vld [vmem:[%s7985_s9 + $0x88] ss:$272 sps:$4 sm:$0xff]   ;;  %v7151_v45 = vld [vmem:[%s7985_s9 + $0x2a4] ss:$272 sps:$4 sm:$0xff]  }
 0x15e   : > { %4531 = vmatprep.mubr.bf16.mxu0 %v7762_v0  ;;  %4574 = vmatprep.mubr.bf16.mxu1 %v7762_v0 }
 0x160   : > { %4502 = vmatpush1.bf16.msra.mxu0 %v7101_v46  ;;  %4545 = vmatpush1.bf16.msra.mxu1 %v7104_v47  ;;  %v7154_v46 = vld [vmem:[%s7985_s9 + $0x2ac] ss:$272 sps:$4 sm:$0xff]   ;;  %v7149_v47 = vld [vmem:[%s7985_s9 + $0x2a0] ss:$272 sps:$4 sm:$0xff]  }
 0x161   : > { %4503 = vmatprep.subr.bf16.mxu0 %v7109_v48  ;;  %4546 = vmatprep.subr.bf16.mxu1 %v7112_v35  ;;  %v7152_v48 = vld [vmem:[%s7985_s9 + $0x2a8] ss:$272 sps:$4 sm:$0xff]   ;;  %v7157_v35 = vld [vmem:[%s7985_s9 + $0x4c4] ss:$272 sps:$4 sm:$0xff]  }
 0x164   : > { %4504 = vmatpush1.bf16.msra.mxu0 %v7107_v49  ;;  %4547 = vmatpush1.bf16.msra.mxu1 %v7110_v51  ;;  %v7160_v49 = vld [vmem:[%s7985_s9 + $0x4cc] ss:$272 sps:$4 sm:$0xff]   ;;  %v7158_v51 = vld [vmem:[%s7985_s9 + $0x4c8] ss:$272 sps:$4 sm:$0xff]  }
 0x165   : > { %4505 = vmatprep.subr.bf16.mxu0 %v7115_v52  ;;  %4548 = vmatprep.subr.bf16.mxu1 %v7118_v53  ;;  %v7163_v52 = vld [vmem:[%s7985_s9 + $0x6e4] ss:$272 sps:$4 sm:$0xff]   ;;  %v7166_v53 = vld [vmem:[%s7985_s9 + $0x6ec] ss:$272 sps:$4 sm:$0xff]  }
 0x168   : > { %4506 = vmatpush1.bf16.msra.mxu0 %v7113_v54  ;;  %4549 = vmatpush1.bf16.msra.mxu1 %v7116_v56  ;;  %v7161_v54 = vld [vmem:[%s7985_s9 + $0x6e0] ss:$272 sps:$4 sm:$0xff]   ;;  %v7164_v56 = vld [vmem:[%s7985_s9 + $0x6e8] ss:$272 sps:$4 sm:$0xff]  }
 0x169   : > { %4507 = vmatprep.subr.bf16.mxu0 %v7121_v57  ;;  %4550 = vmatprep.subr.bf16.mxu1 %v7124_v58  ;;  %v7169_v57 = vld [vmem:[%s7985_s9 + $0x904] ss:$272 sps:$4 sm:$0xff]   ;;  %v7172_v58 = vld [vmem:[%s7985_s9 + $0x90c] ss:$272 sps:$4 sm:$0xff]  }
 0x16c   : > { %4508 = vmatpush1.bf16.msra.mxu0 %v7119_v59  ;;  %4551 = vmatpush1.bf16.msra.mxu1 %v7122_v60  ;;  %v8341_v59 = vsub.s32 4, %v8265_v55  ;;  %v8344_v60 = vsub.s32 6, %v8265_v55 }
 0x16d   : > { %4509 = vmatprep.subr.bf16.mxu0 %v7127_v3  ;;  %4552 = vmatprep.subr.bf16.mxu1 %v7130_v4  ;;  %v8347_v3 = vsub.s32 5, %v8265_v55  ;;  %v7167_v4 = vld [vmem:[%s7985_s9 + $0x900] ss:$272 sps:$4 sm:$0xff]  }
 0x16e   : > { %v3931_v14 = vpop.f32.mrb[0].mxu0  ;;  %v3974_v15 = vpop.f32.mrb[0].mxu1 }
 0x16f   : > { %v3932_v16 = vadd.f32 %v3931_v14, %v834_v5  ;;  %v3975_v17 = vadd.f32 %v3974_v15, %v842_v6  ;;  %v3933_v18 = vpop.f32.mrb[1].mxu0  ;;  %v3976_v19 = vpop.f32.mrb[1].mxu1  ;;  %v7181_v15 = vld [vmem:[%s7985_s9 + $0xd44] ss:$272 sps:$4 sm:$0xff]  }
 0x170   : > { %v3934_v21 = vadd.f32 %v3933_v18, %v838_v8  ;;  %v3977_v22 = vadd.f32 %v3976_v19, %v846_v9  ;;  %v3935_v23 = vpop.f32.mrb[2].mxu0  ;;  %v3978_v24 = vpop.f32.mrb[2].mxu1  ;;  %4510 = vmatpush1.bf16.msra.mxu0 %v7125_v7  ;;  %4553 = vmatpush1.bf16.msra.mxu1 %v7128_v10  ;;  %v7175_v7 = vld [vmem:[%s7985_s9 + $0xb24] ss:$272 sps:$4 sm:$0xff]   ;;  %v7176_v10 = vld [vmem:[%s7985_s9 + $0xb28] ss:$272 sps:$4 sm:$0xff]  }
 0x171   : > { %v3936_v27 = vadd.f32 %v3935_v23, %v834_v5  ;;  %v3979_v28 = vadd.f32 %v3978_v24, %v842_v6  ;;  %v3937_v29 = vpop.f32.mrb[3].mxu0  ;;  %v3980_v30 = vpop.f32.mrb[3].mxu1  ;;  %4511 = vmatprep.subr.bf16.mxu0 %v7133_v11  ;;  %4554 = vmatprep.subr.bf16.mxu1 %v7136_v13  ;;  %v7170_v5 = vld [vmem:[%s7985_s9 + $0x908] ss:$272 sps:$4 sm:$0xff]   ;;  %v8352_v6 = vsub.s32 7, %v8265_v55  ;;  %v850_v11 = vrot.slane %v8281_v63, %v8341_v59 }
 0x172   : > { %v6597_v32 = vpack.c.bf16 %v3934_v21, %v3932_v16  ;;  %v6598_v33 = vpack.c.bf16 %v3977_v22, %v3975_v17  ;;  %v3938_v34 = vadd.f32 %v3937_v29, %v838_v8  ;;  %v3981_v36 = vadd.f32 %v3980_v30, %v846_v9  ;;  %v7178_v8 = vld [vmem:[%s7985_s9 + $0xb2c] ss:$272 sps:$4 sm:$0xff]   ;;  %v7173_v9 = vld [vmem:[%s7985_s9 + $0xb20] ss:$272 sps:$4 sm:$0xff]  }
 0x173   : > { %v858_v13 = vrot.slane %v8281_v63, %v8344_v60  ;;  %v854_v55 = vrot.slane %v8281_v63, %v8347_v3  ;;  %v862_v14 = vrot.slane %v8281_v63, %v8352_v6  ;;  %v7184_v16 = vld [vmem:[%s7985_s9 + $0xd4c] ss:$272 sps:$4 sm:$0xff]   ;;  %v7179_v19 = vld [vmem:[%s7985_s9 + $0xd40] ss:$272 sps:$4 sm:$0xff]  }
 0x174   : > { %5767 = vst [vmem:[%s8311_s8] sm:$0xff] %v6597_v32  ;;  %5768 = vst [vmem:[%s8311_s8 + $0x8] sm:$0xff] %v6598_v33  ;;  %v6631_v38 = vpack.c.bf16 %v3938_v34, %v3936_v27  ;;  %v6632_v39 = vpack.c.bf16 %v3981_v36, %v3979_v28  ;;  %4512 = vmatpush1.bf16.msra.mxu0 %v7131_v20  ;;  %4555 = vmatpush1.bf16.msra.mxu1 %v7134_v25  ;;  %v7182_v20 = vld [vmem:[%s7985_s9 + $0xd48] ss:$272 sps:$4 sm:$0xff]   ;;  %v7187_v32 = vld [vmem:[%s7985_s9 + $0xf64] ss:$272 sps:$4 sm:$0xff]  }
 0x175   : > { %4513 = vmatprep.subr.bf16.mxu0 %v7139_v26  ;;  %4556 = vmatprep.subr.bf16.mxu1 %v7142_v31  ;;  %v7190_v33 = vld [vmem:[%s7985_s9 + $0xf6c] ss:$272 sps:$4 sm:$0xff]  }
 0x176   : > { %5801 = vst [vmem:[%s8311_s8 + $0x110] sm:$0xff] %v6631_v38  ;;  %5802 = vst [vmem:[%s8311_s8 + $0x118] sm:$0xff] %v6632_v39  ;;  %v7185_v39 = vld [vmem:[%s7985_s9 + $0xf60] ss:$272 sps:$4 sm:$0xff]  }
 0x178   : > { %4514 = vmatpush1.bf16.msra.mxu0 %v7137_v37  ;;  %4557 = vmatpush1.bf16.msra.mxu1 %v7140_v40  ;;  %v7188_v40 = vld [vmem:[%s7985_s9 + $0xf68] ss:$272 sps:$4 sm:$0xff]  }
 0x179   : > { %4585 = vmatprep.subr.bf16.mxu0 %v7145_v41  ;;  %4628 = vmatprep.subr.bf16.mxu1 %v7148_v42 }
 0x17b   : > { %4532 = vmatmul.mubr.bf16.vlgmr.msra.gmra.mrb[28].mxu0 %v8213_v12  ;;  %4575 = vmatmul.mubr.bf16.vlgmr.msra.gmra.mrb[28].mxu1 %v8213_v12 }
 0x17c   : > { %4586 = vmatpush1.bf16.msra.mxu0 %v7143_v43  ;;  %4629 = vmatpush1.bf16.msra.mxu1 %v7146_v44  ;;  %v7193_v43 = vld [vmem:[%s7985_s9 + $0x94] ss:$272 sps:$4 sm:$0xff]   ;;  %v7196_v44 = vld [vmem:[%s7985_s9 + $0x9c] ss:$272 sps:$4 sm:$0xff]  }
 0x17d   : > { %4587 = vmatprep.subr.bf16.mxu0 %v7151_v45  ;;  %4630 = vmatprep.subr.bf16.mxu1 %v7154_v46  ;;  %v7191_v45 = vld [vmem:[%s7985_s9 + $0x90] ss:$272 sps:$4 sm:$0xff]   ;;  %v7194_v46 = vld [vmem:[%s7985_s9 + $0x98] ss:$272 sps:$4 sm:$0xff]  }
 0x17e   : > { %4617 = vmatprep.mubr.bf16.mxu0 %v7762_v0  ;;  %4660 = vmatprep.mubr.bf16.mxu1 %v7762_v0 }
 0x180   : > { %4588 = vmatpush1.bf16.msra.mxu0 %v7149_v47  ;;  %4631 = vmatpush1.bf16.msra.mxu1 %v7152_v48  ;;  %v7199_v47 = vld [vmem:[%s7985_s9 + $0x2b4] ss:$272 sps:$4 sm:$0xff]   ;;  %v7202_v48 = vld [vmem:[%s7985_s9 + $0x2bc] ss:$272 sps:$4 sm:$0xff]  }
 0x181   : > { %4589 = vmatprep.subr.bf16.mxu0 %v7157_v35  ;;  %4632 = vmatprep.subr.bf16.mxu1 %v7160_v49  ;;  %v7197_v35 = vld [vmem:[%s7985_s9 + $0x2b0] ss:$272 sps:$4 sm:$0xff]   ;;  %v7200_v49 = vld [vmem:[%s7985_s9 + $0x2b8] ss:$272 sps:$4 sm:$0xff]  }
 0x184   : > { %4590 = vmatpush1.bf16.msra.mxu0 %v7155_v50  ;;  %4633 = vmatpush1.bf16.msra.mxu1 %v7158_v51  ;;  %v7205_v50 = vld [vmem:[%s7985_s9 + $0x4d4] ss:$272 sps:$4 sm:$0xff]   ;;  %v7208_v51 = vld [vmem:[%s7985_s9 + $0x4dc] ss:$272 sps:$4 sm:$0xff]  }
 0x185   : > { %4591 = vmatprep.subr.bf16.mxu0 %v7163_v52  ;;  %4634 = vmatprep.subr.bf16.mxu1 %v7166_v53  ;;  %v7206_v52 = vld [vmem:[%s7985_s9 + $0x4d8] ss:$272 sps:$4 sm:$0xff]   ;;  %v7211_v53 = vld [vmem:[%s7985_s9 + $0x6f4] ss:$272 sps:$4 sm:$0xff]  }
 0x188   : > { %4592 = vmatpush1.bf16.msra.mxu0 %v7161_v54  ;;  %4635 = vmatpush1.bf16.msra.mxu1 %v7164_v56  ;;  %v7214_v54 = vld [vmem:[%s7985_s9 + $0x6fc] ss:$272 sps:$4 sm:$0xff]   ;;  %v7209_v56 = vld [vmem:[%s7985_s9 + $0x6f0] ss:$272 sps:$4 sm:$0xff]  }
 0x189   : > { %4593 = vmatprep.subr.bf16.mxu0 %v7169_v57  ;;  %4636 = vmatprep.subr.bf16.mxu1 %v7172_v58  ;;  %v7212_v57 = vld [vmem:[%s7985_s9 + $0x6f8] ss:$272 sps:$4 sm:$0xff]   ;;  %v7217_v58 = vld [vmem:[%s7985_s9 + $0x914] ss:$272 sps:$4 sm:$0xff]  }
 0x18c   : > { %4594 = vmatpush1.bf16.msra.mxu0 %v7167_v4  ;;  %4637 = vmatpush1.bf16.msra.mxu1 %v7170_v5  ;;  %v7220_v4 = vld [vmem:[%s7985_s9 + $0x91c] ss:$272 sps:$4 sm:$0xff]   ;;  %v7215_v5 = vld [vmem:[%s7985_s9 + $0x910] ss:$272 sps:$4 sm:$0xff]  }
 0x18d   : > { %4595 = vmatprep.subr.bf16.mxu0 %v7175_v7  ;;  %4638 = vmatprep.subr.bf16.mxu1 %v7178_v8  ;;  %v7218_v7 = vld [vmem:[%s7985_s9 + $0x918] ss:$272 sps:$4 sm:$0xff]  }
 0x18e   : > { %v4017_v17 = vpop.f32.mrb[4].mxu0  ;;  %v4060_v18 = vpop.f32.mrb[4].mxu1  ;;  %v8403_v8 = vld [vmem:[%s8278_s30 + $0x8] sm:$0xff] }
 0x18f   : > { %v4018_v21 = vadd.f32 %v4017_v17, %v850_v11  ;;  %v4061_v22 = vadd.f32 %v4060_v18, %v858_v13  ;;  %v4019_v23 = vpop.f32.mrb[5].mxu0  ;;  %v4062_v24 = vpop.f32.mrb[5].mxu1  ;;  %v7229_v17 = vld [vmem:[%s7985_s9 + $0xd54] ss:$272 sps:$4 sm:$0xff]   ;;  %v7232_v18 = vld [vmem:[%s7985_s9 + $0xd5c] ss:$272 sps:$4 sm:$0xff]  }
 0x190   : > { %v4020_v25 = vadd.f32 %v4019_v23, %v854_v55  ;;  %v4063_v26 = vadd.f32 %v4062_v24, %v862_v14  ;;  %v4021_v27 = vpop.f32.mrb[6].mxu0  ;;  %v4064_v28 = vpop.f32.mrb[6].mxu1  ;;  %4596 = vmatpush1.bf16.msra.mxu0 %v7173_v9  ;;  %4639 = vmatpush1.bf16.msra.mxu1 %v7176_v10  ;;  %v7223_v9 = vld [vmem:[%s7985_s9 + $0xb34] ss:$272 sps:$4 sm:$0xff]   ;;  %v7226_v10 = vld [vmem:[%s7985_s9 + $0xb3c] ss:$272 sps:$4 sm:$0xff]  }
 0x191   : > { %v4022_v63 = vadd.f32 %v4021_v27, %v850_v11  ;;  %v4065_v29 = vadd.f32 %v4064_v28, %v858_v13  ;;  %v4023_v30 = vpop.f32.mrb[7].mxu0  ;;  %v4066_v31 = vpop.f32.mrb[7].mxu1  ;;  %4597 = vmatprep.subr.bf16.mxu0 %v7181_v15  ;;  %4640 = vmatprep.subr.bf16.mxu1 %v7184_v16  ;;  %v7221_v11 = vld [vmem:[%s7985_s9 + $0xb30] ss:$272 sps:$4 sm:$0xff]   ;;  %v866_v13 = vrot.slane %v8403_v8, %v8273_v61  ;;  %v7224_v16 = vld [vmem:[%s7985_s9 + $0xb38] ss:$272 sps:$4 sm:$0xff]  }
 0x192   : > { %v6599_v34 = vpack.c.bf16 %v4020_v25, %v4018_v21  ;;  %v6600_v36 = vpack.c.bf16 %v4063_v26, %v4061_v22  ;;  %v4024_v37 = vadd.f32 %v4023_v30, %v854_v55  ;;  %v4067_v38 = vadd.f32 %v4066_v31, %v862_v14  ;;  %v7227_v21 = vld [vmem:[%s7985_s9 + $0xd50] ss:$272 sps:$4 sm:$0xff]   ;;  %v7230_v22 = vld [vmem:[%s7985_s9 + $0xd58] ss:$272 sps:$4 sm:$0xff]  }
 0x193   : > { %v874_v55 = vrot.slane %v8403_v8, %v8276_v62  ;;  %v870_v14 = vrot.slane %v8403_v8, %v8284_v1  ;;  %v878_v15 = vrot.slane %v8403_v8, %v8287_v2 }
 0x194   : > { %5769 = vst [vmem:[%s8311_s8 + $0x10] sm:$0xff] %v6599_v34  ;;  %5770 = vst [vmem:[%s8311_s8 + $0x18] sm:$0xff] %v6600_v36  ;;  %v6633_v41 = vpack.c.bf16 %v4024_v37, %v4022_v63  ;;  %v6634_v42 = vpack.c.bf16 %v4067_v38, %v4065_v29  ;;  %4598 = vmatpush1.bf16.msra.mxu0 %v7179_v19  ;;  %4641 = vmatpush1.bf16.msra.mxu1 %v7182_v20  ;;  %v7235_v34 = vld [vmem:[%s7985_s9 + $0xf74] ss:$272 sps:$4 sm:$0xff]   ;;  %v7238_v36 = vld [vmem:[%s7985_s9 + $0xf7c] ss:$272 sps:$4 sm:$0xff]  }
 0x195   : > { %4599 = vmatprep.subr.bf16.mxu0 %v7187_v32  ;;  %4642 = vmatprep.subr.bf16.mxu1 %v7190_v33 }
 0x196   : > { %5803 = vst [vmem:[%s8311_s8 + $0x120] sm:$0xff] %v6633_v41  ;;  %5804 = vst [vmem:[%s8311_s8 + $0x128] sm:$0xff] %v6634_v42  ;;  %v7233_v41 = vld [vmem:[%s7985_s9 + $0xf70] ss:$272 sps:$4 sm:$0xff]   ;;  %v7236_v42 = vld [vmem:[%s7985_s9 + $0xf78] ss:$272 sps:$4 sm:$0xff]  }
 0x198   : > { %4600 = vmatpush1.bf16.msra.mxu0 %v7185_v39  ;;  %4643 = vmatpush1.bf16.msra.mxu1 %v7188_v40 }
 0x199   : > { %4671 = vmatprep.subr.bf16.mxu0 %v7193_v43  ;;  %4714 = vmatprep.subr.bf16.mxu1 %v7196_v44 }
 0x19b   : > { %4618 = vmatmul.mubr.bf16.vlgmr.msra.gmra.mrb[32].mxu0 %v8213_v12  ;;  %4661 = vmatmul.mubr.bf16.vlgmr.msra.gmra.mrb[32].mxu1 %v8213_v12  ;;  %v7203_v12 = vld [vmem:[%s7985_s9 + $0x4d0] ss:$272 sps:$4 sm:$0xff]  }
 0x19c   : > { %4672 = vmatpush1.bf16.msra.mxu0 %v7191_v45  ;;  %4715 = vmatpush1.bf16.msra.mxu1 %v7194_v46  ;;  %v7241_v45 = vld [vmem:[%s7985_s9 + $0xa4] ss:$272 sps:$4 sm:$0xff]   ;;  %v7244_v46 = vld [vmem:[%s7985_s9 + $0xac] ss:$272 sps:$4 sm:$0xff]  }
 0x19d   : > { %4673 = vmatprep.subr.bf16.mxu0 %v7199_v47  ;;  %4716 = vmatprep.subr.bf16.mxu1 %v7202_v48  ;;  %v7239_v47 = vld [vmem:[%s7985_s9 + $0xa0] ss:$272 sps:$4 sm:$0xff]   ;;  %v7242_v48 = vld [vmem:[%s7985_s9 + $0xa8] ss:$272 sps:$4 sm:$0xff]  }
 0x19e   : > { %4703 = vmatprep.mubr.bf16.mxu0 %v7762_v0  ;;  %4746 = vmatprep.mubr.bf16.mxu1 %v7762_v0 }
 0x1a0   : > { %4674 = vmatpush1.bf16.msra.mxu0 %v7197_v35  ;;  %4717 = vmatpush1.bf16.msra.mxu1 %v7200_v49  ;;  %v7247_v35 = vld [vmem:[%s7985_s9 + $0x2c4] ss:$272 sps:$4 sm:$0xff]   ;;  %v7250_v49 = vld [vmem:[%s7985_s9 + $0x2cc] ss:$272 sps:$4 sm:$0xff]  }
 0x1a1   : > { %4675 = vmatprep.subr.bf16.mxu0 %v7205_v50  ;;  %4718 = vmatprep.subr.bf16.mxu1 %v7208_v51  ;;  %v8435_v50 = vld [vmem:[#allocation2] sm:$0xff]   ;;  %v7245_v51 = vld [vmem:[%s7985_s9 + $0x2c0] ss:$272 sps:$4 sm:$0xff]  }
 0x1a4   : > { %4676 = vmatpush1.bf16.msra.mxu0 %v7203_v12  ;;  %4719 = vmatpush1.bf16.msra.mxu1 %v7206_v52  ;;  %v7248_v12 = vld [vmem:[%s7985_s9 + $0x2c8] ss:$272 sps:$4 sm:$0xff]   ;;  %v7253_v52 = vld [vmem:[%s7985_s9 + $0x4e4] ss:$272 sps:$4 sm:$0xff]  }
 0x1a5   : > { %4677 = vmatprep.subr.bf16.mxu0 %v7211_v53  ;;  %4720 = vmatprep.subr.bf16.mxu1 %v7214_v54  ;;  %v7256_v53 = vld [vmem:[%s7985_s9 + $0x4ec] ss:$272 sps:$4 sm:$0xff]   ;;  %v7251_v54 = vld [vmem:[%s7985_s9 + $0x4e0] ss:$272 sps:$4 sm:$0xff]  }
 0x1a8   : > { %4678 = vmatpush1.bf16.msra.mxu0 %v7209_v56  ;;  %4721 = vmatpush1.bf16.msra.mxu1 %v7212_v57  ;;  %v7254_v56 = vld [vmem:[%s7985_s9 + $0x4e8] ss:$272 sps:$4 sm:$0xff]   ;;  %v7259_v57 = vld [vmem:[%s7985_s9 + $0x704] ss:$272 sps:$4 sm:$0xff]  }
 0x1a9   : > { %4679 = vmatprep.subr.bf16.mxu0 %v7217_v58  ;;  %4722 = vmatprep.subr.bf16.mxu1 %v7220_v4  ;;  %v7262_v58 = vld [vmem:[%s7985_s9 + $0x70c] ss:$272 sps:$4 sm:$0xff]   ;;  %v7257_v4 = vld [vmem:[%s7985_s9 + $0x700] ss:$272 sps:$4 sm:$0xff]  }
 0x1ac   : > { %4680 = vmatpush1.bf16.msra.mxu0 %v7215_v5  ;;  %4723 = vmatpush1.bf16.msra.mxu1 %v7218_v7  ;;  %v7260_v5 = vld [vmem:[%s7985_s9 + $0x708] ss:$272 sps:$4 sm:$0xff]   ;;  %v7265_v7 = vld [vmem:[%s7985_s9 + $0x924] ss:$272 sps:$4 sm:$0xff]  }
 0x1ad   : > { %4681 = vmatprep.subr.bf16.mxu0 %v7223_v9  ;;  %4724 = vmatprep.subr.bf16.mxu1 %v7226_v10  ;;  %v7268_v9 = vld [vmem:[%s7985_s9 + $0x92c] ss:$272 sps:$4 sm:$0xff]   ;;  %v7263_v10 = vld [vmem:[%s7985_s9 + $0x920] ss:$272 sps:$4 sm:$0xff]  }
 0x1ae   : > { %v4103_v19 = vpop.f32.mrb[8].mxu0  ;;  %v4146_v20 = vpop.f32.mrb[8].mxu1 }
 0x1af   : > { %v4104_v23 = vadd.f32 %v4103_v19, %v866_v13  ;;  %v4147_v24 = vadd.f32 %v4146_v20, %v874_v55  ;;  %v4105_v25 = vpop.f32.mrb[9].mxu0  ;;  %v4148_v26 = vpop.f32.mrb[9].mxu1  ;;  %v894_v19 = vrot.slane %v8403_v8, %v8352_v6  ;;  %v7277_v20 = vld [vmem:[%s7985_s9 + $0xd64] ss:$272 sps:$4 sm:$0xff]  }
 0x1b0   : > { %v4106_v27 = vadd.f32 %v4105_v25, %v870_v14  ;;  %v4149_v28 = vadd.f32 %v4148_v26, %v878_v15  ;;  %v4107_v63 = vpop.f32.mrb[10].mxu0  ;;  %v4150_v29 = vpop.f32.mrb[10].mxu1  ;;  %4682 = vmatpush1.bf16.msra.mxu0 %v7221_v11  ;;  %4725 = vmatpush1.bf16.msra.mxu1 %v7224_v16  ;;  %v7266_v11 = vld [vmem:[%s7985_s9 + $0x928] ss:$272 sps:$4 sm:$0xff]   ;;  %v882_v16 = vrot.slane %v8403_v8, %v8341_v59 }
 0x1b1   : > { %v4108_v30 = vadd.f32 %v4107_v63, %v866_v13  ;;  %v4151_v31 = vadd.f32 %v4150_v29, %v874_v55  ;;  %v4109_v32 = vpop.f32.mrb[11].mxu0  ;;  %v4152_v33 = vpop.f32.mrb[11].mxu1  ;;  %4683 = vmatprep.subr.bf16.mxu0 %v7229_v17  ;;  %4726 = vmatprep.subr.bf16.mxu1 %v7232_v18  ;;  %v7271_v13 = vld [vmem:[%s7985_s9 + $0xb44] ss:$272 sps:$4 sm:$0xff]   ;;  %v7274_v55 = vld [vmem:[%s7985_s9 + $0xb4c] ss:$272 sps:$4 sm:$0xff]   ;;  %v890_v17 = vrot.slane %v8403_v8, %v8344_v60 }
 0x1b2   : > { %v6601_v37 = vpack.c.bf16 %v4106_v27, %v4104_v23  ;;  %v6602_v38 = vpack.c.bf16 %v4149_v28, %v4147_v24  ;;  %v4110_v39 = vadd.f32 %v4109_v32, %v870_v14  ;;  %v4153_v40 = vadd.f32 %v4152_v33, %v878_v15  ;;  %v7269_v14 = vld [vmem:[%s7985_s9 + $0xb40] ss:$272 sps:$4 sm:$0xff]   ;;  %v7272_v15 = vld [vmem:[%s7985_s9 + $0xb48] ss:$272 sps:$4 sm:$0xff]  }
 0x1b3   : > { %v886_v18 = vrot.slane %v8403_v8, %v8347_v3  ;;  %v7275_v8 = vld [vmem:[%s7985_s9 + $0xd60] ss:$272 sps:$4 sm:$0xff]  }
 0x1b4   : > { %5771 = vst [vmem:[%s8311_s8 + $0x20] sm:$0xff] %v6601_v37  ;;  %5772 = vst [vmem:[%s8311_s8 + $0x28] sm:$0xff] %v6602_v38  ;;  %v6635_v43 = vpack.c.bf16 %v4110_v39, %v4108_v30  ;;  %v6636_v44 = vpack.c.bf16 %v4153_v40, %v4151_v31  ;;  %4684 = vmatpush1.bf16.msra.mxu0 %v7227_v21  ;;  %4727 = vmatpush1.bf16.msra.mxu1 %v7230_v22  ;;  %v7280_v21 = vld [vmem:[%s7985_s9 + $0xd6c] ss:$272 sps:$4 sm:$0xff]   ;;  %v7278_v31 = vld [vmem:[%s7985_s9 + $0xd68] ss:$272 sps:$4 sm:$0xff]  }
 0x1b5   : > { %4685 = vmatprep.subr.bf16.mxu0 %v7235_v34  ;;  %4728 = vmatprep.subr.bf16.mxu1 %v7238_v36  ;;  %v7283_v37 = vld [vmem:[%s7985_s9 + $0xf84] ss:$272 sps:$4 sm:$0xff]   ;;  %v7286_v38 = vld [vmem:[%s7985_s9 + $0xf8c] ss:$272 sps:$4 sm:$0xff]  }
 0x1b6   : > { %5805 = vst [vmem:[%s8311_s8 + $0x130] sm:$0xff] %v6635_v43  ;;  %5806 = vst [vmem:[%s8311_s8 + $0x138] sm:$0xff] %v6636_v44 }
 0x1b8   : > { %4686 = vmatpush1.bf16.msra.mxu0 %v7233_v41  ;;  %4729 = vmatpush1.bf16.msra.mxu1 %v7236_v42 }
 0x1b9   : > { %4757 = vmatprep.subr.bf16.mxu0 %v7241_v45  ;;  %4800 = vmatprep.subr.bf16.mxu1 %v7244_v46  ;;  %v7281_v45 = vld [vmem:[%s7985_s9 + $0xf80] ss:$272 sps:$4 sm:$0xff]   ;;  %v7284_v46 = vld [vmem:[%s7985_s9 + $0xf88] ss:$272 sps:$4 sm:$0xff]  }
 0x1bb   : > { %4704 = vmatmul.mubr.bf16.vlgmr.msra.gmra.mrb[36].mxu0 %v8435_v50  ;;  %4747 = vmatmul.mubr.bf16.vlgmr.msra.gmra.mrb[36].mxu1 %v8435_v50 }
 0x1bc   : > { %4758 = vmatpush1.bf16.msra.mxu0 %v7239_v47  ;;  %4801 = vmatpush1.bf16.msra.mxu1 %v7242_v48  ;;  %v7289_v47 = vld [vmem:[%s7985_s9 + $0xb4] ss:$272 sps:$4 sm:$0xff]   ;;  %v7292_v48 = vld [vmem:[%s7985_s9 + $0xbc] ss:$272 sps:$4 sm:$0xff]  }
 0x1bd   : > { %4759 = vmatprep.subr.bf16.mxu0 %v7247_v35  ;;  %4802 = vmatprep.subr.bf16.mxu1 %v7250_v49  ;;  %v7287_v35 = vld [vmem:[%s7985_s9 + $0xb0] ss:$272 sps:$4 sm:$0xff]   ;;  %v7290_v49 = vld [vmem:[%s7985_s9 + $0xb8] ss:$272 sps:$4 sm:$0xff]  }
 0x1be   : > { %4789 = vmatprep.mubr.bf16.mxu0 %v7762_v0  ;;  %4832 = vmatprep.mubr.bf16.mxu1 %v7762_v0 }
 0x1c0   : > { %4760 = vmatpush1.bf16.msra.mxu0 %v7245_v51  ;;  %4803 = vmatpush1.bf16.msra.mxu1 %v7248_v12  ;;  %v7295_v51 = vld [vmem:[%s7985_s9 + $0x2d4] ss:$272 sps:$4 sm:$0xff]   ;;  %v7298_v12 = vld [vmem:[%s7985_s9 + $0x2dc] ss:$272 sps:$4 sm:$0xff]  }
 0x1c1   : > { %4761 = vmatprep.subr.bf16.mxu0 %v7253_v52  ;;  %4804 = vmatprep.subr.bf16.mxu1 %v7256_v53  ;;  %v7293_v52 = vld [vmem:[%s7985_s9 + $0x2d0] ss:$272 sps:$4 sm:$0xff]   ;;  %v7296_v53 = vld [vmem:[%s7985_s9 + $0x2d8] ss:$272 sps:$4 sm:$0xff]  }
 0x1c4   : > { %4762 = vmatpush1.bf16.msra.mxu0 %v7251_v54  ;;  %4805 = vmatpush1.bf16.msra.mxu1 %v7254_v56  ;;  %v7301_v54 = vld [vmem:[%s7985_s9 + $0x4f4] ss:$272 sps:$4 sm:$0xff]   ;;  %v7304_v56 = vld [vmem:[%s7985_s9 + $0x4fc] ss:$272 sps:$4 sm:$0xff]  }
 0x1c5   : > { %4763 = vmatprep.subr.bf16.mxu0 %v7259_v57  ;;  %4806 = vmatprep.subr.bf16.mxu1 %v7262_v58  ;;  %v7299_v57 = vld [vmem:[%s7985_s9 + $0x4f0] ss:$272 sps:$4 sm:$0xff]   ;;  %v7302_v58 = vld [vmem:[%s7985_s9 + $0x4f8] ss:$272 sps:$4 sm:$0xff]  }
 0x1c8   : > { %4764 = vmatpush1.bf16.msra.mxu0 %v7257_v4  ;;  %4807 = vmatpush1.bf16.msra.mxu1 %v7260_v5  ;;  %v7307_v4 = vld [vmem:[%s7985_s9 + $0x714] ss:$272 sps:$4 sm:$0xff]   ;;  %v7310_v5 = vld [vmem:[%s7985_s9 + $0x71c] ss:$272 sps:$4 sm:$0xff]  }
 0x1c9   : > { %4765 = vmatprep.subr.bf16.mxu0 %v7265_v7  ;;  %4808 = vmatprep.subr.bf16.mxu1 %v7268_v9  ;;  %v7305_v7 = vld [vmem:[%s7985_s9 + $0x710] ss:$272 sps:$4 sm:$0xff]   ;;  %v7308_v9 = vld [vmem:[%s7985_s9 + $0x718] ss:$272 sps:$4 sm:$0xff]  }
 0x1cc   : > { %4766 = vmatpush1.bf16.msra.mxu0 %v7263_v10  ;;  %4809 = vmatpush1.bf16.msra.mxu1 %v7266_v11  ;;  %v7313_v10 = vld [vmem:[%s7985_s9 + $0x934] ss:$272 sps:$4 sm:$0xff]   ;;  %v7316_v11 = vld [vmem:[%s7985_s9 + $0x93c] ss:$272 sps:$4 sm:$0xff]  }
 0x1cd   : > { %4767 = vmatprep.subr.bf16.mxu0 %v7271_v13  ;;  %4810 = vmatprep.subr.bf16.mxu1 %v7274_v55  ;;  %v7311_v13 = vld [vmem:[%s7985_s9 + $0x930] ss:$272 sps:$4 sm:$0xff]   ;;  %v7314_v55 = vld [vmem:[%s7985_s9 + $0x938] ss:$272 sps:$4 sm:$0xff]  }
 0x1ce   : > { %v4189_v22 = vpop.f32.mrb[12].mxu0  ;;  %v4232_v23 = vpop.f32.mrb[12].mxu1 }
 0x1cf   : > { %v4190_v24 = vadd.f32 %v4189_v22, %v882_v16  ;;  %v4233_v25 = vadd.f32 %v4232_v23, %v890_v17  ;;  %v4191_v26 = vpop.f32.mrb[13].mxu0  ;;  %v4234_v27 = vpop.f32.mrb[13].mxu1  ;;  %v7320_v22 = vld [vmem:[%s7985_s9 + $0xb58] ss:$272 sps:$4 sm:$0xff]   ;;  %v7325_v23 = vld [vmem:[%s7985_s9 + $0xd74] ss:$272 sps:$4 sm:$0xff]  }
 0x1d0   : > { %v4192_v28 = vadd.f32 %v4191_v26, %v886_v18  ;;  %v4235_v63 = vadd.f32 %v4234_v27, %v894_v19  ;;  %v4193_v29 = vpop.f32.mrb[14].mxu0  ;;  %v4236_v30 = vpop.f32.mrb[14].mxu1  ;;  %4768 = vmatpush1.bf16.msra.mxu0 %v7269_v14  ;;  %4811 = vmatpush1.bf16.msra.mxu1 %v7272_v15  ;;  %v8504_v14 = vld [vmem:[%s8278_s30 + $0x10] sm:$0xff] }
 0x1d1   : > { %v4194_v32 = vadd.f32 %v4193_v29, %v882_v16  ;;  %v4237_v33 = vadd.f32 %v4236_v30, %v890_v17  ;;  %v4195_v34 = vpop.f32.mrb[15].mxu0  ;;  %v4238_v36 = vpop.f32.mrb[15].mxu1  ;;  %4769 = vmatprep.subr.bf16.mxu0 %v7277_v20  ;;  %4812 = vmatprep.subr.bf16.mxu1 %v7280_v21  ;;  %v7319_v15 = vld [vmem:[%s7985_s9 + $0xb54] ss:$272 sps:$4 sm:$0xff]   ;;  %v7322_v16 = vld [vmem:[%s7985_s9 + $0xb5c] ss:$272 sps:$4 sm:$0xff]   ;;  %v898_v17 = vrot.slane %v8504_v14, %v8273_v61 }
 0x1d2   : > { %v6603_v39 = vpack.c.bf16 %v4192_v28, %v4190_v24  ;;  %v6604_v40 = vpack.c.bf16 %v4235_v63, %v4233_v25  ;;  %v4196_v41 = vadd.f32 %v4195_v34, %v886_v18  ;;  %v4239_v42 = vadd.f32 %v4238_v36, %v894_v19  ;;  %v7317_v21 = vld [vmem:[%s7985_s9 + $0xb50] ss:$272 sps:$4 sm:$0xff]   ;;  %v7328_v24 = vld [vmem:[%s7985_s9 + $0xd7c] ss:$272 sps:$4 sm:$0xff]   ;;  %v7326_v34 = vld [vmem:[%s7985_s9 + $0xd78] ss:$272 sps:$4 sm:$0xff]  }
 0x1d3   : > { %v906_v18 = vrot.slane %v8504_v14, %v8276_v62  ;;  %v902_v19 = vrot.slane %v8504_v14, %v8284_v1  ;;  %v910_v20 = vrot.slane %v8504_v14, %v8287_v2 }
 0x1d4   : > { %5773 = vst [vmem:[%s8311_s8 + $0x30] sm:$0xff] %v6603_v39  ;;  %5774 = vst [vmem:[%s8311_s8 + $0x38] sm:$0xff] %v6604_v40  ;;  %v6637_v43 = vpack.c.bf16 %v4196_v41, %v4194_v32  ;;  %v6638_v44 = vpack.c.bf16 %v4239_v42, %v4237_v33  ;;  %4770 = vmatpush1.bf16.msra.mxu0 %v7275_v8  ;;  %4813 = vmatpush1.bf16.msra.mxu1 %v7278_v31  ;;  %v7323_v33 = vld [vmem:[%s7985_s9 + $0xd70] ss:$272 sps:$4 sm:$0xff]   ;;  %v7331_v40 = vld [vmem:[%s7985_s9 + $0xf94] ss:$272 sps:$4 sm:$0xff]  }
 0x1d5   : > { %4771 = vmatprep.subr.bf16.mxu0 %v7283_v37  ;;  %4814 = vmatprep.subr.bf16.mxu1 %v7286_v38  ;;  %v7334_v41 = vld [vmem:[%s7985_s9 + $0xf9c] ss:$272 sps:$4 sm:$0xff]  }
 0x1d6   : > { %5807 = vst [vmem:[%s8311_s8 + $0x140] sm:$0xff] %v6637_v43  ;;  %5808 = vst [vmem:[%s8311_s8 + $0x148] sm:$0xff] %v6638_v44 }
 0x1d8   : > { %4772 = vmatpush1.bf16.msra.mxu0 %v7281_v45  ;;  %4815 = vmatpush1.bf16.msra.mxu1 %v7284_v46 }
 0x1d9   : > { %4843 = vmatprep.subr.bf16.mxu0 %v7289_v47  ;;  %4886 = vmatprep.subr.bf16.mxu1 %v7292_v48  ;;  %v7329_v48 = vld [vmem:[%s7985_s9 + $0xf90] ss:$272 sps:$4 sm:$0xff]  }
 0x1db   : > { %4790 = vmatmul.mubr.bf16.vlgmr.msra.gmra.mrb[40].mxu0 %v8435_v50  ;;  %4833 = vmatmul.mubr.bf16.vlgmr.msra.gmra.mrb[40].mxu1 %v8435_v50 }
 0x1dc   : > { %4844 = vmatpush1.bf16.msra.mxu0 %v7287_v35  ;;  %4887 = vmatpush1.bf16.msra.mxu1 %v7290_v49  ;;  %v7332_v35 = vld [vmem:[%s7985_s9 + $0xf98] ss:$272 sps:$4 sm:$0xff]   ;;  %v7337_v49 = vld [vmem:[%s7985_s9 + $0xc4] ss:$272 sps:$4 sm:$0xff]  }
 0x1dd   : > { %4845 = vmatprep.subr.bf16.mxu0 %v7295_v51  ;;  %4888 = vmatprep.subr.bf16.mxu1 %v7298_v12  ;;  %v7340_v51 = vld [vmem:[%s7985_s9 + $0xcc] ss:$272 sps:$4 sm:$0xff]   ;;  %v7335_v12 = vld [vmem:[%s7985_s9 + $0xc0] ss:$272 sps:$4 sm:$0xff]  }
 0x1de   : > { %4875 = vmatprep.mubr.bf16.mxu0 %v7762_v0  ;;  %4918 = vmatprep.mubr.bf16.mxu1 %v7762_v0 }
 0x1e0   : > { %4846 = vmatpush1.bf16.msra.mxu0 %v7293_v52  ;;  %4889 = vmatpush1.bf16.msra.mxu1 %v7296_v53  ;;  %v7338_v52 = vld [vmem:[%s7985_s9 + $0xc8] ss:$272 sps:$4 sm:$0xff]   ;;  %v7343_v53 = vld [vmem:[%s7985_s9 + $0x2e4] ss:$272 sps:$4 sm:$0xff]  }
 0x1e1   : > { %4847 = vmatprep.subr.bf16.mxu0 %v7301_v54  ;;  %4890 = vmatprep.subr.bf16.mxu1 %v7304_v56  ;;  %v7346_v54 = vld [vmem:[%s7985_s9 + $0x2ec] ss:$272 sps:$4 sm:$0xff]   ;;  %v7341_v56 = vld [vmem:[%s7985_s9 + $0x2e0] ss:$272 sps:$4 sm:$0xff]  }
 0x1e4   : > { %4848 = vmatpush1.bf16.msra.mxu0 %v7299_v57  ;;  %4891 = vmatpush1.bf16.msra.mxu1 %v7302_v58  ;;  %v7344_v57 = vld [vmem:[%s7985_s9 + $0x2e8] ss:$272 sps:$4 sm:$0xff]   ;;  %v7349_v58 = vld [vmem:[%s7985_s9 + $0x504] ss:$272 sps:$4 sm:$0xff]  }
 0x1e5   : > { %4849 = vmatprep.subr.bf16.mxu0 %v7307_v4  ;;  %4892 = vmatprep.subr.bf16.mxu1 %v7310_v5  ;;  %v7352_v4 = vld [vmem:[%s7985_s9 + $0x50c] ss:$272 sps:$4 sm:$0xff]   ;;  %v7347_v5 = vld [vmem:[%s7985_s9 + $0x500] ss:$272 sps:$4 sm:$0xff]  }
 0x1e8   : > { %4850 = vmatpush1.bf16.msra.mxu0 %v7305_v7  ;;  %4893 = vmatpush1.bf16.msra.mxu1 %v7308_v9  ;;  %v7350_v7 = vld [vmem:[%s7985_s9 + $0x508] ss:$272 sps:$4 sm:$0xff]   ;;  %v7355_v9 = vld [vmem:[%s7985_s9 + $0x724] ss:$272 sps:$4 sm:$0xff]  }
 0x1e9   : > { %4851 = vmatprep.subr.bf16.mxu0 %v7313_v10  ;;  %4894 = vmatprep.subr.bf16.mxu1 %v7316_v11  ;;  %v7358_v10 = vld [vmem:[%s7985_s9 + $0x72c] ss:$272 sps:$4 sm:$0xff]   ;;  %v7353_v11 = vld [vmem:[%s7985_s9 + $0x720] ss:$272 sps:$4 sm:$0xff]  }
 0x1ec   : > { %4852 = vmatpush1.bf16.msra.mxu0 %v7311_v13  ;;  %4895 = vmatpush1.bf16.msra.mxu1 %v7314_v55  ;;  %v7356_v13 = vld [vmem:[%s7985_s9 + $0x728] ss:$272 sps:$4 sm:$0xff]   ;;  %v7361_v55 = vld [vmem:[%s7985_s9 + $0x944] ss:$272 sps:$4 sm:$0xff]  }
 0x1ed   : > { %4853 = vmatprep.subr.bf16.mxu0 %v7319_v15  ;;  %4896 = vmatprep.subr.bf16.mxu1 %v7322_v16  ;;  %v7364_v15 = vld [vmem:[%s7985_s9 + $0x94c] ss:$272 sps:$4 sm:$0xff]   ;;  %v7359_v16 = vld [vmem:[%s7985_s9 + $0x940] ss:$272 sps:$4 sm:$0xff]  }
 0x1ee   : > { %v4275_v25 = vpop.f32.mrb[16].mxu0  ;;  %v4318_v26 = vpop.f32.mrb[16].mxu1 }
 0x1ef   : > { %v4276_v27 = vadd.f32 %v4275_v25, %v898_v17  ;;  %v4319_v28 = vadd.f32 %v4318_v26, %v906_v18  ;;  %v4277_v63 = vpop.f32.mrb[17].mxu0  ;;  %v4320_v29 = vpop.f32.mrb[17].mxu1  ;;  %v7368_v25 = vld [vmem:[%s7985_s9 + $0xb68] ss:$272 sps:$4 sm:$0xff]   ;;  %v7373_v26 = vld [vmem:[%s7985_s9 + $0xd84] ss:$272 sps:$4 sm:$0xff]  }
 0x1f0   : > { %v4278_v30 = vadd.f32 %v4277_v63, %v902_v19  ;;  %v4321_v8 = vadd.f32 %v4320_v29, %v910_v20  ;;  %v4279_v31 = vpop.f32.mrb[18].mxu0  ;;  %v4322_v32 = vpop.f32.mrb[18].mxu1  ;;  %4854 = vmatpush1.bf16.msra.mxu0 %v7317_v21  ;;  %4897 = vmatpush1.bf16.msra.mxu1 %v7320_v22  ;;  %v922_v21 = vrot.slane %v8504_v14, %v8344_v60 }
 0x1f1   : > { %v4280_v36 = vadd.f32 %v4279_v31, %v898_v17  ;;  %v4323_v37 = vadd.f32 %v4322_v32, %v906_v18  ;;  %v4281_v38 = vpop.f32.mrb[19].mxu0  ;;  %v4324_v39 = vpop.f32.mrb[19].mxu1  ;;  %4855 = vmatprep.subr.bf16.mxu0 %v7325_v23  ;;  %4898 = vmatprep.subr.bf16.mxu1 %v7328_v24  ;;  %v7362_v17 = vld [vmem:[%s7985_s9 + $0x948] ss:$272 sps:$4 sm:$0xff]   ;;  %v7367_v18 = vld [vmem:[%s7985_s9 + $0xb64] ss:$272 sps:$4 sm:$0xff]   ;;  %v918_v22 = vrot.slane %v8504_v14, %v8347_v3 }
 0x1f2   : > { %v6605_v42 = vpack.c.bf16 %v4278_v30, %v4276_v27  ;;  %v6606_v43 = vpack.c.bf16 %v4321_v8, %v4319_v28  ;;  %v4282_v44 = vadd.f32 %v4281_v38, %v902_v19  ;;  %v4325_v45 = vadd.f32 %v4324_v39, %v910_v20  ;;  %v7370_v19 = vld [vmem:[%s7985_s9 + $0xb6c] ss:$272 sps:$4 sm:$0xff]   ;;  %v7365_v24 = vld [vmem:[%s7985_s9 + $0xb60] ss:$272 sps:$4 sm:$0xff]  }
 0x1f3   : > { %v914_v20 = vrot.slane %v8504_v14, %v8341_v59  ;;  %v926_v23 = vrot.slane %v8504_v14, %v8352_v6  ;;  %v7376_v27 = vld [vmem:[%s7985_s9 + $0xd8c] ss:$272 sps:$4 sm:$0xff]  }
 0x1f4   : > { %5775 = vst [vmem:[%s8311_s8 + $0x40] sm:$0xff] %v6605_v42  ;;  %5776 = vst [vmem:[%s8311_s8 + $0x48] sm:$0xff] %v6606_v43  ;;  %v6639_v46 = vpack.c.bf16 %v4282_v44, %v4280_v36  ;;  %v6640_v47 = vpack.c.bf16 %v4325_v45, %v4323_v37  ;;  %4856 = vmatpush1.bf16.msra.mxu0 %v7323_v33  ;;  %4899 = vmatpush1.bf16.msra.mxu1 %v7326_v34  ;;  %v7371_v36 = vld [vmem:[%s7985_s9 + $0xd80] ss:$272 sps:$4 sm:$0xff]   ;;  %v7374_v37 = vld [vmem:[%s7985_s9 + $0xd88] ss:$272 sps:$4 sm:$0xff]  }
 0x1f5   : > { %4857 = vmatprep.subr.bf16.mxu0 %v7331_v40  ;;  %4900 = vmatprep.subr.bf16.mxu1 %v7334_v41  ;;  %v7379_v42 = vld [vmem:[%s7985_s9 + $0xfa4] ss:$272 sps:$4 sm:$0xff]   ;;  %v7382_v43 = vld [vmem:[%s7985_s9 + $0xfac] ss:$272 sps:$4 sm:$0xff]  }
 0x1f6   : > { %5809 = vst [vmem:[%s8311_s8 + $0x150] sm:$0xff] %v6639_v46  ;;  %5810 = vst [vmem:[%s8311_s8 + $0x158] sm:$0xff] %v6640_v47 }
 0x1f8   : > { %4858 = vmatpush1.bf16.msra.mxu0 %v7329_v48  ;;  %4901 = vmatpush1.bf16.msra.mxu1 %v7332_v35 }
 0x1f9   : > { %4929 = vmatprep.subr.bf16.mxu0 %v7337_v49  ;;  %4972 = vmatprep.subr.bf16.mxu1 %v7340_v51  ;;  %v7377_v49 = vld [vmem:[%s7985_s9 + $0xfa0] ss:$272 sps:$4 sm:$0xff]   ;;  %v7380_v51 = vld [vmem:[%s7985_s9 + $0xfa8] ss:$272 sps:$4 sm:$0xff]  }
 0x1fb   : > { %4876 = vmatmul.mubr.bf16.vlgmr.msra.gmra.mrb[44].mxu0 %v8435_v50  ;;  %4919 = vmatmul.mubr.bf16.vlgmr.msra.gmra.mrb[44].mxu1 %v8435_v50 }
 0x1fc   : > { %4930 = vmatpush1.bf16.msra.mxu0 %v7335_v12  ;;  %4973 = vmatpush1.bf16.msra.mxu1 %v7338_v52  ;;  %v7385_v12 = vld [vmem:[%s7985_s9 + $0xd4] ss:$272 sps:$4 sm:$0xff]   ;;  %v7388_v52 = vld [vmem:[%s7985_s9 + $0xdc] ss:$272 sps:$4 sm:$0xff]  }
 0x1fd   : > { %4931 = vmatprep.subr.bf16.mxu0 %v7343_v53  ;;  %4974 = vmatprep.subr.bf16.mxu1 %v7346_v54  ;;  %v7383_v53 = vld [vmem:[%s7985_s9 + $0xd0] ss:$272 sps:$4 sm:$0xff]   ;;  %v7386_v54 = vld [vmem:[%s7985_s9 + $0xd8] ss:$272 sps:$4 sm:$0xff]  }
 0x1fe   : > { %4961 = vmatprep.mubr.bf16.mxu0 %v7762_v0  ;;  %5004 = vmatprep.mubr.bf16.mxu1 %v7762_v0 }
 0x200   : > { %4932 = vmatpush1.bf16.msra.mxu0 %v7341_v56  ;;  %4975 = vmatpush1.bf16.msra.mxu1 %v7344_v57  ;;  %v7391_v56 = vld [vmem:[%s7985_s9 + $0x2f4] ss:$272 sps:$4 sm:$0xff]   ;;  %v7394_v57 = vld [vmem:[%s7985_s9 + $0x2fc] ss:$272 sps:$4 sm:$0xff]  }
 0x201   : > { %4933 = vmatprep.subr.bf16.mxu0 %v7349_v58  ;;  %4976 = vmatprep.subr.bf16.mxu1 %v7352_v4  ;;  %v7389_v58 = vld [vmem:[%s7985_s9 + $0x2f0] ss:$272 sps:$4 sm:$0xff]   ;;  %v7392_v4 = vld [vmem:[%s7985_s9 + $0x2f8] ss:$272 sps:$4 sm:$0xff]  }
 0x204   : > { %4934 = vmatpush1.bf16.msra.mxu0 %v7347_v5  ;;  %4977 = vmatpush1.bf16.msra.mxu1 %v7350_v7  ;;  %v7397_v5 = vld [vmem:[%s7985_s9 + $0x514] ss:$272 sps:$4 sm:$0xff]   ;;  %v7400_v7 = vld [vmem:[%s7985_s9 + $0x51c] ss:$272 sps:$4 sm:$0xff]  }
 0x205   : > { %4935 = vmatprep.subr.bf16.mxu0 %v7355_v9  ;;  %4978 = vmatprep.subr.bf16.mxu1 %v7358_v10  ;;  %v7395_v9 = vld [vmem:[%s7985_s9 + $0x510] ss:$272 sps:$4 sm:$0xff]   ;;  %v7398_v10 = vld [vmem:[%s7985_s9 + $0x518] ss:$272 sps:$4 sm:$0xff]  }
 0x208   : > { %4936 = vmatpush1.bf16.msra.mxu0 %v7353_v11  ;;  %4979 = vmatpush1.bf16.msra.mxu1 %v7356_v13  ;;  %v7403_v11 = vld [vmem:[%s7985_s9 + $0x734] ss:$272 sps:$4 sm:$0xff]   ;;  %v7406_v13 = vld [vmem:[%s7985_s9 + $0x73c] ss:$272 sps:$4 sm:$0xff]  }
 0x209   : > { %4937 = vmatprep.subr.bf16.mxu0 %v7361_v55  ;;  %4980 = vmatprep.subr.bf16.mxu1 %v7364_v15  ;;  %v7401_v55 = vld [vmem:[%s7985_s9 + $0x730] ss:$272 sps:$4 sm:$0xff]   ;;  %v7404_v15 = vld [vmem:[%s7985_s9 + $0x738] ss:$272 sps:$4 sm:$0xff]  }
 0x20c   : > { %4938 = vmatpush1.bf16.msra.mxu0 %v7359_v16  ;;  %4981 = vmatpush1.bf16.msra.mxu1 %v7362_v17  ;;  %v7409_v16 = vld [vmem:[%s7985_s9 + $0x954] ss:$272 sps:$4 sm:$0xff]   ;;  %v7412_v17 = vld [vmem:[%s7985_s9 + $0x95c] ss:$272 sps:$4 sm:$0xff]  }
 0x20d   : > { %4939 = vmatprep.subr.bf16.mxu0 %v7367_v18  ;;  %4982 = vmatprep.subr.bf16.mxu1 %v7370_v19  ;;  %v7407_v18 = vld [vmem:[%s7985_s9 + $0x950] ss:$272 sps:$4 sm:$0xff]   ;;  %v7410_v19 = vld [vmem:[%s7985_s9 + $0x958] ss:$272 sps:$4 sm:$0xff]  }
 0x20e   : > { %v4361_v28 = vpop.f32.mrb[20].mxu0  ;;  %v4404_v63 = vpop.f32.mrb[20].mxu1 }
 0x20f   : > { %v4362_v29 = vadd.f32 %v4361_v28, %v914_v20  ;;  %v4405_v30 = vadd.f32 %v4404_v63, %v922_v21  ;;  %v4363_v8 = vpop.f32.mrb[21].mxu0  ;;  %v4406_v31 = vpop.f32.mrb[21].mxu1  ;;  %v7416_v28 = vld [vmem:[%s7985_s9 + $0xb78] ss:$272 sps:$4 sm:$0xff]   ;;  %v7421_v63 = vld [vmem:[%s7985_s9 + $0xd94] ss:$272 sps:$4 sm:$0xff]  }
 0x210   : > { %v4364_v32 = vadd.f32 %v4363_v8, %v918_v22  ;;  %v4407_v33 = vadd.f32 %v4406_v31, %v926_v23  ;;  %v4365_v34 = vpop.f32.mrb[22].mxu0  ;;  %v4408_v14 = vpop.f32.mrb[22].mxu1  ;;  %4940 = vmatpush1.bf16.msra.mxu0 %v7365_v24  ;;  %4983 = vmatpush1.bf16.msra.mxu1 %v7368_v25 }
 0x211   : > { %v4366_v38 = vadd.f32 %v4365_v34, %v914_v20  ;;  %v4409_v39 = vadd.f32 %v4408_v14, %v922_v21  ;;  %v4367_v40 = vpop.f32.mrb[23].mxu0  ;;  %v4410_v41 = vpop.f32.mrb[23].mxu1  ;;  %4941 = vmatprep.subr.bf16.mxu0 %v7373_v26  ;;  %4984 = vmatprep.subr.bf16.mxu1 %v7376_v27  ;;  %v8603_v20 = vld [vmem:[%s8278_s30 + $0x18] sm:$0xff]  ;;  %v7415_v21 = vld [vmem:[%s7985_s9 + $0xb74] ss:$272 sps:$4 sm:$0xff]  }
 0x212   : > { %v6607_v44 = vpack.c.bf16 %v4364_v32, %v4362_v29  ;;  %v6608_v45 = vpack.c.bf16 %v4407_v33, %v4405_v30  ;;  %v4368_v46 = vadd.f32 %v4367_v40, %v918_v22  ;;  %v4411_v47 = vadd.f32 %v4410_v41, %v926_v23  ;;  %v7418_v22 = vld [vmem:[%s7985_s9 + $0xb7c] ss:$272 sps:$4 sm:$0xff]   ;;  %v7413_v27 = vld [vmem:[%s7985_s9 + $0xb70] ss:$272 sps:$4 sm:$0xff]   ;;  %v7422_v40 = vld [vmem:[%s7985_s9 + $0xd98] ss:$272 sps:$4 sm:$0xff]  }
 0x213   : > { %v930_v23 = vrot.slane %v8603_v20, %v8273_v61  ;;  %v938_v24 = vrot.slane %v8603_v20, %v8276_v62  ;;  %v934_v25 = vrot.slane %v8603_v20, %v8284_v1  ;;  %v942_v26 = vrot.slane %v8603_v20, %v8287_v2  ;;  %v7424_v29 = vld [vmem:[%s7985_s9 + $0xd9c] ss:$272 sps:$4 sm:$0xff]  }
 0x214   : > { %5777 = vst [vmem:[%s8311_s8 + $0x50] sm:$0xff] %v6607_v44  ;;  %5778 = vst [vmem:[%s8311_s8 + $0x58] sm:$0xff] %v6608_v45  ;;  %v6641_v48 = vpack.c.bf16 %v4368_v46, %v4366_v38  ;;  %v6642_v35 = vpack.c.bf16 %v4411_v47, %v4409_v39  ;;  %4942 = vmatpush1.bf16.msra.mxu0 %v7371_v36  ;;  %4985 = vmatpush1.bf16.msra.mxu1 %v7374_v37  ;;  %v7419_v39 = vld [vmem:[%s7985_s9 + $0xd90] ss:$272 sps:$4 sm:$0xff]   ;;  %v7427_v45 = vld [vmem:[%s7985_s9 + $0xfb4] ss:$272 sps:$4 sm:$0xff]  }
 0x215   : > { %4943 = vmatprep.subr.bf16.mxu0 %v7379_v42  ;;  %4986 = vmatprep.subr.bf16.mxu1 %v7382_v43  ;;  %v7430_v46 = vld [vmem:[%s7985_s9 + $0xfbc] ss:$272 sps:$4 sm:$0xff]  }
 0x216   : > { %5811 = vst [vmem:[%s8311_s8 + $0x160] sm:$0xff] %v6641_v48  ;;  %5812 = vst [vmem:[%s8311_s8 + $0x168] sm:$0xff] %v6642_v35 }
 0x218   : > { %4944 = vmatpush1.bf16.msra.mxu0 %v7377_v49  ;;  %4987 = vmatpush1.bf16.msra.mxu1 %v7380_v51 }
 0x219   : > { %5015 = vmatprep.subr.bf16.mxu0 %v7385_v12  ;;  %5058 = vmatprep.subr.bf16.mxu1 %v7388_v52  ;;  %v7425_v52 = vld [vmem:[%s7985_s9 + $0xfb0] ss:$272 sps:$4 sm:$0xff]  }
 0x21b   : > { %4962 = vmatmul.mubr.bf16.vlgmr.msra.gmra.mrb[48].mxu0 %v8435_v50  ;;  %5005 = vmatmul.mubr.bf16.vlgmr.msra.gmra.mrb[48].mxu1 %v8435_v50 }
 0x21c   : > { %5016 = vmatpush1.bf16.msra.mxu0 %v7383_v53  ;;  %5059 = vmatpush1.bf16.msra.mxu1 %v7386_v54  ;;  %v7428_v53 = vld [vmem:[%s7985_s9 + $0xfb8] ss:$272 sps:$4 sm:$0xff]   ;;  %v7433_v54 = vld [vmem:[%s7985_s9 + $0xe4] ss:$272 sps:$4 sm:$0xff]  }
 0x21d   : > { %5017 = vmatprep.subr.bf16.mxu0 %v7391_v56  ;;  %5060 = vmatprep.subr.bf16.mxu1 %v7394_v57  ;;  %v7436_v56 = vld [vmem:[%s7985_s9 + $0xec] ss:$272 sps:$4 sm:$0xff]   ;;  %v7431_v57 = vld [vmem:[%s7985_s9 + $0xe0] ss:$272 sps:$4 sm:$0xff]  }
 0x21e   : > { %5047 = vmatprep.mubr.bf16.mxu0 %v7762_v0  ;;  %5090 = vmatprep.mubr.bf16.mxu1 %v7762_v0 }
 0x220   : > { %5018 = vmatpush1.bf16.msra.mxu0 %v7389_v58  ;;  %5061 = vmatpush1.bf16.msra.mxu1 %v7392_v4  ;;  %v7434_v58 = vld [vmem:[%s7985_s9 + $0xe8] ss:$272 sps:$4 sm:$0xff]   ;;  %v7439_v4 = vld [vmem:[%s7985_s9 + $0x304] ss:$272 sps:$4 sm:$0xff]  }
 0x221   : > { %5019 = vmatprep.subr.bf16.mxu0 %v7397_v5  ;;  %5062 = vmatprep.subr.bf16.mxu1 %v7400_v7  ;;  %v7442_v5 = vld [vmem:[%s7985_s9 + $0x30c] ss:$272 sps:$4 sm:$0xff]   ;;  %v7437_v7 = vld [vmem:[%s7985_s9 + $0x300] ss:$272 sps:$4 sm:$0xff]  }
 0x224   : > { %5020 = vmatpush1.bf16.msra.mxu0 %v7395_v9  ;;  %5063 = vmatpush1.bf16.msra.mxu1 %v7398_v10  ;;  %v7440_v9 = vld [vmem:[%s7985_s9 + $0x308] ss:$272 sps:$4 sm:$0xff]   ;;  %v7445_v10 = vld [vmem:[%s7985_s9 + $0x524] ss:$272 sps:$4 sm:$0xff]  }
 0x225   : > { %5021 = vmatprep.subr.bf16.mxu0 %v7403_v11  ;;  %5064 = vmatprep.subr.bf16.mxu1 %v7406_v13  ;;  %v7448_v11 = vld [vmem:[%s7985_s9 + $0x52c] ss:$272 sps:$4 sm:$0xff]   ;;  %v7446_v13 = vld [vmem:[%s7985_s9 + $0x528] ss:$272 sps:$4 sm:$0xff]  }
 0x228   : > { %5022 = vmatpush1.bf16.msra.mxu0 %v7401_v55  ;;  %5065 = vmatpush1.bf16.msra.mxu1 %v7404_v15  ;;  %v7451_v55 = vld [vmem:[%s7985_s9 + $0x744] ss:$272 sps:$4 sm:$0xff]   ;;  %v7454_v15 = vld [vmem:[%s7985_s9 + $0x74c] ss:$272 sps:$4 sm:$0xff]  }
 0x229   : > { %5023 = vmatprep.subr.bf16.mxu0 %v7409_v16  ;;  %5066 = vmatprep.subr.bf16.mxu1 %v7412_v17  ;;  %v7449_v16 = vld [vmem:[%s7985_s9 + $0x740] ss:$272 sps:$4 sm:$0xff]   ;;  %v7452_v17 = vld [vmem:[%s7985_s9 + $0x748] ss:$272 sps:$4 sm:$0xff]  }
 0x22c   : > { %5024 = vmatpush1.bf16.msra.mxu0 %v7407_v18  ;;  %5067 = vmatpush1.bf16.msra.mxu1 %v7410_v19  ;;  %v7457_v18 = vld [vmem:[%s7985_s9 + $0x964] ss:$272 sps:$4 sm:$0xff]   ;;  %v7460_v19 = vld [vmem:[%s7985_s9 + $0x96c] ss:$272 sps:$4 sm:$0xff]  }
 0x22d   : > { %5025 = vmatprep.subr.bf16.mxu0 %v7415_v21  ;;  %5068 = vmatprep.subr.bf16.mxu1 %v7418_v22  ;;  %v7455_v21 = vld [vmem:[%s7985_s9 + $0x960] ss:$272 sps:$4 sm:$0xff]   ;;  %v7458_v22 = vld [vmem:[%s7985_s9 + $0x968] ss:$272 sps:$4 sm:$0xff]  }
 0x22e   : > { %v4447_v30 = vpop.f32.mrb[24].mxu0  ;;  %v4490_v8 = vpop.f32.mrb[24].mxu1 }
 0x22f   : > { %v4448_v31 = vadd.f32 %v4447_v30, %v930_v23  ;;  %v4491_v32 = vadd.f32 %v4490_v8, %v938_v24  ;;  %v4449_v33 = vpop.f32.mrb[25].mxu0  ;;  %v4492_v34 = vpop.f32.mrb[25].mxu1  ;;  %v7469_v30 = vld [vmem:[%s7985_s9 + $0xda4] ss:$272 sps:$4 sm:$0xff]   ;;  %v7472_v8 = vld [vmem:[%s7985_s9 + $0xdac] ss:$272 sps:$4 sm:$0xff]  }
 0x230   : > { %v4450_v14 = vadd.f32 %v4449_v33, %v934_v25  ;;  %v4493_v36 = vadd.f32 %v4492_v34, %v942_v26  ;;  %v4451_v37 = vpop.f32.mrb[26].mxu0  ;;  %v4494_v38 = vpop.f32.mrb[26].mxu1  ;;  %5026 = vmatpush1.bf16.msra.mxu0 %v7413_v27  ;;  %5069 = vmatpush1.bf16.msra.mxu1 %v7416_v28  ;;  %v950_v27 = vrot.slane %v8603_v20, %v8347_v3 }
 0x231   : > { %v4452_v41 = vadd.f32 %v4451_v37, %v930_v23  ;;  %v4495_v42 = vadd.f32 %v4494_v38, %v938_v24  ;;  %v4453_v43 = vpop.f32.mrb[27].mxu0  ;;  %v4496_v44 = vpop.f32.mrb[27].mxu1  ;;  %5027 = vmatprep.subr.bf16.mxu0 %v7421_v63  ;;  %5070 = vmatprep.subr.bf16.mxu1 %v7424_v29  ;;  %v7463_v23 = vld [vmem:[%s7985_s9 + $0xb84] ss:$272 sps:$4 sm:$0xff]   ;;  %v7466_v24 = vld [vmem:[%s7985_s9 + $0xb8c] ss:$272 sps:$4 sm:$0xff]   ;;  %v958_v28 = vrot.slane %v8603_v20, %v8352_v6 }
 0x232   : > { %v6609_v47 = vpack.c.bf16 %v4450_v14, %v4448_v31  ;;  %v6610_v48 = vpack.c.bf16 %v4493_v36, %v4491_v32  ;;  %v4454_v35 = vadd.f32 %v4453_v43, %v934_v25  ;;  %v4497_v49 = vadd.f32 %v4496_v44, %v942_v26  ;;  %v7461_v63 = vld [vmem:[%s7985_s9 + $0xb80] ss:$272 sps:$4 sm:$0xff]   ;;  %v7464_v29 = vld [vmem:[%s7985_s9 + $0xb88] ss:$272 sps:$4 sm:$0xff]  }
 0x233   : > { %v946_v25 = vrot.slane %v8603_v20, %v8341_v59  ;;  %v954_v26 = vrot.slane %v8603_v20, %v8344_v60 }
 0x234   : > { %5779 = vst [vmem:[%s8311_s8 + $0x60] sm:$0xff] %v6609_v47  ;;  %5780 = vst [vmem:[%s8311_s8 + $0x68] sm:$0xff] %v6610_v48  ;;  %v6643_v51 = vpack.c.bf16 %v4454_v35, %v4452_v41  ;;  %v6644_v12 = vpack.c.bf16 %v4497_v49, %v4495_v42  ;;  %5028 = vmatpush1.bf16.msra.mxu0 %v7419_v39  ;;  %5071 = vmatpush1.bf16.msra.mxu1 %v7422_v40  ;;  %v7467_v40 = vld [vmem:[%s7985_s9 + $0xda0] ss:$272 sps:$4 sm:$0xff]   ;;  %v7470_v41 = vld [vmem:[%s7985_s9 + $0xda8] ss:$272 sps:$4 sm:$0xff]  }
 0x235   : > { %5029 = vmatprep.subr.bf16.mxu0 %v7427_v45  ;;  %5072 = vmatprep.subr.bf16.mxu1 %v7430_v46  ;;  %v7475_v46 = vld [vmem:[%s7985_s9 + $0xfc4] ss:$272 sps:$4 sm:$0xff]   ;;  %v7478_v47 = vld [vmem:[%s7985_s9 + $0xfcc] ss:$272 sps:$4 sm:$0xff]  }
 0x236   : > { %5813 = vst [vmem:[%s8311_s8 + $0x170] sm:$0xff] %v6643_v51  ;;  %5814 = vst [vmem:[%s8311_s8 + $0x178] sm:$0xff] %v6644_v12 }
 0x238   : > { %5030 = vmatpush1.bf16.msra.mxu0 %v7425_v52  ;;  %5073 = vmatpush1.bf16.msra.mxu1 %v7428_v53  ;;  %v7473_v53 = vld [vmem:[%s7985_s9 + $0xfc0] ss:$272 sps:$4 sm:$0xff]  }
 0x239   : > { %5101 = vmatprep.subr.bf16.mxu0 %v7433_v54  ;;  %5144 = vmatprep.subr.bf16.mxu1 %v7436_v56  ;;  %v7476_v54 = vld [vmem:[%s7985_s9 + $0xfc8] ss:$272 sps:$4 sm:$0xff]   ;;  %v7481_v56 = vld [vmem:[%s7985_s9 + $0xf4] ss:$272 sps:$4 sm:$0xff]  }
 0x23b   : > { %5048 = vmatmul.mubr.bf16.vlgmr.msra.gmra.mrb[52].mxu0 %v8435_v50  ;;  %5091 = vmatmul.mubr.bf16.vlgmr.msra.gmra.mrb[52].mxu1 %v8435_v50  ;;  %v7443_v50 = vld [vmem:[%s7985_s9 + $0x520] ss:$272 sps:$4 sm:$0xff]  }
 0x23c   : > { %5102 = vmatpush1.bf16.msra.mxu0 %v7431_v57  ;;  %5145 = vmatpush1.bf16.msra.mxu1 %v7434_v58  ;;  %v7484_v57 = vld [vmem:[%s7985_s9 + $0xfc] ss:$272 sps:$4 sm:$0xff]   ;;  %v7479_v58 = vld [vmem:[%s7985_s9 + $0xf0] ss:$272 sps:$4 sm:$0xff]  }
 0x23d   : > { %5103 = vmatprep.subr.bf16.mxu0 %v7439_v4  ;;  %5146 = vmatprep.subr.bf16.mxu1 %v7442_v5  ;;  %v7482_v4 = vld [vmem:[%s7985_s9 + $0xf8] ss:$272 sps:$4 sm:$0xff]   ;;  %v7487_v5 = vld [vmem:[%s7985_s9 + $0x314] ss:$272 sps:$4 sm:$0xff]  }
 0x23e   : > { %5133 = vmatprep.mubr.bf16.mxu0 %v7762_v0  ;;  %5176 = vmatprep.mubr.bf16.mxu1 %v7762_v0 }
 0x240   : > { %5104 = vmatpush1.bf16.msra.mxu0 %v7437_v7  ;;  %5147 = vmatpush1.bf16.msra.mxu1 %v7440_v9  ;;  %v7490_v7 = vld [vmem:[%s7985_s9 + $0x31c] ss:$272 sps:$4 sm:$0xff]  }
 0x241   : > { %5105 = vmatprep.subr.bf16.mxu0 %v7445_v10  ;;  %5148 = vmatprep.subr.bf16.mxu1 %v7448_v11  ;;  %v8683_v9 = vld [vmem:[#allocation2] sm:$0xff]   ;;  %v7485_v10 = vld [vmem:[%s7985_s9 + $0x310] ss:$272 sps:$4 sm:$0xff]  }
 0x242   : > { %v7488_v11 = vld [vmem:[%s7985_s9 + $0x318] ss:$272 sps:$4 sm:$0xff]  }
 0x244   : > { %5106 = vmatpush1.bf16.msra.mxu0 %v7443_v50  ;;  %5149 = vmatpush1.bf16.msra.mxu1 %v7446_v13  ;;  %v7493_v50 = vld [vmem:[%s7985_s9 + $0x534] ss:$272 sps:$4 sm:$0xff]   ;;  %v7496_v13 = vld [vmem:[%s7985_s9 + $0x53c] ss:$272 sps:$4 sm:$0xff]  }
 0x245   : > { %5107 = vmatprep.subr.bf16.mxu0 %v7451_v55  ;;  %5150 = vmatprep.subr.bf16.mxu1 %v7454_v15  ;;  %v7491_v55 = vld [vmem:[%s7985_s9 + $0x530] ss:$272 sps:$4 sm:$0xff]   ;;  %v7494_v15 = vld [vmem:[%s7985_s9 + $0x538] ss:$272 sps:$4 sm:$0xff]  }
 0x248   : > { %5108 = vmatpush1.bf16.msra.mxu0 %v7449_v16  ;;  %5151 = vmatpush1.bf16.msra.mxu1 %v7452_v17  ;;  %v7499_v16 = vld [vmem:[%s7985_s9 + $0x754] ss:$272 sps:$4 sm:$0xff]   ;;  %v7502_v17 = vld [vmem:[%s7985_s9 + $0x75c] ss:$272 sps:$4 sm:$0xff]  }
 0x249   : > { %5109 = vmatprep.subr.bf16.mxu0 %v7457_v18  ;;  %5152 = vmatprep.subr.bf16.mxu1 %v7460_v19  ;;  %v7497_v18 = vld [vmem:[%s7985_s9 + $0x750] ss:$272 sps:$4 sm:$0xff]   ;;  %v7500_v19 = vld [vmem:[%s7985_s9 + $0x758] ss:$272 sps:$4 sm:$0xff]  }
 0x24c   : > { %5110 = vmatpush1.bf16.msra.mxu0 %v7455_v21  ;;  %5153 = vmatpush1.bf16.msra.mxu1 %v7458_v22  ;;  %v7505_v21 = vld [vmem:[%s7985_s9 + $0x974] ss:$272 sps:$4 sm:$0xff]   ;;  %v7508_v22 = vld [vmem:[%s7985_s9 + $0x97c] ss:$272 sps:$4 sm:$0xff]  }
 0x24d   : > { %5111 = vmatprep.subr.bf16.mxu0 %v7463_v23  ;;  %5154 = vmatprep.subr.bf16.mxu1 %v7466_v24  ;;  %v7503_v23 = vld [vmem:[%s7985_s9 + $0x970] ss:$272 sps:$4 sm:$0xff]   ;;  %v7506_v24 = vld [vmem:[%s7985_s9 + $0x978] ss:$272 sps:$4 sm:$0xff]  }
 0x24e   : > { %v4533_v31 = vpop.f32.mrb[28].mxu0  ;;  %v4576_v32 = vpop.f32.mrb[28].mxu1 }
 0x24f   : > { %v4534_v33 = vadd.f32 %v4533_v31, %v946_v25  ;;  %v4577_v34 = vadd.f32 %v4576_v32, %v954_v26  ;;  %v4535_v14 = vpop.f32.mrb[29].mxu0  ;;  %v4578_v36 = vpop.f32.mrb[29].mxu1  ;;  %v7512_v31 = vld [vmem:[%s7985_s9 + $0xb98] ss:$272 sps:$4 sm:$0xff]   ;;  %v7517_v32 = vld [vmem:[%s7985_s9 + $0xdb4] ss:$272 sps:$4 sm:$0xff]  }
 0x250   : > { %v4536_v37 = vadd.f32 %v4535_v14, %v950_v27  ;;  %v4579_v38 = vadd.f32 %v4578_v36, %v958_v28  ;;  %v4537_v39 = vpop.f32.mrb[30].mxu0  ;;  %v4580_v20 = vpop.f32.mrb[30].mxu1  ;;  %5112 = vmatpush1.bf16.msra.mxu0 %v7461_v63  ;;  %5155 = vmatpush1.bf16.msra.mxu1 %v7464_v29 }
 0x251   : > { %v4538_v42 = vadd.f32 %v4537_v39, %v946_v25  ;;  %v4581_v43 = vadd.f32 %v4580_v20, %v954_v26  ;;  %v4539_v44 = vpop.f32.mrb[31].mxu0  ;;  %v4582_v45 = vpop.f32.mrb[31].mxu1  ;;  %5113 = vmatprep.subr.bf16.mxu0 %v7469_v30  ;;  %5156 = vmatprep.subr.bf16.mxu1 %v7472_v8  ;;  %v8704_v25 = vld [vmem:[%s8278_s30 + $0x20] sm:$0xff] }
 0x252   : > { %v6611_v48 = vpack.c.bf16 %v4536_v37, %v4534_v33  ;;  %v6612_v35 = vpack.c.bf16 %v4579_v38, %v4577_v34  ;;  %v4540_v49 = vadd.f32 %v4539_v44, %v950_v27  ;;  %v4583_v51 = vadd.f32 %v4582_v45, %v958_v28  ;;  %v7511_v26 = vld [vmem:[%s7985_s9 + $0xb94] ss:$272 sps:$4 sm:$0xff]   ;;  %v7514_v27 = vld [vmem:[%s7985_s9 + $0xb9c] ss:$272 sps:$4 sm:$0xff]   ;;  %v7509_v8 = vld [vmem:[%s7985_s9 + $0xb90] ss:$272 sps:$4 sm:$0xff]  }
 0x253   : > { %v962_v28 = vrot.slane %v8704_v25, %v8273_v61  ;;  %v970_v63 = vrot.slane %v8704_v25, %v8276_v62  ;;  %v966_v29 = vrot.slane %v8704_v25, %v8284_v1  ;;  %v974_v30 = vrot.slane %v8704_v25, %v8287_v2  ;;  %v7520_v33 = vld [vmem:[%s7985_s9 + $0xdbc] ss:$272 sps:$4 sm:$0xff]   ;;  %v7518_v44 = vld [vmem:[%s7985_s9 + $0xdb8] ss:$272 sps:$4 sm:$0xff]  }
 0x254   : > { %5781 = vst [vmem:[%s8311_s8 + $0x70] sm:$0xff] %v6611_v48  ;;  %5782 = vst [vmem:[%s8311_s8 + $0x78] sm:$0xff] %v6612_v35  ;;  %v6645_v12 = vpack.c.bf16 %v4540_v49, %v4538_v42  ;;  %v6646_v52 = vpack.c.bf16 %v4583_v51, %v4581_v43  ;;  %5114 = vmatpush1.bf16.msra.mxu0 %v7467_v40  ;;  %5157 = vmatpush1.bf16.msra.mxu1 %v7470_v41  ;;  %v7515_v43 = vld [vmem:[%s7985_s9 + $0xdb0] ss:$272 sps:$4 sm:$0xff]   ;;  %v7523_v35 = vld [vmem:[%s7985_s9 + $0xfd4] ss:$272 sps:$4 sm:$0xff]  }
 0x255   : > { %5115 = vmatprep.subr.bf16.mxu0 %v7475_v46  ;;  %5158 = vmatprep.subr.bf16.mxu1 %v7478_v47  ;;  %v7526_v49 = vld [vmem:[%s7985_s9 + $0xfdc] ss:$272 sps:$4 sm:$0xff]  }
 0x256   : > { %5815 = vst [vmem:[%s8311_s8 + $0x180] sm:$0xff] %v6645_v12  ;;  %5816 = vst [vmem:[%s8311_s8 + $0x188] sm:$0xff] %v6646_v52 }
 0x258   : > { %5116 = vmatpush1.bf16.msra.mxu0 %v7473_v53  ;;  %5159 = vmatpush1.bf16.msra.mxu1 %v7476_v54 }
 0x259   : > { %5187 = vmatprep.subr.bf16.mxu0 %v7481_v56  ;;  %5230 = vmatprep.subr.bf16.mxu1 %v7484_v57  ;;  %v7521_v57 = vld [vmem:[%s7985_s9 + $0xfd0] ss:$272 sps:$4 sm:$0xff]  }
 0x25b   : > { %5134 = vmatmul.mubr.bf16.vlgmr.msra.gmra.mrb[56].mxu0 %v8683_v9  ;;  %5177 = vmatmul.mubr.bf16.vlgmr.msra.gmra.mrb[56].mxu1 %v8683_v9 }
 0x25c   : > { %5188 = vmatpush1.bf16.msra.mxu0 %v7479_v58  ;;  %5231 = vmatpush1.bf16.msra.mxu1 %v7482_v4  ;;  %v7524_v58 = vld [vmem:[%s7985_s9 + $0xfd8] ss:$272 sps:$4 sm:$0xff]   ;;  %v7529_v4 = vld [vmem:[%s7985_s9 + $0x104] ss:$272 sps:$4 sm:$0xff]  }
 0x25d   : > { %5189 = vmatprep.subr.bf16.mxu0 %v7487_v5  ;;  %5232 = vmatprep.subr.bf16.mxu1 %v7490_v7  ;;  %v7532_v5 = vld [vmem:[%s7985_s9 + $0x10c] ss:$272 sps:$4 sm:$0xff]   ;;  %v7527_v7 = vld [vmem:[%s7985_s9 + $0x100] ss:$272 sps:$4 sm:$0xff]  }
 0x25e   : > { %5219 = vmatprep.mubr.bf16.mxu0 %v7762_v0  ;;  %5262 = vmatprep.mubr.bf16.mxu1 %v7762_v0 }
 0x260   : > { %5190 = vmatpush1.bf16.msra.mxu0 %v7485_v10  ;;  %5233 = vmatpush1.bf16.msra.mxu1 %v7488_v11  ;;  %v7530_v10 = vld [vmem:[%s7985_s9 + $0x108] ss:$272 sps:$4 sm:$0xff]   ;;  %v7535_v11 = vld [vmem:[%s7985_s9 + $0x324] ss:$272 sps:$4 sm:$0xff]  }
 0x261   : > { %5191 = vmatprep.subr.bf16.mxu0 %v7493_v50  ;;  %5234 = vmatprep.subr.bf16.mxu1 %v7496_v13  ;;  %v7538_v50 = vld [vmem:[%s7985_s9 + $0x32c] ss:$272 sps:$4 sm:$0xff]   ;;  %v7533_v13 = vld [vmem:[%s7985_s9 + $0x320] ss:$272 sps:$4 sm:$0xff]  }
 0x264   : > { %5192 = vmatpush1.bf16.msra.mxu0 %v7491_v55  ;;  %5235 = vmatpush1.bf16.msra.mxu1 %v7494_v15  ;;  %v7536_v55 = vld [vmem:[%s7985_s9 + $0x328] ss:$272 sps:$4 sm:$0xff]   ;;  %v7541_v15 = vld [vmem:[%s7985_s9 + $0x544] ss:$272 sps:$4 sm:$0xff]  }
 0x265   : > { %5193 = vmatprep.subr.bf16.mxu0 %v7499_v16  ;;  %5236 = vmatprep.subr.bf16.mxu1 %v7502_v17  ;;  %v7544_v16 = vld [vmem:[%s7985_s9 + $0x54c] ss:$272 sps:$4 sm:$0xff]   ;;  %v7539_v17 = vld [vmem:[%s7985_s9 + $0x540] ss:$272 sps:$4 sm:$0xff]  }
 0x268   : > { %5194 = vmatpush1.bf16.msra.mxu0 %v7497_v18  ;;  %5237 = vmatpush1.bf16.msra.mxu1 %v7500_v19  ;;  %v7542_v18 = vld [vmem:[%s7985_s9 + $0x548] ss:$272 sps:$4 sm:$0xff]   ;;  %v7547_v19 = vld [vmem:[%s7985_s9 + $0x764] ss:$272 sps:$4 sm:$0xff]  }
 0x269   : > { %5195 = vmatprep.subr.bf16.mxu0 %v7505_v21  ;;  %5238 = vmatprep.subr.bf16.mxu1 %v7508_v22  ;;  %v7550_v21 = vld [vmem:[%s7985_s9 + $0x76c] ss:$272 sps:$4 sm:$0xff]   ;;  %v7545_v22 = vld [vmem:[%s7985_s9 + $0x760] ss:$272 sps:$4 sm:$0xff]  }
 0x26c   : > { %5196 = vmatpush1.bf16.msra.mxu0 %v7503_v23  ;;  %5239 = vmatpush1.bf16.msra.mxu1 %v7506_v24  ;;  %v7548_v23 = vld [vmem:[%s7985_s9 + $0x768] ss:$272 sps:$4 sm:$0xff]   ;;  %v7556_v24 = vld [vmem:[%s7985_s9 + $0x98c] ss:$272 sps:$4 sm:$0xff]  }
 0x26d   : > { %5197 = vmatprep.subr.bf16.mxu0 %v7511_v26  ;;  %5240 = vmatprep.subr.bf16.mxu1 %v7514_v27  ;;  %v7551_v26 = vld [vmem:[%s7985_s9 + $0x980] ss:$272 sps:$4 sm:$0xff]   ;;  %v7554_v27 = vld [vmem:[%s7985_s9 + $0x988] ss:$272 sps:$4 sm:$0xff]  }
 0x26e   : > { %v4619_v34 = vpop.f32.mrb[32].mxu0  ;;  %v4662_v14 = vpop.f32.mrb[32].mxu1 }
 0x26f   : > { %v4620_v36 = vadd.f32 %v4619_v34, %v962_v28  ;;  %v4663_v37 = vadd.f32 %v4662_v14, %v970_v63  ;;  %v4621_v38 = vpop.f32.mrb[33].mxu0  ;;  %v4664_v39 = vpop.f32.mrb[33].mxu1  ;;  %v7565_v34 = vld [vmem:[%s7985_s9 + $0xdc4] ss:$272 sps:$4 sm:$0xff]   ;;  %v7568_v14 = vld [vmem:[%s7985_s9 + $0xdcc] ss:$272 sps:$4 sm:$0xff]  }
 0x270   : > { %v4622_v20 = vadd.f32 %v4621_v38, %v966_v29  ;;  %v4665_v40 = vadd.f32 %v4664_v39, %v974_v30  ;;  %v4623_v41 = vpop.f32.mrb[34].mxu0  ;;  %v4666_v42 = vpop.f32.mrb[34].mxu1  ;;  %5198 = vmatpush1.bf16.msra.mxu0 %v7509_v8  ;;  %5241 = vmatpush1.bf16.msra.mxu1 %v7512_v31  ;;  %v982_v8 = vrot.slane %v8704_v25, %v8347_v3 }
 0x271   : > { %v4624_v45 = vadd.f32 %v4623_v41, %v962_v28  ;;  %v4667_v46 = vadd.f32 %v4666_v42, %v970_v63  ;;  %v4625_v47 = vpop.f32.mrb[35].mxu0  ;;  %v4668_v48 = vpop.f32.mrb[35].mxu1  ;;  %5199 = vmatprep.subr.bf16.mxu0 %v7517_v32  ;;  %5242 = vmatprep.subr.bf16.mxu1 %v7520_v33  ;;  %v7559_v28 = vld [vmem:[%s7985_s9 + $0xba4] ss:$272 sps:$4 sm:$0xff]   ;;  %v7562_v63 = vld [vmem:[%s7985_s9 + $0xbac] ss:$272 sps:$4 sm:$0xff]   ;;  %v990_v31 = vrot.slane %v8704_v25, %v8352_v6 }
 0x272   : > { %v6613_v51 = vpack.c.bf16 %v4622_v20, %v4620_v36  ;;  %v6614_v12 = vpack.c.bf16 %v4665_v40, %v4663_v37  ;;  %v4626_v52 = vadd.f32 %v4625_v47, %v966_v29  ;;  %v4669_v53 = vadd.f32 %v4668_v48, %v974_v30  ;;  %v7557_v32 = vld [vmem:[%s7985_s9 + $0xba0] ss:$272 sps:$4 sm:$0xff]   ;;  %v7560_v33 = vld [vmem:[%s7985_s9 + $0xba8] ss:$272 sps:$4 sm:$0xff]  }
 0x273   : > { %v978_v29 = vrot.slane %v8704_v25, %v8341_v59  ;;  %v986_v30 = vrot.slane %v8704_v25, %v8344_v60 }
 0x274   : > { %5783 = vst [vmem:[%s8311_s8 + $0x80] sm:$0xff] %v6613_v51  ;;  %5784 = vst [vmem:[%s8311_s8 + $0x88] sm:$0xff] %v6614_v12  ;;  %v6647_v54 = vpack.c.bf16 %v4626_v52, %v4624_v45  ;;  %v6648_v56 = vpack.c.bf16 %v4669_v53, %v4667_v46  ;;  %5200 = vmatpush1.bf16.msra.mxu0 %v7515_v43  ;;  %5243 = vmatpush1.bf16.msra.mxu1 %v7518_v44  ;;  %v7563_v44 = vld [vmem:[%s7985_s9 + $0xdc0] ss:$272 sps:$4 sm:$0xff]   ;;  %v7566_v45 = vld [vmem:[%s7985_s9 + $0xdc8] ss:$272 sps:$4 sm:$0xff]  }
 0x275   : > { %5201 = vmatprep.subr.bf16.mxu0 %v7523_v35  ;;  %5244 = vmatprep.subr.bf16.mxu1 %v7526_v49  ;;  %v7571_v49 = vld [vmem:[%s7985_s9 + $0xfe4] ss:$272 sps:$4 sm:$0xff]   ;;  %v7574_v51 = vld [vmem:[%s7985_s9 + $0xfec] ss:$272 sps:$4 sm:$0xff]  }
 0x276   : > { %5817 = vst [vmem:[%s8311_s8 + $0x190] sm:$0xff] %v6647_v54  ;;  %5818 = vst [vmem:[%s8311_s8 + $0x198] sm:$0xff] %v6648_v56 }
 0x278   : > { %5202 = vmatpush1.bf16.msra.mxu0 %v7521_v57  ;;  %5245 = vmatpush1.bf16.msra.mxu1 %v7524_v58  ;;  %v7569_v58 = vld [vmem:[%s7985_s9 + $0xfe0] ss:$272 sps:$4 sm:$0xff]  }
 0x279   : > { %5273 = vmatprep.subr.bf16.mxu0 %v7529_v4  ;;  %5316 = vmatprep.subr.bf16.mxu1 %v7532_v5  ;;  %v7572_v4 = vld [vmem:[%s7985_s9 + $0xfe8] ss:$272 sps:$4 sm:$0xff]  }
 0x27a   : > { %v818_v5 = vld [vmem:[%s8278_s30 + $0x28] sm:$0xff] }
 0x27b   : > { %5220 = vmatmul.mubr.bf16.vlgmr.msra.gmra.mrb[60].mxu0 %v8683_v9  ;;  %5263 = vmatmul.mubr.bf16.vlgmr.msra.gmra.mrb[60].mxu1 %v8683_v9 }
 0x27c   : > { %5274 = vmatpush1.bf16.msra.mxu0 %v7527_v7  ;;  %5317 = vmatpush1.bf16.msra.mxu1 %v7530_v10  ;;  %v994_v7 = vrot.slane %v818_v5, %v8273_v61  ;;  %v1002_v10 = vrot.slane %v818_v5, %v8276_v62 }
 0x27d   : > { %5275 = vmatprep.subr.bf16.mxu0 %v7535_v11  ;;  %5318 = vmatprep.subr.bf16.mxu1 %v7538_v50  ;;  %v998_v11 = vrot.slane %v818_v5, %v8284_v1  ;;  %v1006_v50 = vrot.slane %v818_v5, %v8287_v2 }
 0x27e   : > { %5305 = vmatprep.mubr.bf16.mxu0 %v7762_v0  ;;  %5348 = vmatprep.mubr.bf16.mxu1 %v7762_v0  ;;  %v7553_v0 = vld [vmem:[%s7985_s9 + $0x984] ss:$272 sps:$4 sm:$0xff]  }
 0x280   : > { %5276 = vmatpush1.bf16.msra.mxu0 %v7533_v13  ;;  %5319 = vmatpush1.bf16.msra.mxu1 %v7536_v55 }
 0x281   : > { %5277 = vmatprep.subr.bf16.mxu0 %v7541_v15  ;;  %5320 = vmatprep.subr.bf16.mxu1 %v7544_v16 }
 0x284   : > { %5278 = vmatpush1.bf16.msra.mxu0 %v7539_v17  ;;  %5321 = vmatpush1.bf16.msra.mxu1 %v7542_v18 }
 0x285   : > { %5279 = vmatprep.subr.bf16.mxu0 %v7547_v19  ;;  %5322 = vmatprep.subr.bf16.mxu1 %v7550_v21 }
 0x288   : > { %5280 = vmatpush1.bf16.msra.mxu0 %v7545_v22  ;;  %5323 = vmatpush1.bf16.msra.mxu1 %v7548_v23 }
 0x289   : > { %5281 = vmatprep.subr.bf16.mxu0 %v7553_v0  ;;  %5324 = vmatprep.subr.bf16.mxu1 %v7556_v24 }
 0x28c   : > { %5282 = vmatpush1.bf16.msra.mxu0 %v7551_v26  ;;  %5325 = vmatpush1.bf16.msra.mxu1 %v7554_v27 }
 0x28d   : > { %5283 = vmatprep.subr.bf16.mxu0 %v7559_v28  ;;  %5326 = vmatprep.subr.bf16.mxu1 %v7562_v63 }
 0x28e   : > { %v4705_v36 = vpop.f32.mrb[36].mxu0  ;;  %v4748_v37 = vpop.f32.mrb[36].mxu1 }
 0x28f   : > { %v4706_v38 = vadd.f32 %v4705_v36, %v978_v29  ;;  %v4749_v39 = vadd.f32 %v4748_v37, %v986_v30  ;;  %v4707_v20 = vpop.f32.mrb[37].mxu0  ;;  %v4750_v40 = vpop.f32.mrb[37].mxu1 }
 0x290   : > { %v4708_v41 = vadd.f32 %v4707_v20, %v982_v8  ;;  %v4751_v42 = vadd.f32 %v4750_v40, %v990_v31  ;;  %v4709_v43 = vpop.f32.mrb[38].mxu0  ;;  %v4752_v25 = vpop.f32.mrb[38].mxu1  ;;  %5284 = vmatpush1.bf16.msra.mxu0 %v7557_v32  ;;  %5327 = vmatpush1.bf16.msra.mxu1 %v7560_v33  ;;  %v1018_v32 = vrot.slane %v818_v5, %v8344_v60 }
 0x291   : > { %v4710_v46 = vadd.f32 %v4709_v43, %v978_v29  ;;  %v4753_v47 = vadd.f32 %v4752_v25, %v986_v30  ;;  %v4711_v48 = vpop.f32.mrb[39].mxu0  ;;  %v4754_v35 = vpop.f32.mrb[39].mxu1  ;;  %5285 = vmatprep.subr.bf16.mxu0 %v7565_v34  ;;  %5328 = vmatprep.subr.bf16.mxu1 %v7568_v14  ;;  %v1014_v33 = vrot.slane %v818_v5, %v8347_v3 }
 0x292   : > { %v6615_v12 = vpack.c.bf16 %v4708_v41, %v4706_v38  ;;  %v6616_v52 = vpack.c.bf16 %v4751_v42, %v4749_v39  ;;  %v4712_v53 = vadd.f32 %v4711_v48, %v982_v8  ;;  %v4755_v54 = vadd.f32 %v4754_v35, %v990_v31 }
 0x293   : > { %v1010_v31 = vrot.slane %v818_v5, %v8341_v59  ;;  %v1022_v34 = vrot.slane %v818_v5, %v8352_v6 }
 0x294   : > { %5785 = vst [vmem:[%s8311_s8 + $0x90] sm:$0xff] %v6615_v12  ;;  %5786 = vst [vmem:[%s8311_s8 + $0x98] sm:$0xff] %v6616_v52  ;;  %v6649_v56 = vpack.c.bf16 %v4712_v53, %v4710_v46  ;;  %v6650_v57 = vpack.c.bf16 %v4755_v54, %v4753_v47  ;;  %5286 = vmatpush1.bf16.msra.mxu0 %v7563_v44  ;;  %5329 = vmatpush1.bf16.msra.mxu1 %v7566_v45  ;;  %v819_v52 = vld [vmem:[%s8278_s30 + $0x30] sm:$0xff] }
 0x295   : > { %5287 = vmatprep.subr.bf16.mxu0 %v7571_v49  ;;  %5330 = vmatprep.subr.bf16.mxu1 %v7574_v51  ;;  %v1026_v53 = vrot.slane %v819_v52, %v8273_v61  ;;  %v1034_v54 = vrot.slane %v819_v52, %v8276_v62 }
 0x296   : > { %5819 = vst [vmem:[%s8311_s8 + $0x1a0] sm:$0xff] %v6649_v56  ;;  %5820 = vst [vmem:[%s8311_s8 + $0x1a8] sm:$0xff] %v6650_v57  ;;  %v1030_v56 = vrot.slane %v819_v52, %v8284_v1  ;;  %v1038_v57 = vrot.slane %v819_v52, %v8287_v2 }
 0x298   : > { %5288 = vmatpush1.bf16.msra.mxu0 %v7569_v58  ;;  %5331 = vmatpush1.bf16.msra.mxu1 %v7572_v4 }
 0x29b   : > { %5306 = vmatmul.mubr.bf16.vlgmr.msra.gmra.mrb[64].mxu0 %v8683_v9  ;;  %5349 = vmatmul.mubr.bf16.vlgmr.msra.gmra.mrb[64].mxu1 %v8683_v9 }
 0x2ae   : > { %v4791_v13 = vpop.f32.mrb[40].mxu0  ;;  %v4834_v55 = vpop.f32.mrb[40].mxu1 }
 0x2af   : > { %v4792_v15 = vadd.f32 %v4791_v13, %v994_v7  ;;  %v4835_v16 = vadd.f32 %v4834_v55, %v1002_v10  ;;  %v4793_v17 = vpop.f32.mrb[41].mxu0  ;;  %v4836_v18 = vpop.f32.mrb[41].mxu1 }
 0x2b0   : > { %v4794_v19 = vadd.f32 %v4793_v17, %v998_v11  ;;  %v4837_v9 = vadd.f32 %v4836_v18, %v1006_v50  ;;  %v4795_v21 = vpop.f32.mrb[42].mxu0  ;;  %v4838_v22 = vpop.f32.mrb[42].mxu1 }
 0x2b1   : > { %v4796_v23 = vadd.f32 %v4795_v21, %v994_v7  ;;  %v4839_v0 = vadd.f32 %v4838_v22, %v1002_v10  ;;  %v4797_v24 = vpop.f32.mrb[43].mxu0  ;;  %v4840_v26 = vpop.f32.mrb[43].mxu1 }
 0x2b2   : > { %v6617_v27 = vpack.c.bf16 %v4794_v19, %v4792_v15  ;;  %v6618_v28 = vpack.c.bf16 %v4837_v9, %v4835_v16  ;;  %v4798_v63 = vadd.f32 %v4797_v24, %v998_v11  ;;  %v4841_v29 = vadd.f32 %v4840_v26, %v1006_v50 }
 0x2b3   : > { %v1042_v26 = vrot.slane %v819_v52, %v8341_v59 }
 0x2b4   : > { %5787 = vst [vmem:[%s8311_s8 + $0xa0] sm:$0xff] %v6617_v27  ;;  %5788 = vst [vmem:[%s8311_s8 + $0xa8] sm:$0xff] %v6618_v28  ;;  %v6651_v30 = vpack.c.bf16 %v4798_v63, %v4796_v23  ;;  %v6652_v8 = vpack.c.bf16 %v4841_v29, %v4839_v0  ;;  %v1050_v27 = vrot.slane %v819_v52, %v8344_v60 }
 0x2b5   : > { %v1046_v28 = vrot.slane %v819_v52, %v8347_v3  ;;  %v1054_v63 = vrot.slane %v819_v52, %v8352_v6 }
 0x2b6   : > { %5821 = vst [vmem:[%s8311_s8 + $0x1b0] sm:$0xff] %v6651_v30  ;;  %5822 = vst [vmem:[%s8311_s8 + $0x1b8] sm:$0xff] %v6652_v8 }
 0x2ce   : > { %v4877_v14 = vpop.f32.mrb[44].mxu0  ;;  %v4920_v36 = vpop.f32.mrb[44].mxu1 }
 0x2cf   : > { %v4878_v37 = vadd.f32 %v4877_v14, %v1010_v31  ;;  %v4921_v38 = vadd.f32 %v4920_v36, %v1018_v32  ;;  %v4879_v39 = vpop.f32.mrb[45].mxu0  ;;  %v4922_v20 = vpop.f32.mrb[45].mxu1 }
 0x2d0   : > { %v4880_v40 = vadd.f32 %v4879_v39, %v1014_v33  ;;  %v4923_v41 = vadd.f32 %v4922_v20, %v1022_v34  ;;  %v4881_v42 = vpop.f32.mrb[46].mxu0  ;;  %v4924_v43 = vpop.f32.mrb[46].mxu1 }
 0x2d1   : > { %v4882_v25 = vadd.f32 %v4881_v42, %v1010_v31  ;;  %v4925_v44 = vadd.f32 %v4924_v43, %v1018_v32  ;;  %v4883_v45 = vpop.f32.mrb[47].mxu0  ;;  %v4926_v46 = vpop.f32.mrb[47].mxu1 }
 0x2d2   : > { %v6619_v47 = vpack.c.bf16 %v4880_v40, %v4878_v37  ;;  %v6620_v48 = vpack.c.bf16 %v4923_v41, %v4921_v38  ;;  %v4884_v35 = vadd.f32 %v4883_v45, %v1014_v33  ;;  %v4927_v49 = vadd.f32 %v4926_v46, %v1022_v34  ;;  %v820_v46 = vld [vmem:[%s8278_s30 + $0x38] sm:$0xff] }
 0x2d4   : > { %5789 = vst [vmem:[%s8311_s8 + $0xb0] sm:$0xff] %v6619_v47  ;;  %5790 = vst [vmem:[%s8311_s8 + $0xb8] sm:$0xff] %v6620_v48  ;;  %v6653_v51 = vpack.c.bf16 %v4884_v35, %v4882_v25  ;;  %v6654_v12 = vpack.c.bf16 %v4927_v49, %v4925_v44  ;;  %v1058_v47 = vrot.slane %v820_v46, %v8273_v61 }
 0x2d5   : > { %v1066_v48 = vrot.slane %v820_v46, %v8276_v62  ;;  %v1062_v35 = vrot.slane %v820_v46, %v8284_v1  ;;  %v1070_v49 = vrot.slane %v820_v46, %v8287_v2 }
 0x2d6   : > { %5823 = vst [vmem:[%s8311_s8 + $0x1c0] sm:$0xff] %v6653_v51  ;;  %5824 = vst [vmem:[%s8311_s8 + $0x1c8] sm:$0xff] %v6654_v12 }
 0x2ee   : > { %v4963_v58 = vpop.f32.mrb[48].mxu0  ;;  %v5006_v4 = vpop.f32.mrb[48].mxu1 }
 0x2ef   : > { %v4964_v5 = vadd.f32 %v4963_v58, %v1026_v53  ;;  %v5007_v7 = vadd.f32 %v5006_v4, %v1034_v54  ;;  %v4965_v10 = vpop.f32.mrb[49].mxu0  ;;  %v5008_v11 = vpop.f32.mrb[49].mxu1 }
 0x2f0   : > { %v4966_v50 = vadd.f32 %v4965_v10, %v1030_v56  ;;  %v5009_v13 = vadd.f32 %v5008_v11, %v1038_v57  ;;  %v4967_v55 = vpop.f32.mrb[50].mxu0  ;;  %v5010_v15 = vpop.f32.mrb[50].mxu1 }
 0x2f1   : > { %v4968_v16 = vadd.f32 %v4967_v55, %v1026_v53  ;;  %v5011_v17 = vadd.f32 %v5010_v15, %v1034_v54  ;;  %v4969_v18 = vpop.f32.mrb[51].mxu0  ;;  %v5012_v19 = vpop.f32.mrb[51].mxu1 }
 0x2f2   : > { %v6621_v9 = vpack.c.bf16 %v4966_v50, %v4964_v5  ;;  %v6622_v21 = vpack.c.bf16 %v5009_v13, %v5007_v7  ;;  %v4970_v22 = vadd.f32 %v4969_v18, %v1030_v56  ;;  %v5013_v23 = vadd.f32 %v5012_v19, %v1038_v57 }
 0x2f3   : > { %v1074_v19 = vrot.slane %v820_v46, %v8341_v59 }
 0x2f4   : > { %5791 = vst [vmem:[%s8311_s8 + $0xc0] sm:$0xff] %v6621_v9  ;;  %5792 = vst [vmem:[%s8311_s8 + $0xc8] sm:$0xff] %v6622_v21  ;;  %v6655_v0 = vpack.c.bf16 %v4970_v22, %v4968_v16  ;;  %v6656_v24 = vpack.c.bf16 %v5013_v23, %v5011_v17  ;;  %v1082_v9 = vrot.slane %v820_v46, %v8344_v60 }
 0x2f5   : > { %v1078_v21 = vrot.slane %v820_v46, %v8347_v3  ;;  %v1086_v22 = vrot.slane %v820_v46, %v8352_v6 }
 0x2f6   : > { %5825 = vst [vmem:[%s8311_s8 + $0x1d0] sm:$0xff] %v6655_v0  ;;  %5826 = vst [vmem:[%s8311_s8 + $0x1d8] sm:$0xff] %v6656_v24 }
 0x30e   : > { %v5049_v29 = vpop.f32.mrb[52].mxu0  ;;  %v5092_v30 = vpop.f32.mrb[52].mxu1 }
 0x30f   : > { %v5050_v8 = vadd.f32 %v5049_v29, %v1042_v26  ;;  %v5093_v31 = vadd.f32 %v5092_v30, %v1050_v27  ;;  %v5051_v32 = vpop.f32.mrb[53].mxu0  ;;  %v5094_v33 = vpop.f32.mrb[53].mxu1 }
 0x310   : > { %v5052_v34 = vadd.f32 %v5051_v32, %v1046_v28  ;;  %v5095_v14 = vadd.f32 %v5094_v33, %v1054_v63  ;;  %v5053_v36 = vpop.f32.mrb[54].mxu0  ;;  %v5096_v37 = vpop.f32.mrb[54].mxu1 }
 0x311   : > { %v5054_v38 = vadd.f32 %v5053_v36, %v1042_v26  ;;  %v5097_v39 = vadd.f32 %v5096_v37, %v1050_v27  ;;  %v5055_v20 = vpop.f32.mrb[55].mxu0  ;;  %v5098_v40 = vpop.f32.mrb[55].mxu1  ;;  %v821_v37 = vld [vmem:[%s8278_s30 + $0x40] sm:$0xf] }
 0x312   : > { %v6623_v41 = vpack.c.bf16 %v5052_v34, %v5050_v8  ;;  %v6624_v42 = vpack.c.bf16 %v5095_v14, %v5093_v31  ;;  %v5056_v43 = vadd.f32 %v5055_v20, %v1046_v28  ;;  %v5099_v25 = vadd.f32 %v5098_v40, %v1054_v63 }
 0x313   : > { %v1094_v20 = vrot.slane %v821_v37, %v8284_v1  ;;  %v1102_v40 = vrot.slane %v821_v37, %v8287_v2 }
 0x314   : > { %5793 = vst [vmem:[%s8311_s8 + $0xd0] sm:$0xff] %v6623_v41  ;;  %5794 = vst [vmem:[%s8311_s8 + $0xd8] sm:$0xff] %v6624_v42  ;;  %v6657_v44 = vpack.c.bf16 %v5056_v43, %v5054_v38  ;;  %v6658_v45 = vpack.c.bf16 %v5099_v25, %v5097_v39  ;;  %v1090_v38 = vrot.slane %v821_v37, %v8273_v61 }
 0x315   : > { %v1098_v39 = vrot.slane %v821_v37, %v8276_v62 }
 0x316   : > { %5827 = vst [vmem:[%s8311_s8 + $0x1e0] sm:$0xff] %v6657_v44  ;;  %5828 = vst [vmem:[%s8311_s8 + $0x1e8] sm:$0xff] %v6658_v45 }
 0x32e   : > { %v5135_v51 = vpop.f32.mrb[56].mxu0  ;;  %v5178_v12 = vpop.f32.mrb[56].mxu1 }
 0x32f   : > { %v5136_v52 = vadd.f32 %v5135_v51, %v1058_v47  ;;  %v5179_v53 = vadd.f32 %v5178_v12, %v1066_v48  ;;  %v5137_v54 = vpop.f32.mrb[57].mxu0  ;;  %v5180_v56 = vpop.f32.mrb[57].mxu1 }
 0x330   : > { %v5138_v57 = vadd.f32 %v5137_v54, %v1062_v35  ;;  %v5181_v58 = vadd.f32 %v5180_v56, %v1070_v49  ;;  %v5139_v4 = vpop.f32.mrb[58].mxu0  ;;  %v5182_v5 = vpop.f32.mrb[58].mxu1 }
 0x331   : > { %v5140_v7 = vadd.f32 %v5139_v4, %v1058_v47  ;;  %v5183_v10 = vadd.f32 %v5182_v5, %v1066_v48  ;;  %v5141_v11 = vpop.f32.mrb[59].mxu0  ;;  %v5184_v50 = vpop.f32.mrb[59].mxu1 }
 0x332   : > { %v6625_v13 = vpack.c.bf16 %v5138_v57, %v5136_v52  ;;  %v6626_v55 = vpack.c.bf16 %v5181_v58, %v5179_v53  ;;  %v5142_v15 = vadd.f32 %v5141_v11, %v1062_v35  ;;  %v5185_v16 = vadd.f32 %v5184_v50, %v1070_v49 }
 0x334   : > { %5795 = vst [vmem:[%s8311_s8 + $0xe0] sm:$0xff] %v6625_v13  ;;  %5796 = vst [vmem:[%s8311_s8 + $0xe8] sm:$0xff] %v6626_v55  ;;  %v6659_v17 = vpack.c.bf16 %v5142_v15, %v5140_v7  ;;  %v6660_v18 = vpack.c.bf16 %v5185_v16, %v5183_v10 }
 0x336   : > { %5829 = vst [vmem:[%s8311_s8 + $0x1f0] sm:$0xff] %v6659_v17  ;;  %5830 = vst [vmem:[%s8311_s8 + $0x1f8] sm:$0xff] %v6660_v18 }
 0x34e   : > { %v5221_v23 = vpop.f32.mrb[60].mxu0  ;;  %v5264_v0 = vpop.f32.mrb[60].mxu1 }
 0x34f   : > { %v5222_v24 = vadd.f32 %v5221_v23, %v1074_v19  ;;  %v5265_v26 = vadd.f32 %v5264_v0, %v1082_v9  ;;  %v5223_v27 = vpop.f32.mrb[61].mxu0  ;;  %v5266_v28 = vpop.f32.mrb[61].mxu1 }
 0x350   : > { %v5224_v63 = vadd.f32 %v5223_v27, %v1078_v21  ;;  %v5267_v29 = vadd.f32 %v5266_v28, %v1086_v22  ;;  %v5225_v30 = vpop.f32.mrb[62].mxu0  ;;  %v5268_v59 = vpop.f32.mrb[62].mxu1 }
 0x351   : > { %v5226_v60 = vadd.f32 %v5225_v30, %v1074_v19  ;;  %v5269_v8 = vadd.f32 %v5268_v59, %v1082_v9  ;;  %v5227_v3 = vpop.f32.mrb[63].mxu0  ;;  %v5270_v31 = vpop.f32.mrb[63].mxu1 }
 0x352   : > { %v6627_v6 = vpack.c.bf16 %v5224_v63, %v5222_v24  ;;  %v6628_v32 = vpack.c.bf16 %v5267_v29, %v5265_v26  ;;  %v5228_v33 = vadd.f32 %v5227_v3, %v1078_v21  ;;  %v5271_v34 = vadd.f32 %v5270_v31, %v1086_v22 }
 0x354   : > { %5797 = vst [vmem:[%s8311_s8 + $0xf0] sm:$0xff] %v6627_v6  ;;  %5798 = vst [vmem:[%s8311_s8 + $0xf8] sm:$0xff] %v6628_v32  ;;  %v6661_v14 = vpack.c.bf16 %v5228_v33, %v5226_v60  ;;  %v6662_v36 = vpack.c.bf16 %v5271_v34, %v5269_v8 }
 0x356   : > { %5831 = vst [vmem:[%s8311_s8 + $0x200] sm:$0xff] %v6661_v14  ;;  %5832 = vst [vmem:[%s8311_s8 + $0x208] sm:$0xff] %v6662_v36 }
 0x36e   : > { %v5307_v41 = vpop.f32.mrb[64].mxu0  ;;  %v5350_v42 = vpop.f32.mrb[64].mxu1 }
 0x36f   : > { %v5308_v43 = vadd.f32 %v5307_v41, %v1090_v38  ;;  %v5351_v25 = vadd.f32 %v5350_v42, %v1098_v39  ;;  %v5309_v44 = vpop.f32.mrb[65].mxu0  ;;  %v5352_v45 = vpop.f32.mrb[65].mxu1 }
 0x370   : > { %v5310_v46 = vadd.f32 %v5309_v44, %v1094_v20  ;;  %v5353_v47 = vadd.f32 %v5352_v45, %v1102_v40  ;;  %v5311_v48 = vpop.f32.mrb[66].mxu0  ;;  %v5354_v35 = vpop.f32.mrb[66].mxu1 }
 0x371   : > { %v5312_v61 = vadd.f32 %v5311_v48, %v1090_v38  ;;  %v5355_v62 = vadd.f32 %v5354_v35, %v1098_v39  ;;  %v5313_v1 = vpop.f32.mrb[67].mxu0  ;;  %v5356_v2 = vpop.f32.mrb[67].mxu1 }
 0x372   : > { %v6629_v49 = vpack.c.bf16 %v5310_v46, %v5308_v43  ;;  %v6630_v51 = vpack.c.bf16 %v5353_v47, %v5351_v25  ;;  %v5314_v12 = vadd.f32 %v5313_v1, %v1094_v20  ;;  %v5357_v52 = vadd.f32 %v5356_v2, %v1102_v40 }
 0x374   : > { %5799 = vst [vmem:[%s8311_s8 + $0x100] sm:$0xff] %v6629_v49  ;;  %5800 = vst [vmem:[%s8311_s8 + $0x108] sm:$0xff] %v6630_v51  ;;  %v6663_v53 = vpack.c.bf16 %v5314_v12, %v5312_v61  ;;  %v6664_v54 = vpack.c.bf16 %v5357_v52, %v5355_v62 }
 0x376   : > { %5833 = vst [vmem:[%s8311_s8 + $0x210] sm:$0xff] %v6663_v53  ;;  %5834 = vst [vmem:[%s8311_s8 + $0x218] sm:$0xff] %v6664_v54 }
 0x377   : > { %7679 = shalt.err (!%p7676_p8)
}
 0x378   : > { %s7680_s18 = scalar_lea.hbm %s8841_s21, 8704  ;;  %s7684_s6 = scalar_lea.hbm %s8899_s3, 17408 }
 0x379   : > { %p7681_p10 = scmp.ne.s32.totalorder %s8841_s21, %s7680_s18  ;;  %p7685_p3 = scmp.lt.u32.totalorder %s8841_s21, %s8899_s3 }
 0x37a   : > { %p7686_p2 = scmp.lt.u32.totalorder %s7684_s6, %s7680_s18  ;;  %p7688_p4 = scmp.lt.u32.totalorder %s7680_s18, %s8841_s21 }
 0x37b   : > { %p7682_p13 = pnand %p7681_p10, %p8924_p6 }
 0x37c   : > { %p7687_p11 = por %p7686_p2, %p7685_p3 }
 0x37d   : > { %p7683_p7 = pneg %p7682_p13 }
 0x37e   : > { %p7689_p1 = por %p7688_p4, %p7687_p11 }
 0x380   : > { %p7690_p12 = pnand %p7689_p1, %p7683_p7 }
 0x382   : > { %7693 = shalt.err (!%p7690_p12)
}
 0x383   : > { %s7764_s30 = smov 4352   ;;  %s7765_s7 = smov 8704  }
 0x384   : > { %s7766_s8 = smov 272  }
 0x385   : > { %6679 = dma.vmem_to_hbm [thread:$0]  (%p8924_p6), %s8843_s27, 8704, %s8841_s21, %s5836_s23, %s7764_s30, %s7765_s7, %s7766_s8  }
 0x386 PF: > { %s5867_s25 = sand.u32 1, %s7732_s12   ;;  %p8925_p0 = scmp.ne.s32.totalorder %s8914_s4, 0 }
 0x387   : > { %p8926_p9 = scmp.ge.s32.totalorder %s7752_s17, 2  ;;  %s5868_s15 = scalar_lea.sflag [#allocation4], %s5867_s25 }
 0x389   : > { %p6693_p5 = pnand %p8926_p9, %p8925_p0 }
 0x38b   : > { %7727 = dma.done.wait (!%p6693_p5), %s5868_s15, 8704  }
 0x38c   : > { %7729 = vsyncadd (!%p6693_p5), %s5868_s15, 4294958592  ;;  %s20_s17 = sadd.s32 1, %s7752_s17   ;;  %s8927_s28 = sld [smem:[#allocation12_spill]] }
 0x38d   : > { %p17_p8 = scmp.ge.s32.totalorder %s20_s17, 4   ;;  %s8928_s12 = smov %s7736_s13 }
 0x38e   : > { %s8929_s13 = smov %s7740_s14  ;;  %s8930_s14 = smov %s7835_s24 }
 0x38f   : > { %s8931_s15 = smov %s7748_s16  ;;  %19 = sbr.rel (!%p17_p8) target bundleno = 9 (0x9), region = 94 }
 0x392   : > { %s8932_s16 = smov %s8927_s28 }
 0x396   :  { %5873 = vsyncpa [#allocation3], 1 }
 0x397   :  { %5875 = vsyncpa [#allocation3 + $0x1], 1 }
 0x398   :  { %5876 = vsyncpa [#allocation6], 1 }
 0x399   :  { %5878 = vsyncpa [#allocation6 + $0x1], 1 }
 0x39a   :  { %5879 = vsyncpa [#allocation4], 1 }
 0x39b   :  { %5881 = vsyncpa [#allocation4 + $0x1], 1 }

</bundles_post_ra>
